<compile_context>
chip_gen: v5e
topology: v5e:2x2
jax: 0.10.0
libtpu: 0.0.40
codegen_flags: <defaults>
</compile_context>

<pallas_src>
import math
import functools

import numpy as np
import jax
import jax.numpy as jnp
from jax.experimental import pallas as pl
from jax.experimental.pallas import tpu as pltpu

WINDOW_SIZE = 11
SIGMA = 1.5
C1 = 0.01 ** 2
C2 = 0.03 ** 2


def gaussian_1d(window_size=WINDOW_SIZE, sigma=SIGMA):
    g = [math.exp(-((x - window_size // 2) ** 2) / (2.0 * sigma ** 2))
         for x in range(window_size)]
    s = sum(g)
    return [v / s for v in g]


def _ssim_kernel(i1_ref, i2_ref, gh_ref, gvt_ref, cinfo_ref, out_ref, *, K, BC):
    """One grid step: TG groups of K lane-packed, zero-padded images."""
    i1 = i1_ref[...]                        # (TG, Hp_pad, Lin) f32
    i2 = i2_ref[...]
    gh = gh_ref[...]                        # (Lin, Lout) banded horizontal Gaussian
    gvt = gvt_ref[...]                      # (H, Hp_pad) banded vertical Gaussian^T
    TG, Hp_pad, Lin = i1.shape
    H = gvt.shape[0]
    Lout = gh.shape[1]

    # Products formed once on the raw padded slabs (padding zeros square to 0).
    sq1 = i1 * i1
    sq2 = i2 * i2
    x12 = i1 * i2

    def hconv(x):
        # Horizontal (lane-axis) Gaussian as a 2-D MXU matmul.
        x2 = x.reshape(TG * Hp_pad, Lin)    # layout-trivial: Hp_pad % 8 == 0
        r = jnp.dot(x2, gh,
                    precision=jax.lax.Precision.HIGHEST,
                    preferred_element_type=jnp.float32)
        return r.reshape(TG, Hp_pad, Lout)

    # Vertical (sublane-axis) Gaussian as a batched MXU matmul (batch = TG).
    gvt_b = jnp.broadcast_to(gvt[None], (TG, H, Hp_pad))   # hoisted once

    def vconv(x):
        return jax.lax.dot_general(
            gvt_b, x, (((2,), (1,)), ((0,), (0,))),
            precision=jax.lax.Precision.HIGHEST,
            preferred_element_type=jnp.float32)             # (TG, H, Lout)

    mu1 = vconv(hconv(i1))
    mu2 = vconv(hconv(i2))
    e11 = vconv(hconv(sq1))
    e22 = vconv(hconv(sq2))
    e12 = vconv(hconv(x12))

    mu1_sq = mu1 * mu1
    mu2_sq = mu2 * mu2
    mu1_mu2 = mu1 * mu2
    sigma1_sq = e11 - mu1_sq
    sigma2_sq = e22 - mu2_sq
    sigma12 = e12 - mu1_mu2

    num = (2.0 * mu1_mu2 + C1) * (2.0 * sigma12 + C2)
    den = (mu1_sq + mu2_sq + C1) * (sigma1_sq + sigma2_sq + C2)   # always > 0
    r = pl.reciprocal(den, approx=True)     # EUP slot
    r = r * (2.0 - den * r)                 # one Newton step -> ~1e-7 rel err
    ssim_map = num * r                      # (TG, H, Lout)

    # In-kernel validity mask: static column validity + column->slot index come
    # from the tiny resident cinfo table; the phantom-image check uses
    # program_id (exact small integers in f32, VALU-only).
    cinfo = cinfo_ref[...]                  # (2, Lout)
    col_valid = cinfo[0:1, :]               # (1, Lout)
    slot = cinfo[1:2, :]                    # (1, Lout)
    t_idx = jax.lax.broadcasted_iota(jnp.int32, (TG, Lout), 0).astype(jnp.float32)
    grp = (pl.program_id(0) * TG).astype(jnp.float32) + t_idx
    img_id = grp * float(K) + slot
    mask = col_valid * jnp.where(img_id < float(BC), 1.0, 0.0)   # (TG, Lout)

    # Lane-dense partial sums for this step (no cross-lane reduce here).
    red = jnp.sum(ssim_map, axis=1) * mask          # (TG, Lout)
    lane = jnp.sum(red, axis=0, keepdims=True)      # (1, Lout)
    out_ref[...] = jnp.broadcast_to(lane, out_ref.shape)


def ssim_loss(img1, img2, window_size=WINDOW_SIZE):
    """1 - mean(SSIM map), matching SSIM.forward with size_average=True."""
    assert img1.shape == img2.shape
    assert window_size % 2 == 1
    B, C, H, W = img1.shape
    pad = window_size // 2
    Hp, Wp = H + 2 * pad, W + 2 * pad
    BC = B * C
    win = window_size

    # Lane packing: K padded images side by side, lane width padded up to a
    # multiple of 128 so every vreg / MXU tile is full.
    K = max(1, 128 // Wp)
    KWp = K * Wp
    Lin = -(-KWp // 128) * 128              # padded input lane width
    L = KWp - 2 * pad                       # valid conv-output lane extent
    Lout = -(-L // 128) * 128               # padded output lane width
    Hp_pad = -(-Hp // 8) * 8                # sublane-aligned padded height

    per_group_bytes = Hp_pad * Lin * 4
    G_raw = -(-BC // K)

    # Generation-aware block sizing (v7x: 64 MiB VMEM; v5e/v6e: 128 MiB).
    try:
        vmem_cap = int(pltpu.get_tpu_info().vmem_capacity_bytes)
    except Exception:
        vmem_cap = 64 * 1024 * 1024         # conservative (v7x) fallback
    budget = min(vmem_cap // 2, 24 * 1024 * 1024)
    # ~20x live working set per input block (2 inputs x 2 buffers + temps).
    TG = max(1, min(G_raw, budget // (22 * per_group_bytes)))
    if G_raw >= 2:                          # >= 2 grid steps -> both v7x TCs fed
        TG = min(TG, -(-G_raw // 2))
    num_steps = -(-G_raw // TG)
    G = num_steps * TG
    n_img = G * K

    def pack(x):
        # TODO(synk): this pad/transpose prepass costs extra HBM round trips on
        # v5e; folding it into the kernel's index_map would need per-image DMA.
        xp = jnp.pad(x.astype(jnp.float32),
                     ((0, 0), (0, 0), (pad, pad), (pad, pad)))
        xp = xp.reshape(BC, Hp, Wp)
        xp = jnp.pad(xp, ((0, n_img - BC), (0, 0), (0, 0)))
        xp = (xp.reshape(G, K, Hp, Wp)
                .transpose(0, 2, 1, 3)
                .reshape(G, Hp, KWp))
        return jnp.pad(xp, ((0, 0), (0, Hp_pad - Hp), (0, Lin - KWp)))

    i1p = pack(img1)
    i2p = pack(img2)

    g = gaussian_1d(window_size, SIGMA)

    # Banded horizontal Gaussian: out[l] = sum_d g[d] * x[l + d].
    gh_np = np.zeros((Lin, Lout), np.float32)
    for l in range(L):
        for d in range(win):
            gh_np[l + d, l] = g[d]
    # Banded vertical Gaussian (transposed): out[h] = sum_d g[d] * x[h + d].
    gvt_np = np.zeros((H, Hp_pad), np.float32)
    for h in range(H):
        for d in range(win):
            gvt_np[h, h + d] = g[d]
    # Column info: row 0 = static column validity, row 1 = column -> image slot.
    ci_np = np.zeros((2, Lout), np.float32)
    for c in range(Lout):
        ci_np[1, c] = min(c // Wp, K - 1)
        if c < L and (c % Wp) < W:
            ci_np[0, c] = 1.0

    kernel = functools.partial(_ssim_kernel, K=K, BC=BC)

    partial_tiles = pl.pallas_call(
        kernel,
        out_shape=jax.ShapeDtypeStruct((num_steps * 8, Lout), jnp.float32),
        grid=(num_steps,),
        in_specs=[
            pl.BlockSpec((TG, Hp_pad, Lin), lambda i: (i, 0, 0)),
            pl.BlockSpec((TG, Hp_pad, Lin), lambda i: (i, 0, 0)),
            pl.BlockSpec((Lin, Lout), lambda i: (0, 0)),   # resident, DMA'd once
            pl.BlockSpec((H, Hp_pad), lambda i: (0, 0)),   # resident, DMA'd once
            pl.BlockSpec((2, Lout), lambda i: (0, 0)),     # resident, DMA'd once
        ],
        out_specs=pl.BlockSpec((8, Lout), lambda i: (i, 0)),
        compiler_params=pltpu.CompilerParams(
            dimension_semantics=("parallel",),
            vmem_limit_bytes=int(max(32 * 1024 * 1024,
                                     min(vmem_cap // 2, 64 * 1024 * 1024)))),
    )(i1p, i2p, jnp.asarray(gh_np), jnp.asarray(gvt_np), jnp.asarray(ci_np))

    lane_partials = partial_tiles.reshape(num_steps, 8, Lout)[:, 0, :]
    mean_ssim = jnp.sum(lane_partials) / float(BC * H * W)
    return 1.0 - mean_ssim


def ssim_loss_reference(img1, img2, window_size=WINDOW_SIZE):
    """Pure-JAX reference mirroring the PyTorch module (depthwise conv2d)."""
    B, C, H, W = img1.shape
    pad = window_size // 2
    g = jnp.asarray(gaussian_1d(window_size, SIGMA), jnp.float32)
    win2d = jnp.outer(g, g)
    w = jnp.broadcast_to(win2d, (C, 1, window_size, window_size))

    def conv(x):
        return jax.lax.conv_general_dilated(
            x, w, window_strides=(1, 1), padding=[(pad, pad), (pad, pad)],
            dimension_numbers=("NCHW", "OIHW", "NCHW"), feature_group_count=C)

    mu1 = conv(img1)
    mu2 = conv(img2)
    mu1_sq, mu2_sq, mu1_mu2 = mu1 ** 2, mu2 ** 2, mu1 * mu2
    sigma1_sq = conv(img1 * img1) - mu1_sq
    sigma2_sq = conv(img2 * img2) - mu2_sq
    sigma12 = conv(img1 * img2) - mu1_mu2
    ssim_map = ((2 * mu1_mu2 + C1) * (2 * sigma12 + C2)) / (
        (mu1_sq + mu2_sq + C1) * (sigma1_sq + sigma2_sq + C2))
    return 1.0 - jnp.mean(ssim_map)


if __name__ == "__main__":
    key = jax.random.PRNGKey(0)
    k1, k2 = jax.random.split(key)
    # Small image-like inputs in [0, 1]: batch=2, channels=4, spatial=16x16.
    img1 = jax.nn.sigmoid(jax.random.normal(k1, (2, 4, 16, 16), jnp.float32))
    img2 = jax.nn.sigmoid(jax.random.normal(k2, (2, 4, 16, 16), jnp.float32))

    out = ssim_loss(img1, img2)
    out = jax.block_until_ready(out)

    ref = jax.block_until_ready(ssim_loss_reference(img1, img2))
    assert abs(float(out) - float(ref)) < 1e-4, (float(out), float(ref))

    print("KERNEL_OK")
</pallas_src>

<mosaic_0001>
module attributes {stable_mosaic.version = 11 : i64} {
  func.func @_ssim_kernel(%arg0: i32, %arg1: memref<1x32x128xf32, #tpu.memory_space<vmem>>, %arg2: memref<1x32x128xf32, #tpu.memory_space<vmem>>, %arg3: memref<128x128xf32, #tpu.memory_space<vmem>>, %arg4: memref<16x32xf32, #tpu.memory_space<vmem>>, %arg5: memref<2x128xf32, #tpu.memory_space<vmem>>, %arg6: memref<8x128xf32, #tpu.memory_space<vmem>>) attributes {dimension_semantics = [#tpu.dimension_semantics<parallel>], iteration_bounds = array<i64: 2>, scalar_prefetch = 0 : i64, scratch_operands = 0 : i64, tpu.core_type = #tpu.core_type<tc>, window_params = [{transform_indices = @transform_0, window_bounds = array<i64: 1, 32, 128>}, {transform_indices = @transform_1, window_bounds = array<i64: 1, 32, 128>}, {pipeline_mode = #tpu.pipeline_mode<synchronous>, transform_indices = @transform_2, window_bounds = array<i64: 128, 128>}, {pipeline_mode = #tpu.pipeline_mode<synchronous>, transform_indices = @transform_3, window_bounds = array<i64: 16, 32>}, {pipeline_mode = #tpu.pipeline_mode<synchronous>, transform_indices = @transform_4, window_bounds = array<i64: 2, 128>}, {transform_indices = @transform_5, window_bounds = array<i64: 8, 128>}]} {
    %c0 = arith.constant 0 : index
    %c0_0 = arith.constant 0 : index
    %c0_1 = arith.constant 0 : index
    %0 = vector.load %arg1[%c0, %c0_0, %c0_1] : memref<1x32x128xf32, #tpu.memory_space<vmem>>, vector<1x32x128xf32>
    %c0_2 = arith.constant 0 : index
    %c0_3 = arith.constant 0 : index
    %c0_4 = arith.constant 0 : index
    %1 = vector.load %arg2[%c0_2, %c0_3, %c0_4] : memref<1x32x128xf32, #tpu.memory_space<vmem>>, vector<1x32x128xf32>
    %c0_5 = arith.constant 0 : index
    %c0_6 = arith.constant 0 : index
    %2 = vector.load %arg3[%c0_5, %c0_6] : memref<128x128xf32, #tpu.memory_space<vmem>>, vector<128x128xf32>
    %c0_7 = arith.constant 0 : index
    %c0_8 = arith.constant 0 : index
    %3 = vector.load %arg4[%c0_7, %c0_8] : memref<16x32xf32, #tpu.memory_space<vmem>>, vector<16x32xf32>
    %4 = arith.mulf %0, %0 : vector<1x32x128xf32>
    %5 = arith.mulf %1, %1 : vector<1x32x128xf32>
    %6 = arith.mulf %0, %1 : vector<1x32x128xf32>
    %7 = vector.shape_cast %3 : vector<16x32xf32> to vector<1x16x32xf32>
    %8 = vector.shape_cast %0 : vector<1x32x128xf32> to vector<32x128xf32>
    %cst = arith.constant dense<0.000000e+00> : vector<32x128xf32>
    %9 = tpu.matmul %8, %2, %cst {dimension_numbers = #tpu.dot_dimension_numbers<[1], [0], [0], [1], [0, 0, 1, 1], [], []>, precision = #tpu.contract_precision<fp32>} : vector<32x128xf32>, vector<128x128xf32>, vector<32x128xf32> -> vector<32x128xf32>
    %10 = vector.shape_cast %9 : vector<32x128xf32> to vector<1x32x128xf32>
    %cst_9 = arith.constant dense<0.000000e+00> : vector<1x16x128xf32>
    %11 = tpu.matmul %7, %10, %cst_9 {dimension_numbers = #tpu.dot_dimension_numbers<[2], [1], [1], [2], [0, 0, 0, 1, 1, 2], [0], [0]>, precision = #tpu.contract_precision<fp32>} : vector<1x16x32xf32>, vector<1x32x128xf32>, vector<1x16x128xf32> -> vector<1x16x128xf32>
    %12 = vector.shape_cast %1 : vector<1x32x128xf32> to vector<32x128xf32>
    %cst_10 = arith.constant dense<0.000000e+00> : vector<32x128xf32>
    %13 = tpu.matmul %12, %2, %cst_10 {dimension_numbers = #tpu.dot_dimension_numbers<[1], [0], [0], [1], [0, 0, 1, 1], [], []>, precision = #tpu.contract_precision<fp32>} : vector<32x128xf32>, vector<128x128xf32>, vector<32x128xf32> -> vector<32x128xf32>
    %14 = vector.shape_cast %13 : vector<32x128xf32> to vector<1x32x128xf32>
    %cst_11 = arith.constant dense<0.000000e+00> : vector<1x16x128xf32>
    %15 = tpu.matmul %7, %14, %cst_11 {dimension_numbers = #tpu.dot_dimension_numbers<[2], [1], [1], [2], [0, 0, 0, 1, 1, 2], [0], [0]>, precision = #tpu.contract_precision<fp32>} : vector<1x16x32xf32>, vector<1x32x128xf32>, vector<1x16x128xf32> -> vector<1x16x128xf32>
    %16 = vector.shape_cast %4 : vector<1x32x128xf32> to vector<32x128xf32>
    %cst_12 = arith.constant dense<0.000000e+00> : vector<32x128xf32>
    %17 = tpu.matmul %16, %2, %cst_12 {dimension_numbers = #tpu.dot_dimension_numbers<[1], [0], [0], [1], [0, 0, 1, 1], [], []>, precision = #tpu.contract_precision<fp32>} : vector<32x128xf32>, vector<128x128xf32>, vector<32x128xf32> -> vector<32x128xf32>
    %18 = vector.shape_cast %17 : vector<32x128xf32> to vector<1x32x128xf32>
    %cst_13 = arith.constant dense<0.000000e+00> : vector<1x16x128xf32>
    %19 = tpu.matmul %7, %18, %cst_13 {dimension_numbers = #tpu.dot_dimension_numbers<[2], [1], [1], [2], [0, 0, 0, 1, 1, 2], [0], [0]>, precision = #tpu.contract_precision<fp32>} : vector<1x16x32xf32>, vector<1x32x128xf32>, vector<1x16x128xf32> -> vector<1x16x128xf32>
    %20 = vector.shape_cast %5 : vector<1x32x128xf32> to vector<32x128xf32>
    %cst_14 = arith.constant dense<0.000000e+00> : vector<32x128xf32>
    %21 = tpu.matmul %20, %2, %cst_14 {dimension_numbers = #tpu.dot_dimension_numbers<[1], [0], [0], [1], [0, 0, 1, 1], [], []>, precision = #tpu.contract_precision<fp32>} : vector<32x128xf32>, vector<128x128xf32>, vector<32x128xf32> -> vector<32x128xf32>
    %22 = vector.shape_cast %21 : vector<32x128xf32> to vector<1x32x128xf32>
    %cst_15 = arith.constant dense<0.000000e+00> : vector<1x16x128xf32>
    %23 = tpu.matmul %7, %22, %cst_15 {dimension_numbers = #tpu.dot_dimension_numbers<[2], [1], [1], [2], [0, 0, 0, 1, 1, 2], [0], [0]>, precision = #tpu.contract_precision<fp32>} : vector<1x16x32xf32>, vector<1x32x128xf32>, vector<1x16x128xf32> -> vector<1x16x128xf32>
    %24 = vector.shape_cast %6 : vector<1x32x128xf32> to vector<32x128xf32>
    %cst_16 = arith.constant dense<0.000000e+00> : vector<32x128xf32>
    %25 = tpu.matmul %24, %2, %cst_16 {dimension_numbers = #tpu.dot_dimension_numbers<[1], [0], [0], [1], [0, 0, 1, 1], [], []>, precision = #tpu.contract_precision<fp32>} : vector<32x128xf32>, vector<128x128xf32>, vector<32x128xf32> -> vector<32x128xf32>
    %26 = vector.shape_cast %25 : vector<32x128xf32> to vector<1x32x128xf32>
    %cst_17 = arith.constant dense<0.000000e+00> : vector<1x16x128xf32>
    %27 = tpu.matmul %7, %26, %cst_17 {dimension_numbers = #tpu.dot_dimension_numbers<[2], [1], [1], [2], [0, 0, 0, 1, 1, 2], [0], [0]>, precision = #tpu.contract_precision<fp32>} : vector<1x16x32xf32>, vector<1x32x128xf32>, vector<1x16x128xf32> -> vector<1x16x128xf32>
    %28 = arith.mulf %11, %11 : vector<1x16x128xf32>
    %29 = arith.mulf %15, %15 : vector<1x16x128xf32>
    %30 = arith.mulf %11, %15 : vector<1x16x128xf32>
    %31 = arith.subf %19, %28 : vector<1x16x128xf32>
    %32 = arith.subf %23, %29 : vector<1x16x128xf32>
    %33 = arith.subf %27, %30 : vector<1x16x128xf32>
    %cst_18 = arith.constant 2.000000e+00 : f32
    %34 = vector.broadcast %cst_18 : f32 to vector<1x16x128xf32>
    %35 = arith.mulf %34, %30 : vector<1x16x128xf32>
    %cst_19 = arith.constant 9.99999974E-5 : f32
    %36 = vector.broadcast %cst_19 : f32 to vector<1x16x128xf32>
    %37 = arith.addf %35, %36 : vector<1x16x128xf32>
    %cst_20 = arith.constant 2.000000e+00 : f32
    %38 = vector.broadcast %cst_20 : f32 to vector<1x16x128xf32>
    %39 = arith.mulf %38, %33 : vector<1x16x128xf32>
    %cst_21 = arith.constant 8.99999984E-4 : f32
    %40 = vector.broadcast %cst_21 : f32 to vector<1x16x128xf32>
    %41 = arith.addf %39, %40 : vector<1x16x128xf32>
    %42 = arith.mulf %37, %41 : vector<1x16x128xf32>
    %43 = arith.addf %28, %29 : vector<1x16x128xf32>
    %cst_22 = arith.constant 9.99999974E-5 : f32
    %44 = vector.broadcast %cst_22 : f32 to vector<1x16x128xf32>
    %45 = arith.addf %43, %44 : vector<1x16x128xf32>
    %46 = arith.addf %31, %32 : vector<1x16x128xf32>
    %cst_23 = arith.constant 8.99999984E-4 : f32
    %47 = vector.broadcast %cst_23 : f32 to vector<1x16x128xf32>
    %48 = arith.addf %46, %47 : vector<1x16x128xf32>
    %49 = arith.mulf %45, %48 : vector<1x16x128xf32>
    %50 = tpu.reciprocal %49 {approx = true} : vector<1x16x128xf32> -> vector<1x16x128xf32>
    %51 = arith.mulf %49, %50 : vector<1x16x128xf32>
    %cst_24 = arith.constant 2.000000e+00 : f32
    %52 = vector.broadcast %cst_24 : f32 to vector<1x16x128xf32>
    %53 = arith.subf %52, %51 : vector<1x16x128xf32>
    %54 = arith.mulf %50, %53 : vector<1x16x128xf32>
    %55 = arith.mulf %42, %54 : vector<1x16x128xf32>
    %c0_25 = arith.constant 0 : index
    %c0_26 = arith.constant 0 : index
    %56 = vector.load %arg5[%c0_25, %c0_26] : memref<2x128xf32, #tpu.memory_space<vmem>>, vector<2x128xf32>
    %57 = vector.extract_strided_slice %56 {offsets = [0, 0], sizes = [1, 128], strides = [1, 1]} : vector<2x128xf32> to vector<1x128xf32>
    %58 = vector.extract_strided_slice %56 {offsets = [1, 0], sizes = [1, 128], strides = [1, 1]} : vector<2x128xf32> to vector<1x128xf32>
    %59 = tpu.iota {dimensions = array<i32: 0>} : vector<1x128xi32>
    %60 = arith.sitofp %59 : vector<1x128xi32> to vector<1x128xf32>
    %c1_i32 = arith.constant 1 : i32
    %61 = arith.muli %arg0, %c1_i32 : i32
    %62 = arith.sitofp %61 : i32 to f32
    %63 = vector.broadcast %62 : f32 to vector<1x128xf32>
    %64 = arith.addf %63, %60 : vector<1x128xf32>
    %cst_27 = arith.constant 4.000000e+00 : f32
    %65 = vector.broadcast %cst_27 : f32 to vector<1x128xf32>
    %66 = arith.mulf %64, %65 : vector<1x128xf32>
    %67 = arith.addf %66, %58 : vector<1x128xf32>
    %cst_28 = arith.constant 8.000000e+00 : f32
    %68 = vector.broadcast %cst_28 : f32 to vector<1x128xf32>
    %69 = arith.cmpf olt, %67, %68 : vector<1x128xf32>
    %cst_29 = arith.constant 1.000000e+00 : f32
    %cst_30 = arith.constant 0.000000e+00 : f32
    %70 = vector.broadcast %cst_29 : f32 to vector<1x128xf32>
    %71 = vector.broadcast %cst_30 : f32 to vector<1x128xf32>
    %72 = arith.select %69, %70, %71 : vector<1x128xi1>, vector<1x128xf32>
    %73 = arith.mulf %57, %72 : vector<1x128xf32>
    %cst_31 = arith.constant dense<0.000000e+00> : vector<1x128xf32>
    %74 = vector.multi_reduction <add>, %55, %cst_31 [1] : vector<1x16x128xf32> to vector<1x128xf32>
    %75 = arith.mulf %74, %73 : vector<1x128xf32>
    %cst_32 = arith.constant dense<0.000000e+00> : vector<128xf32>
    %76 = vector.multi_reduction <add>, %75, %cst_32 [0] : vector<1x128xf32> to vector<128xf32>
    %77 = vector.shape_cast %76 : vector<128xf32> to vector<1x128xf32>
    %78 = vector.shape_cast %77 : vector<1x128xf32> to vector<1x128xf32>
    %79 = vector.broadcast %78 : vector<1x128xf32> to vector<8x128xf32>
    %c0_33 = arith.constant 0 : index
    %c0_34 = arith.constant 0 : index
    %80 = vector.load %arg6[%c0_33, %c0_34] : memref<8x128xf32, #tpu.memory_space<vmem>>, vector<8x128xf32>
    tpu.vector_store %arg6[%c0_33, %c0_34], %79 {strides = array<i32>} : memref<8x128xf32, #tpu.memory_space<vmem>>, vector<8x128xf32>,
    return
  }
  func.func @transform_0(%arg0: i32) -> (i32, i32, i32) {
    %c0_i32 = arith.constant 0 : i32
    %c0_i32_0 = arith.constant 0 : i32
    %c0_i32_1 = arith.constant 0 : i32
    return %arg0, %c0_i32, %c0_i32_0 : i32, i32, i32
  }
  func.func @transform_1(%arg0: i32) -> (i32, i32, i32) {
    %c0_i32 = arith.constant 0 : i32
    %c0_i32_0 = arith.constant 0 : i32
    %c0_i32_1 = arith.constant 0 : i32
    return %arg0, %c0_i32, %c0_i32_0 : i32, i32, i32
  }
  func.func @transform_2(%arg0: i32) -> (i32, i32) {
    %c0_i32 = arith.constant 0 : i32
    %c0_i32_0 = arith.constant 0 : i32
    %c0_i32_1 = arith.constant 0 : i32
    return %c0_i32, %c0_i32_0 : i32, i32
  }
  func.func @transform_3(%arg0: i32) -> (i32, i32) {
    %c0_i32 = arith.constant 0 : i32
    %c0_i32_0 = arith.constant 0 : i32
    %c0_i32_1 = arith.constant 0 : i32
    return %c0_i32, %c0_i32_0 : i32, i32
  }
  func.func @transform_4(%arg0: i32) -> (i32, i32) {
    %c0_i32 = arith.constant 0 : i32
    %c0_i32_0 = arith.constant 0 : i32
    %c0_i32_1 = arith.constant 0 : i32
    return %c0_i32, %c0_i32_0 : i32, i32
  }
  func.func @transform_5(%arg0: i32) -> (i32, i32) {
    %c0_i32 = arith.constant 0 : i32
    %c0_i32_0 = arith.constant 0 : i32
    return %arg0, %c0_i32 : i32, i32
  }
}

</mosaic_0001>

<bundles_post_ra>
// kernel: tpu_custom_call.1
= control target key start
LH: loop header
LB: loop body
LE: loop exit
PB: predicated region body
PF: predicated region fallthrough
CT: control target
= control target key end

     0   :  { %s5495_s0 = inlined_call_operand.hbm [shape: f32[2,32,128], index: 0, kind: input, shape index: {}]   ;;  %s5496_s1 = inlined_call_operand.hbm [shape: f32[2,32,128], index: 1, kind: input, shape index: {}]   ;;  %s5497_s2 = inlined_call_operand.hbm [shape: f32[128,128], index: 2, kind: input, shape index: {}]   ;;  %s5498_s3 = inlined_call_operand.hbm [shape: f32[16,32], index: 3, kind: input, shape index: {}]   ;;  %s5499_s4 = inlined_call_operand.vmem [shape: f32[2,128], index: 4, kind: input, shape index: {}]   ;;  %s5500_s5 = inlined_call_operand.hbm [shape: f32[16,128], index: 5, kind: output, shape index: {}]  }
   0x1   :  { %5614 = sst [smem:[#allocation89_spill]] %s5495_s0 }
   0x2   :  { %5615 = sst [smem:[#allocation90_spill]] %s5497_s2 }
   0x3   :  { %5616 = sst [smem:[#allocation91_spill]] %s5498_s3 }
   0x4   :  { %10 = vsyncpa [#allocation3], 0 }
   0x5   :  { %12 = vsyncpa [#allocation3 + $0x1], 0 }
   0x6   :  { %13 = vsyncpa [#allocation6], 0 }
   0x7   :  { %15 = vsyncpa [#allocation6 + $0x1], 0 }
   0x8   :  { %16 = vsyncpa [#allocation9], 0 }
   0x9   :  { %17 = vsyncpa [#allocation4], 0 }
   0xa   :  { %19 = vsyncpa [#allocation4 + $0x1], 0  ;;  %s4192_s18 = smov 0   ;;  %s4194_s19 = smov 0  }
   0xb   :  { %s4196_s20 = smov 0   ;;  %s4198_s21 = smov 0  }
   0xc LB: > { %s4213_s22 = sadd.s32 4294967295, %s4155_s21   ;;  %s3811_s23 = sadd.s32 4294967294, %s4155_s21   ;;  %s4155_s21 = sphi %s4198_s21, %s5904_s21   ;;  %s4151_s20 = sphi %s4196_s20, %s5903_s20   ;;  %s4147_s19 = sphi %s4194_s19, %s5902_s19   ;;  %s4143_s18 = sphi %s4192_s18, %s5901_s18  }
   0xd   : > { %p45_p0 = scmp.ne.s32.totalorder %s4147_s19, %s4143_s18  ;;  %p46_p1 = scmp.eq.s32.totalorder %s4213_s22, 0 }
   0xe   : > { %p158_p2 = scmp.eq.s32.totalorder %s4213_s22, 1  ;;  %p164_p3 = scmp.eq.s32.totalorder %s3811_s23, 1 }
   0xf   : > { %p4222_p4 = por %p46_p1, %p45_p0  ;;  %p3812_p5 = scmp.ge.s32.totalorder %s4155_s21, 1 }
  0x10   : > { %p4227_p6 = por %p164_p3, %p45_p0  ;;  %p171_p7 = scmp.lt.s32.totalorder %s4155_s21, 3 }
  0x11   : > { %s5619_s2 = sld [smem:[#allocation90_spill]]  ;;  %s4157_s30 = smov [#allocation7]  }
  0x12   : > { %p4235_p8 = pnand %p3812_p5, %p171_p7  ;;  %s184_s6 = sshll.u32 %s4157_s30, 4  ;;  %s185_s6 = int_to_ptr.vmem [resolvable:$true] %s184_s6 }
  0x13   : > { %s5621_s3 = sld [smem:[#allocation91_spill]]  ;;  %s5501_s10 = smov 128  }
  0x14   : > { %p3880_p9 = pneg %p4235_p8  ;;  %s5503_s11 = smov 8  }
  0x15   : > { %s4160_s12 = smov [#allocation8]   ;;  %s4254_s14 = sadd.s32 1, %s4155_s21  }
  0x16   : > { %p3881_p10 = pnand %p3880_p9, %p46_p1  ;;  %s198_s13 = sshll.u32 %s4160_s12, 4  ;;  %s199_s13 = int_to_ptr.vmem [resolvable:$true] %s198_s13 }
  0x17   : > { %s182_s28 = sshll.u32 %s5619_s2, 4  ;;  %s32_s15 = sadd.s32 1, %s4151_s20  ;;  %s183_s28 = int_to_ptr.hbm [resolvable:$true] %s182_s28 }
  0x18   : > { %3883 = dma.hbm_to_vmem [thread:$0]  (!%p3881_p10), %s183_s28, 2048, %s185_s6, [#allocation6], %s5501_s10, %s5501_s10, %s5503_s11  }
  0x19   : > { %s196_s9 = sshll.u32 %s5621_s3, 4  ;;  %s29_s16 = ssub.s32 %s4155_s21, %s4254_s14  ;;  %s197_s9 = int_to_ptr.hbm [resolvable:$true] %s196_s9 }
  0x1a   : > { %3886 = dma.hbm_to_vmem [thread:$0]  (!%p3881_p10), %s197_s9, 256, %s199_s13, [#allocation9], %s5501_s10, %s5501_s10, %s5503_s11  }
  0x1b   : > { %p39_p12 = scmp.ne.s32.totalorder %s4151_s20, %s4147_s19  ;;  %p30_p13 = scmp.eq.s32.totalorder %s29_s16, 0 }
  0x1c   : > { %p40_p0 = scmp.eq.s32.totalorder %s4155_s21, 0  ;;  %p3900_p5 = scmp.lt.s32.totalorder %s4155_s21, 2 }
  0x1d   : > { %p4264_p3 = por %p158_p2, %p39_p12  ;;  %s215_s26 = sand.u32 1, %s4151_s20  }
  0x1e   : > { %s4270_s23 = scalar_select %p30_p13, %s4151_s20, %s32_s15  }
  0x1f   : > { %p41_p7 = por %p40_p0, %p39_p12  ;;  %s4273_s27 = sshll.u32 %s215_s26, 5 }
  0x20   : > { %5623 = sst [smem:[#allocation16_spill]] %s4270_s23  ;;  %s3832_s28 = sshll.u32 %s4155_s21, 5 }
  0x21   : > { %s5624_s0 = sld [smem:[#allocation89_spill]]  ;;  %s219_s8 = scalar_lea.vmem [#allocation2], %s4273_s27 }
  0x22   : > { %s227_s9 = sshll.u32 %s219_s8, 4  ;;  %p4280_p2 = pnand %p3900_p5, %p41_p7  ;;  %s228_s9 = int_to_ptr.vmem [resolvable:$true] %s227_s9 }
  0x23   : > { %s246_s10 = scalar_lea.hbm %s5496_s1, %s3832_s28  ;;  %s216_s2 = scalar_lea.sflag [#allocation3], %s215_s26 }
  0x24   : > { %s247_s11 = sshll.u32 %s246_s10, 4  ;;  %p4021_p10 = pneg %p4280_p2  ;;  %s248_s11 = int_to_ptr.hbm [resolvable:$true] %s247_s11 }
  0x27   : > { %s224_s7 = scalar_lea.hbm %s5624_s0, %s3832_s28  ;;  %s4024_s8 = scalar_lea.hbm %s5624_s0, 64 }
  0x28   : > { %s225_s12 = sshll.u32 %s224_s7, 4  ;;  %s226_s12 = int_to_ptr.hbm [resolvable:$true] %s225_s12 }
  0x29   : > { %s4017_s3 = sshra.s32 %s226_s12, 4  ;;  %s4018_s3 = int_to_ptr.hbm [resolvable:$true] %s4017_s3 }
  0x2a   : > { %s4019_s30 = scalar_lea.hbm %s4018_s3, 32  ;;  %p4025_p0 = scmp.lt.s32.totalorder %s4018_s3, %s5624_s0 }
  0x2b   : > { %p4020_p9 = scmp.ne.s32.totalorder %s4018_s3, %s4019_s30  ;;  %p4026_p5 = scmp.lt.s32.totalorder %s4024_s8, %s4019_s30 }
  0x2d   : > { %p4022_p12 = pnand %p4021_p10, %p4020_p9  ;;  %p4027_p7 = por %p4026_p5, %p4025_p0 }
  0x2f   : > { %p4023_p13 = pneg %p4022_p12 }
  0x31   : > { %p4028_p11 = pnand %p4027_p7, %p4023_p13 }
  0x33   : > { %4031 = shalt.err (!%p4028_p11)
}
  0x34   : > { %s5626_s10 = smov 8   ;;  %s5627_s26 = smov 128  }
  0x35   : > { %3890 = dma.hbm_to_vmem [thread:$0]  (!%p4280_p2), %s226_s12, 512, %s228_s9, %s216_s2, %s5627_s26, %s5627_s26, %s5626_s10  }
  0x36   : > { %s241_s28 = scalar_lea.vmem [#allocation5], %s4273_s27  ;;  %s237_s7 = sand.u32 1, %s4155_s21  }
  0x37   : > { %s249_s6 = sshll.u32 %s241_s28, 4  ;;  %s238_s15 = scalar_lea.sflag [#allocation6], %s237_s7  ;;  %s250_s6 = int_to_ptr.vmem [resolvable:$true] %s249_s6 }
  0x38   : > { %s4047_s3 = sshra.s32 %s248_s11, 4  ;;  %s4054_s0 = scalar_lea.hbm %s5496_s1, 64  ;;  %s4048_s3 = int_to_ptr.hbm [resolvable:$true] %s4047_s3 }
  0x39   : > { %s4049_s30 = scalar_lea.hbm %s4048_s3, 32  ;;  %p4055_p13 = scmp.lt.s32.totalorder %s4048_s3, %s5496_s1 }
  0x3a   : > { %p4050_p9 = scmp.ne.s32.totalorder %s4048_s3, %s4049_s30  ;;  %p4056_p0 = scmp.lt.s32.totalorder %s4054_s0, %s4049_s30 }
  0x3c   : > { %p4052_p11 = pnand %p4050_p9, %p4021_p10  ;;  %p4057_p5 = por %p4056_p0, %p4055_p13 }
  0x3e   : > { %p4053_p12 = pneg %p4052_p11 }
  0x40   : > { %p4058_p7 = pnand %p4057_p5, %p4053_p12 }
  0x42   : > { %4061 = shalt.err (!%p4058_p7)
}
  0x43   : > { %3893 = dma.hbm_to_vmem [thread:$0]  (!%p4280_p2), %s248_s11, 512, %s250_s6, %s238_s15, %s5627_s26, %s5627_s26, %s5626_s10  }
  0x44   : > { %261 = sbr.rel (%p4235_p8) target bundleno = 1499 (0x5db), region = 40 }
  0x49   : > { %s4322_s27 = sand.u32 1, %s4147_s19  }
  0x4a   : > { %s3823_s23 = sshll.u32 %s4322_s27, 5  ;;  %s264_s0 = scalar_lea.sflag [#allocation3], %s4322_s27 }
  0x4b   : > { %s4326_s9 = scalar_lea.vmem [#allocation2], %s3823_s23 }
  0x4c   : > { %4122 = dma.done.wait (%p4222_p4), %s264_s0, 512  }
  0x4d   : > { %4124 = vsyncadd (%p4222_p4), %s264_s0, 4294966784  ;;  %s273_s11 = sand.u32 1, %s4213_s22   ;;  %s4333_s12 = scalar_lea.vmem [#allocation5], %s3823_s23 }
  0x4e   : > { %s274_s29 = scalar_lea.sflag [#allocation6], %s273_s11 }
  0x4f   : > { %4126 = dma.done.wait (%p4222_p4), %s274_s29, 512  }
  0x50   : > { %4128 = vsyncadd (%p4222_p4), %s274_s29, 4294966784 }
  0x51   : > { %4130 = dma.done.wait (%p46_p1), [#allocation6], 2048  }
  0x52   : > { %4132 = vsyncadd (%p46_p1), [#allocation6], 4294965248 }
  0x53   : > { %4134 = dma.done.wait (%p46_p1), [#allocation9], 256  }
  0x54   : > { %4136 = vsyncadd (%p46_p1), [#allocation9], 4294967040  ;;  %v343_v0 = vld [vmem:[#allocation7 + $0x78] sm:$0xff]  ;;  %v342_v1 = vld [vmem:[#allocation7 + $0x70] sm:$0xff]  ;;  %vm792_vm0 = vcmask 261120   ;;  %s3661_s24 = scvt.s32.f32 %s4213_s22  ;;  %s3827_s26 = sshll.u32 %s4322_s27, 3 }
  0x55   : > { %v341_v2 = vld [vmem:[#allocation7 + $0x68] sm:$0xff]  ;;  %v4347_v3 = vand.u32 4294901760, %v343_v0  ;;  %v4349_v4 = vand.u32 4294901760, %v342_v1  ;;  %v340_v6 = vld [vmem:[#allocation7 + $0x60] sm:$0xff]  ;;  %v339_v7 = vld [vmem:[#allocation7 + $0x58] sm:$0xff]  ;;  %s3829_s28 = sshll.u32 %s4213_s22, 3 }
  0x56   : > { %v4351_v5 = vand.u32 4294901760, %v341_v2  ;;  %v338_v8 = vld [vmem:[#allocation7 + $0x50] sm:$0xff]  ;;  %v4353_v9 = vand.u32 4294901760, %v340_v6  ;;  %v4355_v10 = vand.u32 4294901760, %v339_v7  ;;  %v337_v12 = vld [vmem:[#allocation7 + $0x48] sm:$0xff]  ;;  %v336_v13 = vld [vmem:[#allocation7 + $0x40] sm:$0xff]  ;;  %s3694_s15 = scalar_lea.hbm %s5500_s5, %s3829_s28 }
  0x57   : > { %v4357_v11 = vand.u32 4294901760, %v338_v8  ;;  %359 = vmatpush.msra.mxu0 %v4347_v3  ;;  %v4361_v14 = vsub.f32 %v343_v0, %v4347_v3  ;;  %v4364_v15 = vsub.f32 %v342_v1, %v4349_v4  ;;  %606 = vmatpush.msra.mxu3 %v4347_v3  ;;  %v4370_v17 = vand.u32 4294901760, %v337_v12  ;;  %v335_v18 = vld [vmem:[#allocation7 + $0x38] sm:$0xff]  ;;  %v334_v29 = vld [vmem:[#allocation7 + $0x30] sm:$0xff]  ;;  %v333_v36 = vld [vmem:[#allocation7 + $0x28] sm:$0xff]  ;;  %s319_s3 = scalar_lea.vmem [#allocation10], %s3827_s26 }
  0x58   : > { %v4368_v16 = vsub.f32 %v341_v2, %v4351_v5  ;;  %v4373_v19 = vsub.f32 %v340_v6, %v4353_v9  ;;  %v4376_v20 = vsub.f32 %v339_v7, %v4355_v10  ;;  %v4381_v22 = vand.u32 4294901760, %v336_v13  ;;  %v332_v43 = vld [vmem:[#allocation7 + $0x20] sm:$0xff]  ;;  %v331_v49 = vld [vmem:[#allocation7 + $0x18] sm:$0xff]  ;;  %v330_v55 = vld [vmem:[#allocation7 + $0x10] sm:$0xff]  ;;  %s3696_s30 = sshll.u32 %s319_s3, 4  ;;  %s3698_s8 = sshll.u32 %s3694_s15, 4  ;;  %s3697_s30 = int_to_ptr.vmem [resolvable:$true] %s3696_s30  ;;  %s3699_s8 = int_to_ptr.hbm [resolvable:$true] %s3698_s8 }
  0x59   : > { %v4379_v21 = vsub.f32 %v338_v8, %v4357_v11  ;;  %361 = vmatpush.msra.mxu0 %v4349_v4  ;;  %538 = vmatpush.msra.mxu2 %v4361_v14  ;;  %v4386_v23 = vand.u32 4294901760, %v4361_v14  ;;  %v4389_v24 = vand.u32 4294901760, %v4364_v15  ;;  %v4399_v27 = vsub.f32 %v337_v12, %v4370_v17  ;;  %v320_v56 = vld [vmem:[%s4326_s9] sm:$0xff]  ;;  %v329_v62 = vld [vmem:[#allocation7 + $0x8] sm:$0xff]  ;;  %s3684_s16 = scalar_lea.sflag [#allocation4], %s4322_s27  ;;  %s4091_s2 = sshra.s32 %s3699_s8, 4  ;;  %s4092_s2 = int_to_ptr.hbm [resolvable:$true] %s4091_s2 }
  0x5a   : > { %v4392_v25 = vand.u32 4294901760, %v4368_v16  ;;  %608 = vmatpush.msra.mxu3 %v4349_v4  ;;  %v4396_v26 = vand.u32 4294901760, %v4373_v19  ;;  %v4401_v28 = vand.u32 4294901760, %v335_v18  ;;  %v4412_v33 = vand.u32 4294901760, %v4376_v20  ;;  %v328_v8 = vld [vmem:[#allocation7] sm:$0xff]  ;;  %s4093_s22 = scalar_lea.hbm %s4092_s2, 8  ;;  %p4098_p2 = scmp.lt.s32.totalorder %s4092_s2, %s5500_s5 }
  0x5b   : > { %5628 = vst [vmem:[#allocation17_spill] sm:$0xff] %v4386_v23  ;;  %363 = vmatpush.msra.mxu0 %v4351_v5  ;;  %541 = vmatpush.msra.mxu2 %v4364_v15  ;;  %v426_v30 = vsub.f32 %v4361_v14, %v4386_v23  ;;  %v432_v31 = vsub.f32 %v4364_v15, %v4389_v24  ;;  %v4419_v35 = vand.u32 4294901760, %v4379_v21  ;;  %v4429_v40 = vand.u32 4294901760, %v334_v29  ;;  %p4094_p1 = scmp.ne.s32.totalorder %s4092_s2, %s4093_s22 }
  0x5c   : > { %5629 = vst [vmem:[#allocation18_spill] sm:$0xff] %v4389_v24  ;;  %v438_v32 = vsub.f32 %v4368_v16, %v4392_v25  ;;  %610 = vmatpush.msra.mxu3 %v4351_v5  ;;  %v4416_v34 = vsub.f32 %v336_v13, %v4381_v22  ;;  %v444_v39 = vsub.f32 %v4373_v19, %v4396_v26  ;;  %v4436_v42 = vand.u32 4294901760, %v4399_v27 }
  0x5d   : > { %5630 = vst [vmem:[#allocation19_spill] sm:$0xff] %v4392_v25  ;;  %365 = vmatpush.msra.mxu0 %v4353_v9  ;;  %544 = vmatpush.msra.mxu2 %v4368_v16  ;;  %v4423_v37 = vand.u32 4294901760, %v426_v30  ;;  %v4425_v38 = vand.u32 4294901760, %v432_v31  ;;  %v4433_v41 = vsub.f32 %v335_v18, %v4401_v28  ;;  %v450_v45 = vsub.f32 %v4376_v20, %v4412_v33  ;;  %v321_v31 = vld [vmem:[%s4326_s9 + $0x8] sm:$0xff]  ;;  %p4095_p4 = pnand %p4094_p1, %p4264_p3 }
  0x5e   : > { %5631 = vst [vmem:[#allocation20_spill] sm:$0xff] %v4396_v26  ;;  %612 = vmatpush.msra.mxu3 %v4353_v9  ;;  %v4440_v44 = vand.u32 4294901760, %v438_v32  ;;  %v4444_v46 = vand.u32 4294901760, %v333_v36  ;;  %v456_v47 = vsub.f32 %v4379_v21, %v4419_v35  ;;  %v4451_v48 = vand.u32 4294901760, %v4416_v34 }
  0x5f   : > { %5632 = vst [vmem:[#allocation21_spill] sm:$0xff] %v4412_v33  ;;  %367 = vmatpush.msra.mxu0 %v4355_v10  ;;  %428 = vmatpush.msra.mxu1 %v4423_v37  ;;  %v4455_v50 = vand.u32 4294901760, %v444_v39  ;;  %v4458_v51 = vsub.f32 %v334_v29, %v4429_v40  ;;  %v4460_v52 = vand.u32 4294901760, %v332_v43  ;;  %v462_v53 = vsub.f32 %v4399_v27, %v4436_v42  ;;  %p4096_p8 = pneg %p4095_p4 }
  0x60   : > { %5633 = vst [vmem:[#allocation22_spill] sm:$0xff] %v4416_v34  ;;  %547 = vmatpush.msra.mxu2 %v4373_v19  ;;  %614 = vmatpush.msra.mxu3 %v4355_v10  ;;  %v4467_v54 = vand.u32 4294901760, %v4433_v41  ;;  %v4472_v57 = vand.u32 4294901760, %v450_v45  ;;  %v4475_v58 = vsub.f32 %v333_v36, %v4444_v46  ;;  %v4477_v59 = vand.u32 4294901760, %v331_v49 }
  0x61   : > { %5634 = vst [vmem:[#allocation23_spill] sm:$0xff] %v4419_v35  ;;  %369 = vmatpush.msra.mxu0 %v4357_v11  ;;  %434 = vmatpush.msra.mxu1 %v4425_v38  ;;  %v4481_v60 = vand.u32 4294901760, %v456_v47  ;;  %v468_v61 = vsub.f32 %v4416_v34, %v4451_v48  ;;  %v4488_v63 = vsub.f32 %v332_v43, %v4460_v52  ;;  %v4490_v0 = vand.u32 4294901760, %v330_v55 }
  0x62   : > { %5635 = vst [vmem:[#allocation24_spill] sm:$0xff] %v4429_v40  ;;  %550 = vmatpush.msra.mxu2 %v4376_v20  ;;  %616 = vmatpush.msra.mxu3 %v4357_v11  ;;  %v4493_v1 = vand.u32 4294901760, %v4458_v51  ;;  %v4495_v2 = vand.u32 4294901760, %v320_v56  ;;  %v4499_v6 = vand.u32 4294901760, %v462_v53  ;;  %v474_v7 = vsub.f32 %v4433_v41, %v4467_v54 }
  0x63   : > { %5636 = vst [vmem:[#allocation25_spill] sm:$0xff] %v4433_v41  ;;  %371 = vmatpush.msra.mxu0 %v4370_v17  ;;  %440 = vmatpush.msra.mxu1 %v4440_v44  ;;  %v4506_v12 = vsub.f32 %v331_v49, %v4477_v59  ;;  %v4508_v13 = vand.u32 4294901760, %v329_v62  ;;  %v4511_v18 = vand.u32 4294901760, %v4475_v58  ;;  %v4518_v30 = vand.u32 4294901760, %v468_v61 }
  0x64   : > { %5637 = vst [vmem:[#allocation26_spill] sm:$0xff] %v4436_v42  ;;  %553 = vmatpush.msra.mxu2 %v4379_v21  ;;  %618 = vmatpush.msra.mxu3 %v4370_v17  ;;  %v4514_v29 = vsub.f32 %v320_v56, %v4495_v2  ;;  %v480_v32 = vsub.f32 %v4458_v51, %v4493_v1  ;;  %v4528_v39 = vand.u32 4294901760, %v328_v8  ;;  %v4531_v43 = vand.u32 4294901760, %v4488_v63 }
  0x65   : > { %5638 = vst [vmem:[#allocation27_spill] sm:$0xff] %v4444_v46  ;;  %373 = vmatpush.msra.mxu0 %v4381_v22  ;;  %446 = vmatpush.msra.mxu1 %v4455_v50  ;;  %v4526_v36 = vsub.f32 %v330_v55, %v4490_v0  ;;  %v4535_v45 = vand.u32 4294901760, %v474_v7  ;;  %v486_v49 = vsub.f32 %v4475_v58, %v4511_v18  ;;  %v4546_v55 = vand.u32 4294901760, %v4506_v12 }
  0x66   : > { %5639 = vst [vmem:[#allocation28_spill] sm:$0xff] %v4451_v48  ;;  %556 = vmatpush.msra.mxu2 %v4399_v27  ;;  %620 = vmatpush.msra.mxu3 %v4381_v22  ;;  %v392_v47 = vand.u32 4294901760, %v4514_v29  ;;  %v4543_v53 = vsub.f32 %v329_v62, %v4508_v13  ;;  %v4548_v56 = vand.u32 4294901760, %v321_v31  ;;  %v4554_v61 = vand.u32 4294901760, %v480_v32 }
  0x67   : > { %5640 = vst [vmem:[#allocation29_spill] sm:$0xff] %v4458_v51  ;;  %375 = vmatpush.msra.mxu0 %v4401_v28  ;;  %452 = vmatpush.msra.mxu1 %v4472_v57  ;;  %v492_v7 = vsub.f32 %v4488_v63, %v4531_v43  ;;  %v4559_v62 = vsub.f32 %v328_v8, %v4528_v39  ;;  %v4569_v32 = vand.u32 4294901760, %v486_v49 }
  0x68   : > { %5641 = vst [vmem:[#allocation30_spill] sm:$0xff] %v4460_v52  ;;  %559 = vmatpush.msra.mxu2 %v4416_v34  ;;  %622 = vmatpush.msra.mxu3 %v4401_v28  ;;  %v498_v8 = vsub.f32 %v4506_v12, %v4546_v55 }
  0x69   : > { %5642 = vst [vmem:[#allocation31_spill] sm:$0xff] %v4467_v54  ;;  %377 = vmatpush.msra.mxu0 %v4429_v40  ;;  %458 = vmatpush.msra.mxu1 %v4481_v60 }
  0x6a   : > { %5643 = vst [vmem:[#allocation32_spill] sm:$0xff] %v4475_v58  ;;  %562 = vmatpush.msra.mxu2 %v4433_v41  ;;  %624 = vmatpush.msra.mxu3 %v4429_v40  ;;  %v4562_v41 = vand.u32 4294901760, %v4526_v36  ;;  %v4595_v34 = vand.u32 4294901760, %v498_v8 }
  0x6b   : > { %5644 = vst [vmem:[#allocation33_spill] sm:$0xff] %v4477_v59  ;;  %379 = vmatpush.msra.mxu0 %v4444_v46  ;;  %464 = vmatpush.msra.mxu1 %v4499_v6 }
  0x6c   : > { %5645 = vst [vmem:[#allocation34_spill] sm:$0xff] %v4481_v60  ;;  %565 = vmatpush.msra.mxu2 %v4458_v51  ;;  %626 = vmatpush.msra.mxu3 %v4444_v46  ;;  %v393_v51 = vsub.f32 %v4514_v29, %v392_v47  ;;  %v504_v49 = vsub.f32 %v4526_v36, %v4562_v41 }
  0x6d   : > { %5646 = vst [vmem:[#allocation35_spill] sm:$0xff] %v4488_v63  ;;  %381 = vmatpush.msra.mxu0 %v4460_v52  ;;  %470 = vmatpush.msra.mxu1 %v4518_v30 }
  0x6e   : > { %5647 = vst [vmem:[#allocation36_spill] sm:$0xff] %v4490_v0  ;;  %568 = vmatpush.msra.mxu2 %v4475_v58  ;;  %628 = vmatpush.msra.mxu3 %v4460_v52  ;;  %v4583_v58 = vand.u32 4294901760, %v492_v7 }
  0x6f   : > { %5648 = vst [vmem:[#allocation37_spill] sm:$0xff] %v4493_v1  ;;  %383 = vmatpush.msra.mxu0 %v4477_v59  ;;  %476 = vmatpush.msra.mxu1 %v4535_v45 }
  0x70   : > { %5649 = vst [vmem:[#allocation38_spill] sm:$0xff] %v4499_v6  ;;  %v4577_v6 = vsub.f32 %v321_v31, %v4548_v56  ;;  %571 = vmatpush.msra.mxu2 %v4488_v63  ;;  %630 = vmatpush.msra.mxu3 %v4477_v59  ;;  %v394_v31 = vand.u32 4294901760, %v393_v51  ;;  %v322_v63 = vld [vmem:[%s4326_s9 + $0x10] sm:$0xff]  ;;  %v4604_v51 = vand.u32 4294901760, %v504_v49 }
  0x71   : > { %5650 = vst [vmem:[#allocation39_spill] sm:$0xff] %v4506_v12  ;;  %385 = vmatpush.msra.mxu0 %v4490_v0  ;;  %482 = vmatpush.msra.mxu1 %v4554_v61  ;;  %v4608_v8 = vand.u32 4294901760, %v322_v63 }
  0x72   : > { %5651 = vst [vmem:[#allocation40_spill] sm:$0xff] %v4508_v13  ;;  %574 = vmatpush.msra.mxu2 %v4506_v12  ;;  %632 = vmatpush.msra.mxu3 %v4490_v0 }
  0x73   : > { %5652 = vst [vmem:[#allocation41_spill] sm:$0xff] %v4511_v18  ;;  %387 = vmatpush.msra.mxu0 %v4508_v13  ;;  %488 = vmatpush.msra.mxu1 %v4569_v32 }
  0x74   : > { %5653 = vst [vmem:[#allocation42_spill] sm:$0xff] %v4518_v30  ;;  %v4574_v30 = vand.u32 4294901760, %v4543_v53  ;;  %577 = vmatpush.msra.mxu2 %v4526_v36  ;;  %634 = vmatpush.msra.mxu3 %v4508_v13 }
  0x75   : > { %5654 = vst [vmem:[#allocation43_spill] sm:$0xff] %v4526_v36  ;;  %389 = vmatpush.msra.mxu0 %v4528_v39  ;;  %494 = vmatpush.msra.mxu1 %v4583_v58 }
  0x76   : > { %5655 = vst [vmem:[#allocation44_spill] sm:$0xff] %v4528_v39  ;;  %v510_v7 = vsub.f32 %v4543_v53, %v4574_v30  ;;  %580 = vmatpush.msra.mxu2 %v4543_v53  ;;  %395 = vmatmul.f32.vlgmr.msra.gmra.mxu0 %v394_v31  ;;  %v407_v31 = vsub.f32 %v322_v63, %v4608_v8 }
  0x77   : > { %5656 = vst [vmem:[#allocation45_spill] sm:$0xff] %v4531_v43  ;;  %500 = vmatpush.msra.mxu1 %v4595_v34  ;;  %665 = vmatpush.msrb.mxu0 %v4386_v23 }
  0x78   : > { %5657 = vst [vmem:[#allocation46_spill] sm:$0xff] %v4535_v45  ;;  %v4588_v45 = vand.u32 4294901760, %v4559_v62  ;;  %v4613_v36 = vand.u32 4294901760, %v510_v7  ;;  %583 = vmatpush.msra.mxu2 %v4559_v62  ;;  %636 = vmatpush.msra.mxu3 %v4528_v39 }
  0x79   : > { %5658 = vst [vmem:[#allocation47_spill] sm:$0xff] %v4543_v53  ;;  %586 = vmatmul.f32.vlgmr.msra.gmra.mxu2 %v4514_v29  ;;  %506 = vmatpush.msra.mxu1 %v4604_v51 }
  0x7a   : > { %5659 = vst [vmem:[#allocation48_spill] sm:$0xff] %v4546_v55  ;;  %v516_v12 = vsub.f32 %v4559_v62, %v4588_v45  ;;  %3834 = vmatpush.msrb.mxu2 %v4386_v23  ;;  %669 = vmatpush.msrb.mxu0 %v4389_v24 }
  0x7b   : > { %5660 = vst [vmem:[#allocation49_spill] sm:$0xff] %v4554_v61  ;;  %v400_v61 = vand.u32 4294901760, %v4577_v6  ;;  %640 = vmatmul.f32.vlgmr.msra.gmra.mxu3 %v392_v47  ;;  %512 = vmatpush.msra.mxu1 %v4613_v36 }
  0x7c   : > { %5661 = vst [vmem:[#allocation50_spill] sm:$0xff] %v4559_v62  ;;  %v4620_v49 = vand.u32 4294901760, %v516_v12  ;;  %3835 = vmatpush.msrb.mxu2 %v4389_v24  ;;  %673 = vmatpush.msrb.mxu0 %v4392_v25  ;;  %v323_v62 = vld [vmem:[%s4326_s9 + $0x18] sm:$0xff]  ;;  %v408_v12 = vand.u32 4294901760, %v407_v31 }
  0x7d   : > { %5662 = vst [vmem:[#allocation51_spill] sm:$0xff] %v4562_v41  ;;  %3850 = vmatpush.msrb.mxu3 %v4347_v3  ;;  %v4634_v63 = vand.u32 4294901760, %v323_v62 }
  0x7e   : > { %5663 = vst [vmem:[#allocation52_spill] sm:$0xff] %v4569_v32  ;;  %v401_v32 = vsub.f32 %v4577_v6, %v400_v61  ;;  %518 = vmatpush.msra.mxu1 %v4620_v49  ;;  %3836 = vmatpush.msrb.mxu2 %v4392_v25  ;;  %v409_v29 = vsub.f32 %v407_v31, %v408_v12 }
  0x7f   : > { %5664 = vst [vmem:[#allocation53_spill] sm:$0xff] %v4574_v30  ;;  %677 = vmatpush.msrb.mxu0 %v4396_v26  ;;  %3851 = vmatpush.msrb.mxu3 %v4349_v4  ;;  %v415_v47 = vsub.f32 %v323_v62, %v4634_v63 }
  0x80   : > { %5665 = vst [vmem:[#allocation54_spill] sm:$0xff] %v4583_v58  ;;  %v402_v7 = vand.u32 4294901760, %v401_v32  ;;  %520 = vmatmul.f32.vlgmr.msra.gmra.mxu1 %v4495_v2  ;;  %3837 = vmatpush.msrb.mxu2 %v4396_v26  ;;  %v410_v32 = vand.u32 4294901760, %v409_v29  ;;  %v344_v26 = vld [vmem:[#allocation8] sm:$0xff] }
  0x81   : > { %5666 = vst [vmem:[#allocation55_spill] sm:$0xff] %v4588_v45  ;;  %681 = vmatpush.msrb.mxu0 %v4412_v33  ;;  %744 = vmatpush.msrb.mxu1 %v4347_v3 }
  0x82   : > { %5667 = vst [vmem:[#allocation56_spill] sm:$0xff] %v4595_v34  ;;  %403 = vmatmul.f32.gmra.mxu0 %v402_v7  ;;  %3852 = vmatpush.msrb.mxu3 %v4351_v5 }
  0x83   : > { %5668 = vst [vmem:[#allocation57_spill] sm:$0xff] %v4604_v51  ;;  %591 = vmatmul.f32.gmra.mxu2 %v4577_v6  ;;  %685 = vmatpush.msrb.mxu0 %v4419_v35  ;;  %v416_v6 = vand.u32 4294901760, %v415_v47  ;;  %v794_v51 = vsel %vm792_vm0, %v344_v26, 0  ;;  %v345_v26 = vld [vmem:[#allocation8 + $0x8] sm:$0xff] }
  0x84   : > { %5669 = vst [vmem:[#allocation58_spill] sm:$0xff] %v4613_v36  ;;  %3838 = vmatpush.msrb.mxu2 %v4412_v33  ;;  %746 = vmatpush.msrb.mxu1 %v4349_v4 }
  0x85   : > { %5670 = vst [vmem:[#allocation59_spill] sm:$0xff] %v4620_v49  ;;  %3853 = vmatpush.msrb.mxu3 %v4353_v9  ;;  %689 = vmatpush.msrb.mxu0 %v4436_v42 }
  0x86   : > { %646 = vmatmul.f32.gmra.mxu3 %v400_v61  ;;  %3839 = vmatpush.msrb.mxu2 %v4419_v35  ;;  %v417_v61 = vsub.f32 %v415_v47, %v416_v6 }
  0x87   : > { %748 = vmatpush.msrb.mxu1 %v4351_v5  ;;  %3854 = vmatpush.msrb.mxu3 %v4355_v10 }
  0x88   : > { %3840 = vmatpush.msrb.mxu2 %v4436_v42  ;;  %693 = vmatpush.msrb.mxu0 %v4451_v48  ;;  %v418_v62 = vand.u32 4294901760, %v417_v61 }
  0x89   : > { %750 = vmatpush.msrb.mxu1 %v4353_v9  ;;  %3855 = vmatpush.msrb.mxu3 %v4357_v11 }
  0x8a   : > { %411 = vmatmul.f32.gmra.mxu0 %v410_v32  ;;  %524 = vmatmul.f32.gmra.mxu1 %v4548_v56 }
  0x8b   : > { %3841 = vmatpush.msrb.mxu2 %v4451_v48  ;;  %697 = vmatpush.msrb.mxu0 %v4467_v54 }
  0x8c   : > { %752 = vmatpush.msrb.mxu1 %v4355_v10  ;;  %3856 = vmatpush.msrb.mxu3 %v4370_v17 }
  0x8d   : > { %596 = vmatmul.f32.gmra.mxu2 %v407_v31  ;;  %701 = vmatpush.msrb.mxu0 %v4493_v1 }
  0x8e   : > { %3842 = vmatpush.msrb.mxu2 %v4467_v54  ;;  %754 = vmatpush.msrb.mxu1 %v4357_v11 }
  0x8f   : > { %3857 = vmatpush.msrb.mxu3 %v4381_v22  ;;  %705 = vmatpush.msrb.mxu0 %v4511_v18 }
  0x90   : > { %652 = vmatmul.f32.gmra.mxu3 %v408_v12  ;;  %3843 = vmatpush.msrb.mxu2 %v4493_v1 }
  0x91   : > { %756 = vmatpush.msrb.mxu1 %v4370_v17  ;;  %3858 = vmatpush.msrb.mxu3 %v4401_v28 }
  0x92   : > { %3844 = vmatpush.msrb.mxu2 %v4511_v18  ;;  %709 = vmatpush.msrb.mxu0 %v4531_v43 }
  0x93   : > { %758 = vmatpush.msrb.mxu1 %v4381_v22  ;;  %3859 = vmatpush.msrb.mxu3 %v4429_v40 }
  0x94   : > { %419 = vmatmul.f32.gmra.mxu0 %v418_v62  ;;  %528 = vmatmul.f32.gmra.mxu1 %v4608_v8 }
  0x95   : > { %3845 = vmatpush.msrb.mxu2 %v4531_v43  ;;  %713 = vmatpush.msrb.mxu0 %v4546_v55 }
  0x96   : > { %760 = vmatpush.msrb.mxu1 %v4401_v28  ;;  %3860 = vmatpush.msrb.mxu3 %v4444_v46 }
  0x97   : > { %601 = vmatmul.f32.gmra.mxu2 %v415_v47  ;;  %717 = vmatpush.msrb.mxu0 %v4562_v41 }
  0x98   : > { %3846 = vmatpush.msrb.mxu2 %v4546_v55  ;;  %762 = vmatpush.msrb.mxu1 %v4429_v40 }
  0x99   : > { %3861 = vmatpush.msrb.mxu3 %v4460_v52  ;;  %721 = vmatpush.msrb.mxu0 %v4574_v30 }
  0x9a   : > { %658 = vmatmul.f32.gmra.mxu3 %v416_v6  ;;  %3847 = vmatpush.msrb.mxu2 %v4562_v41 }
  0x9b   : > { %764 = vmatpush.msrb.mxu1 %v4444_v46  ;;  %3862 = vmatpush.msrb.mxu3 %v4477_v59 }
  0x9c   : > { %3848 = vmatpush.msrb.mxu2 %v4574_v30  ;;  %725 = vmatpush.msrb.mxu0 %v4588_v45 }
  0x9d   : > { %766 = vmatpush.msrb.mxu1 %v4460_v52  ;;  %3863 = vmatpush.msrb.mxu3 %v4490_v0 }
  0x9e   : > { %532 = vmatmul.f32.gmra.mxu1 %v4634_v63  ;;  %727 = vmatmul.f32.vlgmr.msrb.gmra.mxu0 %v4495_v2 }
  0x9f   : > { %3849 = vmatpush.msrb.mxu2 %v4588_v45  ;;  %768 = vmatpush.msrb.mxu1 %v4477_v59 }
  0xa0   : > { %3864 = vmatpush.msrb.mxu3 %v4508_v13  ;;  %739 = vmatmul.f32.vlgmr.msrb.gmra.mxu2 %v4634_v63 }
  0xa1   : > { %770 = vmatpush.msrb.mxu1 %v4490_v0 }
  0xa2   : > { %3865 = vmatpush.msrb.mxu3 %v4528_v39 }
  0xa3   : > { %788 = vmatmul.f32.vlgmr.msrb.gmra.mxu3 %v4634_v63  ;;  %772 = vmatpush.msrb.mxu1 %v4508_v13 }
  0xa5   : > { %774 = vmatpush.msrb.mxu1 %v4528_v39 }
  0xa6   : > { %731 = vmatmul.f32.gmra.mxu0 %v4548_v56  ;;  %776 = vmatmul.f32.vlgmr.msrb.gmra.mxu1 %v4495_v2 }
  0xae   : > { %735 = vmatmul.f32.gmra.mxu0 %v4608_v8  ;;  %780 = vmatmul.f32.gmra.mxu1 %v4548_v56 }
  0xb6   : > { %784 = vmatmul.f32.gmra.mxu1 %v4608_v8 }
  0xf3   : > { %v396_v31 = vpop.f32.mrf.mxu0 }
  0xfc   : > { %v587_v7 = vpop.f32.mrf.mxu2 }
  0xfd   : > { %v521_v12 = vpop.f32.mrf.mxu1 }
  0xfe   : > { %v641_v47 = vpop.f32.mrf.mxu3  ;;  %v522_v48 = vadd.f32 %v521_v12, %v396_v31 }
  0xff   : > { %v404_v29 = vpop.f32.mrf.mxu0 }
 0x100   : > { %v588_v24 = vadd.f32 %v587_v7, %v522_v48 }
 0x106   : > { %v592_v63 = vpop.f32.mrf.mxu2 }
 0x107   : > { %v525_v32 = vpop.f32.mrf.mxu1  ;;  %v412_v6 = vpop.f32.mrf.mxu0 }
 0x108   : > { %v526_v8 = vadd.f32 %v525_v32, %v404_v29 }
 0x109   : > { %v647_v61 = vpop.f32.mrf.mxu3 }
 0x10a   : > { %v593_v49 = vadd.f32 %v592_v63, %v526_v8  ;;  %v797_v63 = vsel %vm792_vm0, %v345_v26, 0 }
 0x110   : > { %v597_v62 = vpop.f32.mrf.mxu2 }
 0x111   : > { %v529_v45 = vpop.f32.mrf.mxu1  ;;  %v420_v30 = vpop.f32.mrf.mxu0 }
 0x113   : > { %v653_v41 = vpop.f32.mrf.mxu3 }
 0x11a   : > { %v602_v2 = vpop.f32.mrf.mxu2 }
 0x11b   : > { %v533_v55 = vpop.f32.mrf.mxu1  ;;  %v728_v18 = vpop.f32.mrf.mxu0 }
 0x11c   : > { %v534_v43 = vadd.f32 %v533_v55, %v420_v30  ;;  %v648_v30 = vadd.f32 %v647_v61, %v593_v49  ;;  %v530_v55 = vadd.f32 %v529_v45, %v412_v6 }
 0x11d   : > { %v659_v56 = vpop.f32.mrf.mxu3 }
 0x11e   : > { %v603_v1 = vadd.f32 %v602_v2, %v534_v43 }
 0x120   : > { %v660_v54 = vadd.f32 %v659_v56, %v603_v1 }
 0x123   : > { %v740_v42 = vpop.f32.mrf.mxu2  ;;  %v777_v33 = vpop.f32.mrf.mxu1 }
 0x124   : > { %v741_v35 = vadd.f32 %v740_v42, %v660_v54  ;;  %v732_v36 = vpop.f32.mrf.mxu0  ;;  %v4711_v42 = vand.u32 4294901760, %v794_v51  ;;  %v642_v54 = vadd.f32 %v641_v47, %v588_v24  ;;  %v4720_v47 = vand.u32 4294901760, %v797_v63 }
 0x125   : > { %v733_v1 = vadd.f32 %v732_v36, %v648_v30 }
 0x126   : > { %v789_v25 = vpop.f32.mrf.mxu3  ;;  %v4714_v45 = vsub.f32 %v794_v51, %v4711_v42  ;;  %v4725_v8 = vsub.f32 %v797_v63, %v4720_v47  ;;  %v4779_v63 = vld [vmem:[%s4333_s12 + $0x8] sm:$0xff] }
 0x127   : > { %v790_v53 = vadd.f32 %v789_v25, %v741_v35  ;;  %v598_v25 = vadd.f32 %v597_v62, %v530_v55  ;;  %v729_v35 = vadd.f32 %v728_v18, %v642_v54  ;;  %5673 = vst [vmem:[#allocation62_spill] sm:$0xff] %v4779_v63 }
 0x128   : > { %v4718_v24 = vand.u32 4294901760, %v4714_v45 }
 0x129   : > { %v4706_v23 = vand.u32 4294901760, %v790_v53  ;;  %v654_v32 = vadd.f32 %v653_v41, %v598_v25 }
 0x12a   : > { %5671 = vst [vmem:[#allocation60_spill] sm:$0xff] %v4718_v24 }
 0x12b   : > { %v849_v43 = vsub.f32 %v790_v53, %v4706_v23  ;;  %812 = vmatpush.msra.mxu2 %v4706_v23  ;;  %999 = vmatpush.msra.mxu1 %v4706_v23  ;;  %v781_v31 = vpop.f32.mrf.mxu1  ;;  %v778_v53 = vadd.f32 %v777_v33, %v729_v35  ;;  %v822_v33 = vsub.f32 %v4714_v45, %v4718_v24 }
 0x12c   : > { %v782_v48 = vadd.f32 %v781_v31, %v733_v1  ;;  %v736_v49 = vpop.f32.mrf.mxu0  ;;  %v4730_v31 = vand.u32 4294901760, %v4725_v8 }
 0x12d   : > { %v850_v12 = vand.u32 4294901760, %v849_v43  ;;  %v817_v36 = vand.u32 4294901760, %v778_v53  ;;  %v737_v18 = vadd.f32 %v736_v49, %v654_v32  ;;  %v4727_v55 = vand.u32 4294901760, %v822_v33  ;;  %v5674_v32 = vld [vmem:[#allocation22_spill] sm:$0xff] }
 0x12e   : > { %v815_v6 = vand.u32 4294901760, %v782_v48  ;;  %5672 = vst [vmem:[#allocation61_spill] sm:$0xff] %v4730_v31  ;;  %v830_v26 = vsub.f32 %v4725_v8, %v4730_v31 }
 0x12f   : > { %964 = vmatpush.msra.mxu0 %v850_v12  ;;  %v851_v7 = vsub.f32 %v849_v43, %v850_v12  ;;  %v867_v51 = vsub.f32 %v778_v53, %v817_v36 }
 0x130   : > { %v861_v62 = vsub.f32 %v782_v48, %v815_v6  ;;  %v4737_v49 = vand.u32 4294901760, %v830_v26 }
 0x131   : > { %v852_v29 = vand.u32 4294901760, %v851_v7  ;;  %v868_v1 = vand.u32 4294901760, %v867_v51 }
 0x132   : > { %v862_v30 = vand.u32 4294901760, %v861_v62 }
 0x133   : > { %853 = vmatpush.msra.mxu3 %v852_v29  ;;  %v785_v61 = vpop.f32.mrf.mxu1  ;;  %v869_v48 = vsub.f32 %v867_v51, %v868_v1 }
 0x134   : > { %v786_v2 = vadd.f32 %v785_v61, %v737_v18  ;;  %v863_v25 = vsub.f32 %v861_v62, %v862_v30  ;;  %v5675_v18 = vld [vmem:[#allocation38_spill] sm:$0xff]  ;;  %v5676_v61 = vld [vmem:[#allocation25_spill] sm:$0xff] }
 0x135   : > { %v870_v53 = vand.u32 4294901760, %v869_v48  ;;  %v5684_v48 = vld [vmem:[#allocation35_spill] sm:$0xff] }
 0x136   : > { %v813_v56 = vand.u32 4294901760, %v786_v2  ;;  %v864_v7 = vand.u32 4294901760, %v863_v25 }
 0x138   : > { %v855_v41 = vsub.f32 %v786_v2, %v813_v56  ;;  %814 = vmatpush.msra.mxu2 %v813_v56  ;;  %1001 = vmatpush.msra.mxu1 %v813_v56 }
 0x13a   : > { %816 = vmatpush.msra.mxu2 %v815_v6  ;;  %1003 = vmatpush.msra.mxu1 %v815_v6  ;;  %v856_v54 = vand.u32 4294901760, %v855_v41 }
 0x13c   : > { %818 = vmatpush.msra.mxu2 %v817_v36  ;;  %968 = vmatpush.msra.mxu0 %v856_v54  ;;  %v857_v12 = vsub.f32 %v855_v41, %v856_v54 }
 0x13d   : > { %1005 = vmatpush.msra.mxu1 %v817_v36  ;;  %824 = vmatmul.f32.vlgmr.msra.gmra.mxu2 %v4727_v55 }
 0x13e   : > { %895 = vmatpush.msrb.mxu2 %v849_v43  ;;  %972 = vmatpush.msra.mxu0 %v862_v30  ;;  %v858_v35 = vand.u32 4294901760, %v857_v12  ;;  %v5681_v30 = vld [vmem:[#allocation49_spill] sm:$0xff] }
 0x13f   : > { %1263 = vmatpush.msrb.mxu1 %v4347_v3 }
 0x140   : > { %898 = vmatpush.msrb.mxu2 %v855_v41  ;;  %859 = vmatpush.msra.mxu3 %v858_v35  ;;  %v5680_v41 = vld [vmem:[#allocation29_spill] sm:$0xff]  ;;  %v5683_v35 = vld [vmem:[#allocation52_spill] sm:$0xff] }
 0x141   : > { %976 = vmatpush.msra.mxu0 %v868_v1  ;;  %1265 = vmatpush.msrb.mxu1 %v4349_v4  ;;  %v5682_v1 = vld [vmem:[#allocation32_spill] sm:$0xff] }
 0x142   : > { %901 = vmatpush.msrb.mxu2 %v861_v62  ;;  %865 = vmatpush.msra.mxu3 %v864_v7  ;;  %v5677_v62 = vld [vmem:[#allocation42_spill] sm:$0xff]  ;;  %v5685_v7 = vld [vmem:[#allocation39_spill] sm:$0xff] }
 0x143   : > { %1195 = vmatpush.msrb.mxu0 %v4361_v14  ;;  %1267 = vmatpush.msrb.mxu1 %v4351_v5 }
 0x144   : > { %904 = vmatpush.msrb.mxu2 %v867_v51  ;;  %871 = vmatpush.msra.mxu3 %v870_v53  ;;  %v5678_v51 = vld [vmem:[#allocation46_spill] sm:$0xff] }
 0x145   : > { %873 = vmatmul.f32.vlgmr.msra.gmra.mxu3 %v4711_v42  ;;  %832 = vmatmul.f32.gmra.mxu2 %v4737_v49 }
 0x146   : > { %1016 = vmatpush.msra.mxu2 %v4347_v3  ;;  %929 = vmatpush.msrb.mxu3 %v4706_v23  ;;  %v324_v23 = vld [vmem:[%s4333_s12] sm:$0xff] }
 0x147   : > { %1198 = vmatpush.msrb.mxu0 %v4364_v15  ;;  %1269 = vmatpush.msrb.mxu1 %v4353_v9  ;;  %v4763_v43 = vand.u32 4294901760, %v324_v23 }
 0x148   : > { %1018 = vmatpush.msra.mxu2 %v4349_v4  ;;  %931 = vmatpush.msrb.mxu3 %v813_v56  ;;  %v4809_v56 = vld [vmem:[%s4333_s12 + $0x10] sm:$0xff] }
 0x149   : > { %1201 = vmatpush.msrb.mxu0 %v4368_v16  ;;  %1271 = vmatpush.msrb.mxu1 %v4355_v10  ;;  %v4774_v29 = vsub.f32 %v324_v23, %v4763_v43  ;;  %5679 = vst [vmem:[#allocation63_spill] sm:$0xff] %v4809_v56  ;;  %v4819_v25 = vand.u32 4294901760, %v4809_v56  ;;  %v5686_v23 = vld [vmem:[#allocation17_spill] sm:$0xff] }
 0x14a   : > { %1020 = vmatpush.msra.mxu2 %v4351_v5  ;;  %933 = vmatpush.msrb.mxu3 %v815_v6 }
 0x14b   : > { %978 = vmatmul.f32.vlgmr.msra.gmra.mxu0 %v4711_v42  ;;  %1007 = vmatmul.f32.vlgmr.msra.gmra.mxu1 %v4711_v42  ;;  %v5571_v6 = vand.u32 4294901760, %v4774_v29  ;;  %v1064_v53 = vsub.f32 %v4809_v56, %v4819_v25 }
 0x14c   : > { %1022 = vmatpush.msra.mxu2 %v4353_v9  ;;  %1204 = vmatpush.msrb.mxu0 %v4373_v19 }
 0x14d   : > { %935 = vmatpush.msrb.mxu3 %v817_v36  ;;  %907 = vmatmul.f32.vlgmr.msrb.gmra.mxu2 %v4714_v45  ;;  %v4789_v36 = vand.u32 4294901760, %v4779_v63  ;;  %v1050_v2 = vsub.f32 %v4774_v29, %v5571_v6  ;;  %v5688_v6 = vld [vmem:[#allocation43_spill] sm:$0xff]  ;;  %v1065_v56 = vand.u32 4294901760, %v1064_v53 }
 0x14e   : > { %1024 = vmatpush.msra.mxu2 %v4355_v10  ;;  %877 = vmatmul.f32.gmra.mxu3 %v4720_v47 }
 0x14f   : > { %1085 = vmatpush.msra.mxu3 %v4423_v37  ;;  %1207 = vmatpush.msrb.mxu0 %v4376_v20  ;;  %v4804_v33 = vsub.f32 %v4779_v63, %v4789_v36  ;;  %v1051_v54 = vand.u32 4294901760, %v1050_v2  ;;  %v4834_v2 = vld [vmem:[%s4333_s12 + $0x18] sm:$0xff]  ;;  %v5689_v63 = vld [vmem:[#allocation57_spill] sm:$0xff] }
 0x150   : > { %1026 = vmatpush.msra.mxu2 %v4357_v11  ;;  %1273 = vmatpush.msrb.mxu1 %v4357_v11  ;;  %5687 = vst [vmem:[#allocation64_spill] sm:$0xff] %v4834_v2 }
 0x151   : > { %1091 = vmatpush.msra.mxu3 %v4425_v38  ;;  %1210 = vmatpush.msrb.mxu0 %v4379_v21  ;;  %v1057_v12 = vand.u32 4294901760, %v4804_v33 }
 0x152   : > { %1028 = vmatpush.msra.mxu2 %v4370_v17  ;;  %1275 = vmatpush.msrb.mxu1 %v4370_v17 }
 0x153   : > { %1097 = vmatpush.msra.mxu3 %v4440_v44  ;;  %1213 = vmatpush.msrb.mxu0 %v4399_v27  ;;  %v1058_v26 = vsub.f32 %v4804_v33, %v1057_v12 }
 0x154   : > { %1030 = vmatpush.msra.mxu2 %v4381_v22  ;;  %1277 = vmatpush.msrb.mxu1 %v4381_v22 }
 0x155   : > { %1103 = vmatpush.msra.mxu3 %v4455_v50  ;;  %912 = vmatmul.f32.gmra.mxu2 %v4725_v8 }
 0x156   : > { %1032 = vmatpush.msra.mxu2 %v4401_v28  ;;  %939 = vmatmul.f32.vlgmr.msrb.gmra.mxu3 %v4718_v24 }
 0x157   : > { %1109 = vmatpush.msra.mxu3 %v4472_v57  ;;  %1216 = vmatpush.msrb.mxu0 %v5674_v32 }
 0x158   : > { %1034 = vmatpush.msra.mxu2 %v4429_v40  ;;  %1279 = vmatpush.msrb.mxu1 %v4401_v28 }
 0x159   : > { %1115 = vmatpush.msra.mxu3 %v4481_v60  ;;  %1219 = vmatpush.msrb.mxu0 %v5676_v61 }
 0x15a   : > { %1036 = vmatpush.msra.mxu2 %v4444_v46  ;;  %982 = vmatmul.f32.gmra.mxu0 %v4720_v47 }
 0x15b   : > { %1121 = vmatpush.msra.mxu3 %v5675_v18  ;;  %1011 = vmatmul.f32.gmra.mxu1 %v4720_v47 }
 0x15c   : > { %1038 = vmatpush.msra.mxu2 %v4460_v52  ;;  %1222 = vmatpush.msrb.mxu0 %v5680_v41 }
 0x15d   : > { %1127 = vmatpush.msra.mxu3 %v5677_v62  ;;  %1281 = vmatpush.msrb.mxu1 %v4429_v40 }
 0x15e   : > { %1040 = vmatpush.msra.mxu2 %v4477_v59  ;;  %945 = vmatmul.f32.gmra.mxu3 %v4730_v31 }
 0x15f   : > { %1133 = vmatpush.msra.mxu3 %v5678_v51  ;;  %1225 = vmatpush.msrb.mxu0 %v5682_v1 }
 0x160   : > { %1042 = vmatpush.msra.mxu2 %v4490_v0  ;;  %1283 = vmatpush.msrb.mxu1 %v4444_v46 }
 0x161   : > { %1139 = vmatpush.msra.mxu3 %v5681_v30  ;;  %1228 = vmatpush.msrb.mxu0 %v5684_v48  ;;  %v5697_v48 = vld [vmem:[#allocation21_spill] sm:$0xff] }
 0x162   : > { %1044 = vmatpush.msra.mxu2 %v4508_v13  ;;  %1285 = vmatpush.msrb.mxu1 %v4460_v52 }
 0x163   : > { %1145 = vmatpush.msra.mxu3 %v5683_v35  ;;  %1231 = vmatpush.msrb.mxu0 %v5685_v7  ;;  %v5691_v7 = vld [vmem:[#allocation47_spill] sm:$0xff] }
 0x164   : > { %1046 = vmatpush.msra.mxu2 %v4528_v39  ;;  %1287 = vmatpush.msrb.mxu1 %v4477_v59  ;;  %v5693_v35 = vld [vmem:[#allocation19_spill] sm:$0xff] }
 0x165   : > { %1151 = vmatpush.msra.mxu3 %v4583_v58  ;;  %1052 = vmatmul.f32.vlgmr.msra.gmra.mxu2 %v1051_v54  ;;  %v5690_v54 = vld [vmem:[#allocation18_spill] sm:$0xff]  ;;  %v1059_v58 = vand.u32 4294901760, %v1058_v26  ;;  %v1066_v26 = vsub.f32 %v1064_v53, %v1065_v56 }
 0x166   : > { %1322 = vmatpush.msrb.mxu2 %v5686_v23  ;;  %1234 = vmatpush.msrb.mxu0 %v5688_v6  ;;  %v5692_v23 = vld [vmem:[#allocation58_spill] sm:$0xff] }
 0x167   : > { %1157 = vmatpush.msra.mxu3 %v4595_v34  ;;  %v4843_v34 = vand.u32 4294901760, %v4834_v2  ;;  %1289 = vmatpush.msrb.mxu1 %v4490_v0  ;;  %v5694_v6 = vld [vmem:[#allocation50_spill] sm:$0xff] }
 0x168   : > { %1326 = vmatpush.msrb.mxu2 %v5690_v54  ;;  %1237 = vmatpush.msrb.mxu0 %v5691_v7  ;;  %v5696_v54 = vld [vmem:[#allocation20_spill] sm:$0xff] }
 0x169   : > { %1163 = vmatpush.msra.mxu3 %v5689_v63  ;;  %v5695_v63 = vld [vmem:[#allocation59_spill] sm:$0xff]  ;;  %v1072_v7 = vsub.f32 %v4834_v2, %v4843_v34  ;;  %1291 = vmatpush.msrb.mxu1 %v4508_v13  ;;  %v5700_v2 = vand.u32 4294901760, %v4774_v29 }
 0x16a   : > { %1330 = vmatpush.msrb.mxu2 %v5693_v35  ;;  %1240 = vmatpush.msrb.mxu0 %v5694_v6  ;;  %v5698_v35 = vld [vmem:[#allocation23_spill] sm:$0xff] }
 0x16b   : > { %1169 = vmatpush.msra.mxu3 %v5692_v23  ;;  %1243 = vmatmul.f32.vlgmr.msrb.gmra.mxu0 %v4774_v29  ;;  %v5702_v23 = vld [vmem:[#allocation31_spill] sm:$0xff] }
 0x16c   : > { %1334 = vmatpush.msrb.mxu2 %v5696_v54  ;;  %v1067_v54 = vand.u32 4294901760, %v1066_v26  ;;  %1293 = vmatpush.msrb.mxu1 %v4528_v39  ;;  %v5703_v26 = vld [vmem:[#allocation37_spill] sm:$0xff] }
 0x16d   : > { %1175 = vmatpush.msra.mxu3 %v5695_v63  ;;  %1060 = vmatmul.f32.gmra.mxu2 %v1059_v58  ;;  %v1073_v58 = vand.u32 4294901760, %v1072_v7  ;;  %v5699_v63 = vld [vmem:[#allocation26_spill] sm:$0xff] }
 0x16e   : > { %1177 = vmatmul.f32.vlgmr.msra.gmra.mxu3 %v4763_v43  ;;  %1338 = vmatpush.msrb.mxu2 %v5697_v48  ;;  %v5701_v48 = vld [vmem:[#allocation28_spill] sm:$0xff] }
 0x16f   : > { %1401 = vmatpush.msrb.mxu3 %v4347_v3  ;;  %1297 = vmatmul.f32.vlgmr.msrb.gmra.mxu1 %v5700_v2  ;;  %v5704_v2 = vld [vmem:[#allocation41_spill] sm:$0xff] }
 0x170   : > { %1342 = vmatpush.msrb.mxu2 %v5698_v35  ;;  %v1074_v35 = vsub.f32 %v1072_v7, %v1073_v58 }
 0x171   : > { %1403 = vmatpush.msrb.mxu3 %v4349_v4 }
 0x172   : > { %1346 = vmatpush.msrb.mxu2 %v5699_v63  ;;  %v1075_v29 = vand.u32 4294901760, %v1074_v35  ;;  %v5708_v35 = vld [vmem:[#allocation53_spill] sm:$0xff] }
 0x173   : > { %1405 = vmatpush.msrb.mxu3 %v4351_v5  ;;  %1248 = vmatmul.f32.gmra.mxu0 %v4804_v33  ;;  %v5707_v33 = vld [vmem:[#allocation51_spill] sm:$0xff] }
 0x174   : > { %1350 = vmatpush.msrb.mxu2 %v5701_v48 }
 0x175   : > { %1407 = vmatpush.msrb.mxu3 %v4353_v9  ;;  %1068 = vmatmul.f32.gmra.mxu2 %v1067_v54  ;;  %v5705_v54 = vld [vmem:[#allocation45_spill] sm:$0xff] }
 0x176   : > { %1181 = vmatmul.f32.gmra.mxu3 %v4789_v36  ;;  %1354 = vmatpush.msrb.mxu2 %v5702_v23  ;;  %v5706_v23 = vld [vmem:[#allocation48_spill] sm:$0xff] }
 0x177   : > { %1409 = vmatpush.msrb.mxu3 %v4355_v10  ;;  %1303 = vmatmul.f32.gmra.mxu1 %v1057_v12  ;;  %v5709_v12 = vld [vmem:[#allocation55_spill] sm:$0xff] }
 0x178   : > { %1358 = vmatpush.msrb.mxu2 %v5703_v26 }
 0x179   : > { %1411 = vmatpush.msrb.mxu3 %v4357_v11 }
 0x17a   : > { %1362 = vmatpush.msrb.mxu2 %v5704_v2 }
 0x17b   : > { %1413 = vmatpush.msrb.mxu3 %v4370_v17  ;;  %1253 = vmatmul.f32.gmra.mxu0 %v1064_v53 }
 0x17c   : > { %1366 = vmatpush.msrb.mxu2 %v5705_v54 }
 0x17d   : > { %1415 = vmatpush.msrb.mxu3 %v4381_v22  ;;  %1076 = vmatmul.f32.gmra.mxu2 %v1075_v29 }
 0x17e   : > { %1185 = vmatmul.f32.gmra.mxu3 %v4819_v25  ;;  %1370 = vmatpush.msrb.mxu2 %v5706_v23 }
 0x17f   : > { %1417 = vmatpush.msrb.mxu3 %v4401_v28  ;;  %1309 = vmatmul.f32.gmra.mxu1 %v1065_v56 }
 0x180   : > { %1374 = vmatpush.msrb.mxu2 %v5707_v33 }
 0x181   : > { %1419 = vmatpush.msrb.mxu3 %v4429_v40 }
 0x182   : > { %1378 = vmatpush.msrb.mxu2 %v5708_v35 }
 0x183   : > { %1421 = vmatpush.msrb.mxu3 %v4444_v46  ;;  %1258 = vmatmul.f32.gmra.mxu0 %v1072_v7 }
 0x184   : > { %1382 = vmatpush.msrb.mxu2 %v5709_v12 }
 0x185   : > { %1423 = vmatpush.msrb.mxu3 %v4460_v52  ;;  %1384 = vmatmul.f32.vlgmr.msrb.gmra.mxu2 %v4763_v43 }
 0x186   : > { %1189 = vmatmul.f32.gmra.mxu3 %v4843_v34 }
 0x187   : > { %1425 = vmatpush.msrb.mxu3 %v4477_v59  ;;  %1315 = vmatmul.f32.gmra.mxu1 %v1073_v58 }
 0x189   : > { %1427 = vmatpush.msrb.mxu3 %v4490_v0 }
 0x18b   : > { %1429 = vmatpush.msrb.mxu3 %v4508_v13 }
 0x18d   : > { %1431 = vmatpush.msrb.mxu3 %v4528_v39  ;;  %1388 = vmatmul.f32.gmra.mxu2 %v4789_v36 }
 0x18e   : > { %1433 = vmatmul.f32.vlgmr.msrb.gmra.mxu3 %v4763_v43 }
 0x195   : > { %1392 = vmatmul.f32.gmra.mxu2 %v4819_v25 }
 0x196   : > { %1437 = vmatmul.f32.gmra.mxu3 %v4789_v36 }
 0x19d   : > { %1396 = vmatmul.f32.gmra.mxu2 %v4843_v34 }
 0x19e   : > { %1441 = vmatmul.f32.gmra.mxu3 %v4819_v25 }
 0x1a6   : > { %1445 = vmatmul.f32.gmra.mxu3 %v4843_v34 }
 0x1c0   : > { %v4899_v56 = vpop.f32.mrf.mxu2 }
 0x1c1   : > { %5710 = vst [vmem:[#allocation65_spill] sm:$0xff] %v4899_v56 }
 0x1c8   : > { %v4901_v7 = vpop.f32.mrf.mxu3  ;;  %v4903_v53 = vpop.f32.mrf.mxu2 }
 0x1c9   : > { %5711 = vst [vmem:[#allocation66_spill] sm:$0xff] %v4901_v7  ;;  %v4915_v25 = vpop.f32.mrf.mxu0  ;;  %v4917_v56 = vpop.f32.mrf.mxu1 }
 0x1ca   : > { %5712 = vst [vmem:[#allocation67_spill] sm:$0xff] %v4903_v53 }
 0x1cb   : > { %5718 = vst [vmem:[#allocation73_spill] sm:$0xff] %v4915_v25 }
 0x1cc   : > { %5719 = vst [vmem:[#allocation74_spill] sm:$0xff] %v4917_v56 }
 0x1d0   : > { %v4907_v29 = vpop.f32.mrf.mxu2 }
 0x1d1   : > { %v4905_v58 = vpop.f32.mrf.mxu3  ;;  %5714 = vst [vmem:[#allocation69_spill] sm:$0xff] %v4907_v29 }
 0x1d2   : > { %5713 = vst [vmem:[#allocation68_spill] sm:$0xff] %v4905_v58 }
 0x1d7   : > { %v4919_v7 = vpop.f32.mrf.mxu0 }
 0x1d8   : > { %v4911_v12 = vpop.f32.mrf.mxu2  ;;  %5720 = vst [vmem:[#allocation75_spill] sm:$0xff] %v4919_v7  ;;  %v4921_v58 = vpop.f32.mrf.mxu1 }
 0x1d9   : > { %v4909_v43 = vpop.f32.mrf.mxu3  ;;  %5716 = vst [vmem:[#allocation71_spill] sm:$0xff] %v4911_v12 }
 0x1da   : > { %5715 = vst [vmem:[#allocation70_spill] sm:$0xff] %v4909_v43 }
 0x1db   : > { %5721 = vst [vmem:[#allocation76_spill] sm:$0xff] %v4921_v58 }
 0x1e1   : > { %v4913_v36 = vpop.f32.mrf.mxu3 }
 0x1e2   : > { %5717 = vst [vmem:[#allocation72_spill] sm:$0xff] %v4913_v36 }
 0x1e8   : > { %v1053_v35 = vpop.f32.mrf.mxu2  ;;  %v1244_v29 = vpop.f32.mrf.mxu0 }
 0x1ec   : > { %v1298_v2 = vpop.f32.mrf.mxu1 }
 0x1f0   : > { %v1061_v34 = vpop.f32.mrf.mxu2  ;;  %v1249_v36 = vpop.f32.mrf.mxu0 }
 0x1f1   : > { %v1178_v33 = vpop.f32.mrf.mxu3 }
 0x1f2   : > { %v1179_v7 = vadd.f32 %v1178_v33, %v1053_v35 }
 0x1f4   : > { %v1304_v48 = vpop.f32.mrf.mxu1  ;;  %v1245_v58 = vadd.f32 %v1244_v29, %v1179_v7  ;;  %v5723_v29 = vld [vmem:[#allocation34_spill] sm:$0xff] }
 0x1f6   : > { %v1299_v18 = vadd.f32 %v1298_v2, %v1245_v58  ;;  %v5722_v58 = vld [vmem:[#allocation24_spill] sm:$0xff] }
 0x1f8   : > { %v1069_v53 = vpop.f32.mrf.mxu2  ;;  %v1254_v6 = vpop.f32.mrf.mxu0 }
 0x1f9   : > { %v1182_v23 = vpop.f32.mrf.mxu3 }
 0x1fa   : > { %v1183_v13 = vadd.f32 %v1182_v23, %v1061_v34 }
 0x1fc   : > { %v1310_v56 = vpop.f32.mrf.mxu1  ;;  %v1250_v1 = vadd.f32 %v1249_v36, %v1183_v13  ;;  %v3946_v36 = vld [vmem:[%s4326_s9 + $0x8] sm:$0xff] }
 0x1fe   : > { %v1305_v62 = vadd.f32 %v1304_v48, %v1250_v1 }
 0x200   : > { %v1077_v54 = vpop.f32.mrf.mxu2  ;;  %v1259_v41 = vpop.f32.mrf.mxu0 }
 0x201   : > { %v1186_v43 = vpop.f32.mrf.mxu3 }
 0x202   : > { %v1187_v39 = vadd.f32 %v1186_v43, %v1069_v53 }
 0x204   : > { %v1255_v0 = vadd.f32 %v1254_v6, %v1187_v39  ;;  %v1316_v40 = vpop.f32.mrf.mxu1 }
 0x206   : > { %v1311_v51 = vadd.f32 %v1310_v56, %v1255_v0 }
 0x208   : > { %v1385_v26 = vpop.f32.mrf.mxu2 }
 0x209   : > { %v1190_v12 = vpop.f32.mrf.mxu3  ;;  %v1386_v53 = vadd.f32 %v1385_v26, %v1299_v18  ;;  %v3945_v26 = vld [vmem:[%s4326_s9] sm:$0xff] }
 0x20a   : > { %v1191_v59 = vadd.f32 %v1190_v12, %v1077_v54  ;;  %v346_v2 = vmul.f32 %v3945_v26, %v3945_v26  ;;  %v5743_v26 = vld [vmem:[#allocation43_spill] sm:$0xff] }
 0x20c   : > { %v1260_v46 = vadd.f32 %v1259_v41, %v1191_v59  ;;  %v4953_v56 = vand.u32 4294901760, %v346_v2 }
 0x20e   : > { %v1317_v34 = vadd.f32 %v1316_v40, %v1260_v46  ;;  %v1698_v7 = vsub.f32 %v346_v2, %v4953_v56  ;;  %v5744_v2 = vld [vmem:[#allocation56_spill] sm:$0xff] }
 0x210   : > { %v1389_v63 = vpop.f32.mrf.mxu2 }
 0x211   : > { %v1434_v25 = vpop.f32.mrf.mxu3  ;;  %v1390_v32 = vadd.f32 %v1389_v63, %v1305_v62 }
 0x212   : > { %v1435_v33 = vadd.f32 %v1434_v25, %v1386_v53  ;;  %v347_v25 = vmul.f32 %v3946_v36, %v3946_v36  ;;  %v5724_v53 = vld [vmem:[#allocation22_spill] sm:$0xff]  ;;  %v5745_v36 = vld [vmem:[#allocation47_spill] sm:$0xff] }
 0x214   : > { %v1467_v0 = vand.u32 4294901760, %v1435_v33 }
 0x218   : > { %v1393_v31 = vpop.f32.mrf.mxu2 }
 0x219   : > { %v1438_v30 = vpop.f32.mrf.mxu3  ;;  %v1394_v52 = vadd.f32 %v1393_v31, %v1311_v51  ;;  %v1517_v51 = vsub.f32 %v1435_v33, %v1467_v0  ;;  %v1699_v33 = vand.u32 4294901760, %v1698_v7 }
 0x21a   : > { %v1439_v23 = vadd.f32 %v1438_v30, %v1390_v32 }
 0x21b   : > { %v1518_v32 = vand.u32 4294901760, %v1517_v51 }
 0x21c   : > { %v1465_v6 = vand.u32 4294901760, %v1439_v23 }
 0x21d   : > { %v1519_v62 = vsub.f32 %v1517_v51, %v1518_v32 }
 0x21e   : > { %v1511_v1 = vsub.f32 %v1439_v23, %v1465_v6  ;;  %v5725_v23 = vld [vmem:[#allocation27_spill] sm:$0xff] }
 0x21f   : > { %v1520_v30 = vand.u32 4294901760, %v1519_v62 }
 0x220   : > { %v1397_v43 = vpop.f32.mrf.mxu2  ;;  %v1512_v63 = vand.u32 4294901760, %v1511_v1 }
 0x221   : > { %v1442_v61 = vpop.f32.mrf.mxu3  ;;  %v1398_v13 = vadd.f32 %v1397_v43, %v1317_v34  ;;  %v5726_v43 = vld [vmem:[#allocation38_spill] sm:$0xff]  ;;  %v5727_v34 = vld [vmem:[#allocation25_spill] sm:$0xff] }
 0x222   : > { %v1443_v60 = vadd.f32 %v1442_v61, %v1394_v52  ;;  %v1513_v18 = vsub.f32 %v1511_v1, %v1512_v63 }
 0x224   : > { %v1463_v39 = vand.u32 4294901760, %v1443_v60  ;;  %v1514_v41 = vand.u32 4294901760, %v1513_v18  ;;  %v5740_v18 = vld [vmem:[#allocation39_spill] sm:$0xff] }
 0x226   : > { %v1505_v54 = vsub.f32 %v1443_v60, %v1463_v39 }
 0x228   : > { %v1506_v52 = vand.u32 4294901760, %v1505_v54 }
 0x229   : > { %v1446_v35 = vpop.f32.mrf.mxu3 }
 0x22a   : > { %v1447_v12 = vadd.f32 %v1446_v35, %v1398_v13  ;;  %v1507_v46 = vsub.f32 %v1505_v54, %v1506_v52  ;;  %v5729_v13 = vld [vmem:[#allocation42_spill] sm:$0xff]  ;;  %v5730_v35 = vld [vmem:[#allocation29_spill] sm:$0xff] }
 0x22c   : > { %v1461_v31 = vand.u32 4294901760, %v1447_v12  ;;  %v1508_v61 = vand.u32 4294901760, %v1507_v46  ;;  %v5738_v46 = vld [vmem:[#allocation40_spill] sm:$0xff] }
 0x22e   : > { %v1499_v48 = vsub.f32 %v1447_v12, %v1461_v31  ;;  %1462 = vmatpush.msra.mxu0 %v1461_v31  ;;  %1649 = vmatpush.msra.mxu3 %v1461_v31  ;;  %v5733_v12 = vld [vmem:[#allocation32_spill] sm:$0xff] }
 0x230   : > { %1464 = vmatpush.msra.mxu0 %v1463_v39  ;;  %1651 = vmatpush.msra.mxu3 %v1463_v39  ;;  %v1500_v59 = vand.u32 4294901760, %v1499_v48 }
 0x232   : > { %1466 = vmatpush.msra.mxu0 %v1465_v6  ;;  %1614 = vmatpush.msra.mxu2 %v1500_v59  ;;  %v1501_v40 = vsub.f32 %v1499_v48, %v1500_v59  ;;  %v5735_v59 = vld [vmem:[#allocation36_spill] sm:$0xff] }
 0x233   : > { %1653 = vmatpush.msra.mxu3 %v1465_v6 }
 0x234   : > { %1468 = vmatpush.msra.mxu0 %v1467_v0  ;;  %1618 = vmatpush.msra.mxu2 %v1506_v52  ;;  %v1502_v60 = vand.u32 4294901760, %v1501_v40  ;;  %v5737_v40 = vld [vmem:[#allocation35_spill] sm:$0xff] }
 0x235   : > { %1655 = vmatpush.msra.mxu3 %v1467_v0  ;;  %1474 = vmatmul.f32.vlgmr.msra.gmra.mxu0 %v4727_v55 }
 0x236   : > { %1545 = vmatpush.msrb.mxu0 %v1499_v48  ;;  %1503 = vmatpush.msra.mxu1 %v1502_v60  ;;  %v3947_v48 = vld [vmem:[%s4326_s9 + $0x10] sm:$0xff] }
 0x237   : > { %1622 = vmatpush.msra.mxu2 %v1512_v63  ;;  %1913 = vmatpush.msrb.mxu3 %v4347_v3  ;;  %v348_v52 = vmul.f32 %v3947_v48, %v3947_v48  ;;  %v5736_v63 = vld [vmem:[#allocation49_spill] sm:$0xff]  ;;  %v3948_v48 = vld [vmem:[%s4326_s9 + $0x18] sm:$0xff] }
 0x238   : > { %1548 = vmatpush.msrb.mxu0 %v1505_v54  ;;  %1509 = vmatpush.msra.mxu1 %v1508_v61  ;;  %v5732_v54 = vld [vmem:[#allocation46_spill] sm:$0xff] }
 0x239   : > { %1626 = vmatpush.msra.mxu2 %v1518_v32  ;;  %1915 = vmatpush.msrb.mxu3 %v4349_v4  ;;  %v5739_v32 = vld [vmem:[#allocation52_spill] sm:$0xff]  ;;  %v4995_v62 = vand.u32 4294901760, %v348_v52 }
 0x23a   : > { %1551 = vmatpush.msrb.mxu0 %v1511_v1  ;;  %1515 = vmatpush.msra.mxu1 %v1514_v41  ;;  %v1700_v1 = vsub.f32 %v1698_v7, %v1699_v33  ;;  %v5741_v41 = vld [vmem:[#allocation44_spill] sm:$0xff] }
 0x23b   : > { %1845 = vmatpush.msrb.mxu2 %v4361_v14  ;;  %1917 = vmatpush.msrb.mxu3 %v4351_v5 }
 0x23c   : > { %1554 = vmatpush.msrb.mxu0 %v1517_v51  ;;  %1521 = vmatpush.msra.mxu1 %v1520_v30  ;;  %v1701_v60 = vand.u32 4294901760, %v1700_v1  ;;  %v5742_v30 = vld [vmem:[#allocation54_spill] sm:$0xff]  ;;  %v1714_v1 = vsub.f32 %v348_v52, %v4995_v62 }
 0x23d   : > { %1523 = vmatmul.f32.vlgmr.msra.gmra.mxu1 %v4711_v42  ;;  %1482 = vmatmul.f32.gmra.mxu0 %v4737_v49 }
 0x23e   : > { %1666 = vmatpush.msra.mxu0 %v4347_v3  ;;  %1579 = vmatpush.msrb.mxu1 %v1461_v31  ;;  %v5734_v31 = vld [vmem:[#allocation61_spill] sm:$0xff] }
 0x23f   : > { %1848 = vmatpush.msrb.mxu2 %v4364_v15  ;;  %1919 = vmatpush.msrb.mxu3 %v4353_v9 }
 0x240   : > { %1668 = vmatpush.msra.mxu0 %v4349_v4  ;;  %1581 = vmatpush.msrb.mxu1 %v1463_v39  ;;  %v5728_v39 = vld [vmem:[#allocation30_spill] sm:$0xff] }
 0x241   : > { %1851 = vmatpush.msrb.mxu2 %v4368_v16  ;;  %1921 = vmatpush.msrb.mxu3 %v4355_v10 }
 0x242   : > { %1670 = vmatpush.msra.mxu0 %v4351_v5  ;;  %1583 = vmatpush.msrb.mxu1 %v1465_v6  ;;  %v4975_v6 = vand.u32 4294901760, %v347_v25 }
 0x243   : > { %1628 = vmatmul.f32.vlgmr.msra.gmra.mxu2 %v4711_v42  ;;  %1657 = vmatmul.f32.vlgmr.msra.gmra.mxu3 %v4711_v42 }
 0x244   : > { %1672 = vmatpush.msra.mxu0 %v4353_v9  ;;  %1854 = vmatpush.msrb.mxu2 %v4373_v19  ;;  %v1706_v51 = vsub.f32 %v347_v25, %v4975_v6 }
 0x245   : > { %1585 = vmatpush.msrb.mxu1 %v1467_v0  ;;  %1557 = vmatmul.f32.vlgmr.msrb.gmra.mxu0 %v4714_v45  ;;  %v5731_v0 = vld [vmem:[#allocation33_spill] sm:$0xff] }
 0x246   : > { %1674 = vmatpush.msra.mxu0 %v4355_v10  ;;  %1527 = vmatmul.f32.gmra.mxu1 %v4720_v47  ;;  %v1707_v61 = vand.u32 4294901760, %v1706_v51 }
 0x247   : > { %1735 = vmatpush.msra.mxu1 %v4423_v37  ;;  %1857 = vmatpush.msrb.mxu2 %v4376_v20 }
 0x248   : > { %1676 = vmatpush.msra.mxu0 %v4357_v11  ;;  %1923 = vmatpush.msrb.mxu3 %v4357_v11  ;;  %v1708_v25 = vsub.f32 %v1706_v51, %v1707_v61 }
 0x249   : > { %1741 = vmatpush.msra.mxu1 %v4425_v38  ;;  %1860 = vmatpush.msrb.mxu2 %v4379_v21 }
 0x24a   : > { %1678 = vmatpush.msra.mxu0 %v4370_v17  ;;  %1925 = vmatpush.msrb.mxu3 %v4370_v17 }
 0x24b   : > { %1747 = vmatpush.msra.mxu1 %v4440_v44  ;;  %1863 = vmatpush.msrb.mxu2 %v4399_v27 }
 0x24c   : > { %1680 = vmatpush.msra.mxu0 %v4381_v22  ;;  %1927 = vmatpush.msrb.mxu3 %v4381_v22 }
 0x24d   : > { %1753 = vmatpush.msra.mxu1 %v4455_v50  ;;  %1562 = vmatmul.f32.gmra.mxu0 %v4725_v8 }
 0x24e   : > { %1682 = vmatpush.msra.mxu0 %v4401_v28  ;;  %1589 = vmatmul.f32.vlgmr.msrb.gmra.mxu1 %v4718_v24 }
 0x24f   : > { %1759 = vmatpush.msra.mxu1 %v4472_v57  ;;  %1866 = vmatpush.msrb.mxu2 %v5724_v53 }
 0x250   : > { %1684 = vmatpush.msra.mxu0 %v5722_v58  ;;  %1929 = vmatpush.msrb.mxu3 %v4401_v28 }
 0x251   : > { %1765 = vmatpush.msra.mxu1 %v5723_v29  ;;  %1869 = vmatpush.msrb.mxu2 %v5727_v34 }
 0x252   : > { %1686 = vmatpush.msra.mxu0 %v5725_v23  ;;  %1632 = vmatmul.f32.gmra.mxu2 %v4720_v47 }
 0x253   : > { %1771 = vmatpush.msra.mxu1 %v5726_v43  ;;  %1872 = vmatpush.msrb.mxu2 %v5730_v35 }
 0x254   : > { %1688 = vmatpush.msra.mxu0 %v5728_v39  ;;  %1661 = vmatmul.f32.gmra.mxu3 %v4720_v47 }
 0x255   : > { %1777 = vmatpush.msra.mxu1 %v5729_v13  ;;  %1875 = vmatpush.msrb.mxu2 %v5733_v12  ;;  %v5751_v12 = vld [vmem:[#allocation19_spill] sm:$0xff] }
 0x256   : > { %1690 = vmatpush.msra.mxu0 %v5731_v0  ;;  %1931 = vmatpush.msrb.mxu3 %v5722_v58 }
 0x257   : > { %1783 = vmatpush.msra.mxu1 %v5732_v54  ;;  %1878 = vmatpush.msrb.mxu2 %v5737_v40  ;;  %v5746_v40 = vld [vmem:[#allocation17_spill] sm:$0xff] }
 0x258   : > { %1595 = vmatmul.f32.gmra.mxu1 %v5734_v31  ;;  %1692 = vmatpush.msra.mxu0 %v5735_v59 }
 0x259   : > { %1789 = vmatpush.msra.mxu1 %v5736_v63  ;;  %1933 = vmatpush.msrb.mxu3 %v5725_v23 }
 0x25a   : > { %1694 = vmatpush.msra.mxu0 %v5738_v46  ;;  %1881 = vmatpush.msrb.mxu2 %v5740_v18  ;;  %v349_v18 = vmul.f32 %v3948_v48, %v3948_v48  ;;  %v5752_v48 = vld [vmem:[#allocation59_spill] sm:$0xff] }
 0x25b   : > { %1795 = vmatpush.msra.mxu1 %v5739_v32  ;;  %1935 = vmatpush.msrb.mxu3 %v5728_v39  ;;  %v5747_v32 = vld [vmem:[#allocation57_spill] sm:$0xff] }
 0x25c   : > { %1696 = vmatpush.msra.mxu0 %v5741_v41  ;;  %1884 = vmatpush.msrb.mxu2 %v5743_v26  ;;  %v5750_v26 = vld [vmem:[#allocation58_spill] sm:$0xff]  ;;  %v1721_v52 = vand.u32 4294901760, %v349_v18 }
 0x25d   : > { %1801 = vmatpush.msra.mxu1 %v5742_v30  ;;  %1937 = vmatpush.msrb.mxu3 %v5731_v0  ;;  %v5748_v30 = vld [vmem:[#allocation50_spill] sm:$0xff] }
 0x25e   : > { %1702 = vmatmul.f32.vlgmr.msra.gmra.mxu0 %v1701_v60  ;;  %1887 = vmatpush.msrb.mxu2 %v5745_v36  ;;  %v5749_v60 = vld [vmem:[#allocation18_spill] sm:$0xff]  ;;  %v1709_v36 = vand.u32 4294901760, %v1708_v25  ;;  %v5755_v25 = vld [vmem:[#allocation23_spill] sm:$0xff] }
 0x25f   : > { %1807 = vmatpush.msra.mxu1 %v5744_v2  ;;  %1939 = vmatpush.msrb.mxu3 %v5735_v59  ;;  %v1715_v2 = vand.u32 4294901760, %v1714_v1 }
 0x260   : > { %1972 = vmatpush.msrb.mxu0 %v5746_v40  ;;  %1890 = vmatpush.msrb.mxu2 %v5748_v30  ;;  %v1722_v30 = vsub.f32 %v349_v18, %v1721_v52 }
 0x261   : > { %1813 = vmatpush.msra.mxu1 %v5747_v32  ;;  %1941 = vmatpush.msrb.mxu3 %v5738_v46  ;;  %v5753_v32 = vld [vmem:[#allocation20_spill] sm:$0xff] }
 0x262   : > { %1976 = vmatpush.msrb.mxu0 %v5749_v60  ;;  %1893 = vmatmul.f32.vlgmr.msrb.gmra.mxu2 %v1698_v7  ;;  %v1716_v7 = vsub.f32 %v1714_v1, %v1715_v2 }
 0x263   : > { %1819 = vmatpush.msra.mxu1 %v5750_v26  ;;  %1943 = vmatpush.msrb.mxu3 %v5741_v41  ;;  %v5754_v26 = vld [vmem:[#allocation21_spill] sm:$0xff] }
 0x264   : > { %1980 = vmatpush.msrb.mxu0 %v5751_v12  ;;  %1947 = vmatmul.f32.vlgmr.msrb.gmra.mxu3 %v1699_v33  ;;  %v1717_v33 = vand.u32 4294901760, %v1716_v7  ;;  %v5756_v12 = vld [vmem:[#allocation26_spill] sm:$0xff]  ;;  %v5760_v7 = vld [vmem:[#allocation41_spill] sm:$0xff] }
 0x265   : > { %1825 = vmatpush.msra.mxu1 %v5752_v48  ;;  %v1723_v48 = vand.u32 4294901760, %v1722_v30 }
 0x266   : > { %1984 = vmatpush.msrb.mxu0 %v5753_v32  ;;  %1827 = vmatmul.f32.vlgmr.msra.gmra.mxu1 %v4953_v56 }
 0x267   : > { %1710 = vmatmul.f32.gmra.mxu0 %v1709_v36  ;;  %2051 = vmatpush.msrb.mxu1 %v4347_v3  ;;  %v5757_v36 = vld [vmem:[#allocation28_spill] sm:$0xff]  ;;  %v1724_v18 = vsub.f32 %v1722_v30, %v1723_v48 }
 0x268   : > { %1988 = vmatpush.msrb.mxu0 %v5754_v26  ;;  %v5758_v26 = vld [vmem:[#allocation31_spill] sm:$0xff] }
 0x269   : > { %2053 = vmatpush.msrb.mxu1 %v4349_v4 }
 0x26a   : > { %1992 = vmatpush.msrb.mxu0 %v5755_v25  ;;  %1898 = vmatmul.f32.gmra.mxu2 %v1706_v51  ;;  %v5759_v51 = vld [vmem:[#allocation37_spill] sm:$0xff] }
 0x26b   : > { %2055 = vmatpush.msrb.mxu1 %v4351_v5 }
 0x26c   : > { %1996 = vmatpush.msrb.mxu0 %v5756_v12  ;;  %1953 = vmatmul.f32.gmra.mxu3 %v1707_v61  ;;  %v1725_v61 = vand.u32 4294901760, %v1724_v18  ;;  %v5764_v18 = vld [vmem:[#allocation53_spill] sm:$0xff] }
 0x26d   : > { %2057 = vmatpush.msrb.mxu1 %v4353_v9 }
 0x26e   : > { %2000 = vmatpush.msrb.mxu0 %v5757_v36  ;;  %1831 = vmatmul.f32.gmra.mxu1 %v4975_v6  ;;  %v5761_v36 = vld [vmem:[#allocation45_spill] sm:$0xff] }
 0x26f   : > { %1718 = vmatmul.f32.gmra.mxu0 %v1717_v33  ;;  %2059 = vmatpush.msrb.mxu1 %v4355_v10  ;;  %v5762_v33 = vld [vmem:[#allocation48_spill] sm:$0xff] }
 0x270   : > { %2004 = vmatpush.msrb.mxu0 %v5758_v26 }
 0x271   : > { %2061 = vmatpush.msrb.mxu1 %v4357_v11 }
 0x272   : > { %2008 = vmatpush.msrb.mxu0 %v5759_v51  ;;  %1903 = vmatmul.f32.gmra.mxu2 %v1714_v1  ;;  %v5763_v1 = vld [vmem:[#allocation51_spill] sm:$0xff] }
 0x273   : > { %2063 = vmatpush.msrb.mxu1 %v4370_v17 }
 0x274   : > { %2012 = vmatpush.msrb.mxu0 %v5760_v7  ;;  %1959 = vmatmul.f32.gmra.mxu3 %v1715_v2  ;;  %v5765_v2 = vld [vmem:[#allocation55_spill] sm:$0xff] }
 0x275   : > { %2065 = vmatpush.msrb.mxu1 %v4381_v22 }
 0x276   : > { %2016 = vmatpush.msrb.mxu0 %v5761_v36  ;;  %1835 = vmatmul.f32.gmra.mxu1 %v4995_v62 }
 0x277   : > { %1726 = vmatmul.f32.gmra.mxu0 %v1725_v61  ;;  %2067 = vmatpush.msrb.mxu1 %v4401_v28 }
 0x278   : > { %2020 = vmatpush.msrb.mxu0 %v5762_v33 }
 0x279   : > { %2069 = vmatpush.msrb.mxu1 %v5722_v58 }
 0x27a   : > { %2024 = vmatpush.msrb.mxu0 %v5763_v1  ;;  %1908 = vmatmul.f32.gmra.mxu2 %v1722_v30 }
 0x27b   : > { %2071 = vmatpush.msrb.mxu1 %v5725_v23 }
 0x27c   : > { %2028 = vmatpush.msrb.mxu0 %v5764_v18  ;;  %1965 = vmatmul.f32.gmra.mxu3 %v1723_v48 }
 0x27d   : > { %2073 = vmatpush.msrb.mxu1 %v5728_v39 }
 0x27e   : > { %2032 = vmatpush.msrb.mxu0 %v5765_v2  ;;  %1839 = vmatmul.f32.gmra.mxu1 %v1721_v52 }
 0x27f   : > { %2034 = vmatmul.f32.vlgmr.msrb.gmra.mxu0 %v4953_v56  ;;  %2075 = vmatpush.msrb.mxu1 %v5731_v0 }
 0x281   : > { %2077 = vmatpush.msrb.mxu1 %v5735_v59 }
 0x283   : > { %2079 = vmatpush.msrb.mxu1 %v5738_v46 }
 0x285   : > { %2081 = vmatpush.msrb.mxu1 %v5741_v41 }
 0x286   : > { %2083 = vmatmul.f32.vlgmr.msrb.gmra.mxu1 %v4953_v56 }
 0x287   : > { %2038 = vmatmul.f32.gmra.mxu0 %v4975_v6 }
 0x28e   : > { %2087 = vmatmul.f32.gmra.mxu1 %v4975_v6 }
 0x28f   : > { %2042 = vmatmul.f32.gmra.mxu0 %v4995_v62 }
 0x296   : > { %2091 = vmatmul.f32.gmra.mxu1 %v4995_v62 }
 0x297   : > { %2046 = vmatmul.f32.gmra.mxu0 %v1721_v52 }
 0x29e   : > { %2095 = vmatmul.f32.gmra.mxu1 %v1721_v52 }
 0x2b2   : > { %v5053_v30 = vpop.f32.mrf.mxu0 }
 0x2b3   : > { %5766 = vst [vmem:[#allocation77_spill] sm:$0xff] %v5053_v30 }
 0x2ba   : > { %v5055_v48 = vpop.f32.mrf.mxu1  ;;  %v5057_v61 = vpop.f32.mrf.mxu0 }
 0x2bb   : > { %5767 = vst [vmem:[#allocation78_spill] sm:$0xff] %v5055_v48 }
 0x2bc   : > { %5768 = vst [vmem:[#allocation79_spill] sm:$0xff] %v5057_v61 }
 0x2c2   : > { %v5061_v18 = vpop.f32.mrf.mxu0 }
 0x2c3   : > { %v5059_v2 = vpop.f32.mrf.mxu1  ;;  %5770 = vst [vmem:[#allocation81_spill] sm:$0xff] %v5061_v18 }
 0x2c4   : > { %5769 = vst [vmem:[#allocation80_spill] sm:$0xff] %v5059_v2 }
 0x2c6   : > { %v5069_v62 = vpop.f32.mrf.mxu2  ;;  %v5071_v30 = vpop.f32.mrf.mxu3 }
 0x2c7   : > { %5774 = vst [vmem:[#allocation85_spill] sm:$0xff] %v5069_v62 }
 0x2c8   : > { %5775 = vst [vmem:[#allocation86_spill] sm:$0xff] %v5071_v30 }
 0x2ca   : > { %v5065_v1 = vpop.f32.mrf.mxu0 }
 0x2cb   : > { %v5063_v56 = vpop.f32.mrf.mxu1  ;;  %5772 = vst [vmem:[#allocation83_spill] sm:$0xff] %v5065_v1 }
 0x2cc   : > { %5771 = vst [vmem:[#allocation82_spill] sm:$0xff] %v5063_v56 }
 0x2d5   : > { %v5067_v6 = vpop.f32.mrf.mxu1  ;;  %v5073_v48 = vpop.f32.mrf.mxu2 }
 0x2d6   : > { %5773 = vst [vmem:[#allocation84_spill] sm:$0xff] %v5067_v6 }
 0x2d7   : > { %5776 = vst [vmem:[#allocation87_spill] sm:$0xff] %v5073_v48  ;;  %v5075_v2 = vpop.f32.mrf.mxu3 }
 0x2d8   : > { %5777 = vst [vmem:[#allocation88_spill] sm:$0xff] %v5075_v2 }
 0x2db   : > { %v1703_v33 = vpop.f32.mrf.mxu0 }
 0x2e3   : > { %v1828_v52 = vpop.f32.mrf.mxu1 }
 0x2e4   : > { %v1711_v36 = vpop.f32.mrf.mxu0  ;;  %v1829_v48 = vadd.f32 %v1828_v52, %v1703_v33  ;;  %v5780_v52 = vld [vmem:[#allocation34_spill] sm:$0xff] }
 0x2e5   : > { %v1894_v18 = vpop.f32.mrf.mxu2 }
 0x2e6   : > { %v1895_v2 = vadd.f32 %v1894_v18, %v1829_v48 }
 0x2e7   : > { %v1948_v26 = vpop.f32.mrf.mxu3 }
 0x2e8   : > { %v1949_v43 = vadd.f32 %v1948_v26, %v1895_v2 }
 0x2eb   : > { %v1832_v61 = vpop.f32.mrf.mxu1 }
 0x2ec   : > { %v1719_v7 = vpop.f32.mrf.mxu0  ;;  %v1833_v41 = vadd.f32 %v1832_v61, %v1711_v36 }
 0x2ed   : > { %v1899_v6 = vpop.f32.mrf.mxu2 }
 0x2ee   : > { %v1900_v35 = vadd.f32 %v1899_v6, %v1833_v41 }
 0x2ef   : > { %v1954_v25 = vpop.f32.mrf.mxu3 }
 0x2f0   : > { %v1955_v13 = vadd.f32 %v1954_v25, %v1900_v35 }
 0x2f3   : > { %v1836_v51 = vpop.f32.mrf.mxu1 }
 0x2f4   : > { %v1727_v56 = vpop.f32.mrf.mxu0  ;;  %v1837_v40 = vadd.f32 %v1836_v51, %v1719_v7 }
 0x2f5   : > { %v1904_v60 = vpop.f32.mrf.mxu2 }
 0x2f6   : > { %v1905_v63 = vadd.f32 %v1904_v60, %v1837_v40 }
 0x2f7   : > { %v1960_v30 = vpop.f32.mrf.mxu3 }
 0x2f8   : > { %v1961_v31 = vadd.f32 %v1960_v30, %v1905_v63 }
 0x2fb   : > { %v1840_v1 = vpop.f32.mrf.mxu1 }
 0x2fc   : > { %v2035_v12 = vpop.f32.mrf.mxu0  ;;  %v1841_v54 = vadd.f32 %v1840_v1, %v1727_v56  ;;  %v5778_v56 = vld [vmem:[#allocation62_spill] sm:$0xff] }
 0x2fd   : > { %v1909_v0 = vpop.f32.mrf.mxu2  ;;  %v2036_v51 = vadd.f32 %v2035_v12, %v1949_v43  ;;  %v351_v6 = vmul.f32 %v5778_v56, %v5778_v56 }
 0x2fe   : > { %v1910_v23 = vadd.f32 %v1909_v0, %v1841_v54 }
 0x2ff   : > { %v1966_v58 = vpop.f32.mrf.mxu3 }
 0x300   : > { %v1967_v61 = vadd.f32 %v1966_v58, %v1910_v23 }
 0x303   : > { %v2084_v32 = vpop.f32.mrf.mxu1 }
 0x304   : > { %v2039_v62 = vpop.f32.mrf.mxu0  ;;  %v2085_v33 = vadd.f32 %v2084_v32, %v2036_v51  ;;  %v5095_v32 = vld [vmem:[%s4333_s12] sm:$0xff]  ;;  %v5781_v51 = vld [vmem:[#allocation22_spill] sm:$0xff] }
 0x305   : > { %v2040_v53 = vadd.f32 %v2039_v62, %v1955_v13  ;;  %v350_v25 = vmul.f32 %v5095_v32, %v5095_v32  ;;  %v5779_v62 = vld [vmem:[#allocation24_spill] sm:$0xff] }
 0x306   : > { %v2117_v63 = vand.u32 4294901760, %v2085_v33 }
 0x307   : > { %v5107_v2 = vand.u32 4294901760, %v350_v25 }
 0x309   : > { %v5118_v48 = vsub.f32 %v350_v25, %v5107_v2  ;;  %v5800_v25 = vld [vmem:[#allocation39_spill] sm:$0xff] }
 0x30b   : > { %v2088_v46 = vpop.f32.mrf.mxu1 }
 0x30c   : > { %v2043_v59 = vpop.f32.mrf.mxu0  ;;  %v2089_v36 = vadd.f32 %v2088_v46, %v2040_v53 }
 0x30d   : > { %v2044_v39 = vadd.f32 %v2043_v59, %v1961_v31  ;;  %v2167_v59 = vsub.f32 %v2085_v33, %v2117_v63  ;;  %v5783_v33 = vld [vmem:[#allocation38_spill] sm:$0xff] }
 0x30e   : > { %v2115_v60 = vand.u32 4294901760, %v2089_v36 }
 0x30f   : > { %v2168_v43 = vand.u32 4294901760, %v2167_v59 }
 0x310   : > { %v2161_v35 = vsub.f32 %v2089_v36, %v2115_v60  ;;  %v5604_v36 = vand.u32 4294901760, %v5118_v48 }
 0x311   : > { %v2169_v54 = vsub.f32 %v2167_v59, %v2168_v43 }
 0x312   : > { %v2162_v53 = vand.u32 4294901760, %v2161_v35 }
 0x313   : > { %v2092_v34 = vpop.f32.mrf.mxu1  ;;  %v2170_v46 = vand.u32 4294901760, %v2169_v54  ;;  %v5798_v54 = vld [vmem:[#allocation44_spill] sm:$0xff] }
 0x314   : > { %v2093_v29 = vadd.f32 %v2092_v34, %v2044_v39  ;;  %v2047_v7 = vpop.f32.mrf.mxu0  ;;  %v2163_v13 = vsub.f32 %v2161_v35, %v2162_v53 }
 0x315   : > { %v2048_v41 = vadd.f32 %v2047_v7, %v1967_v61  ;;  %v5131_v7 = vand.u32 4294901760, %v351_v6  ;;  %v5782_v61 = vld [vmem:[#allocation27_spill] sm:$0xff] }
 0x316   : > { %v2113_v40 = vand.u32 4294901760, %v2093_v29  ;;  %v2164_v12 = vand.u32 4294901760, %v2163_v13  ;;  %v5796_v13 = vld [vmem:[#allocation52_spill] sm:$0xff] }
 0x318   : > { %v2155_v1 = vsub.f32 %v2093_v29, %v2113_v40 }
 0x31a   : > { %v2156_v34 = vand.u32 4294901760, %v2155_v1 }
 0x31b   : > { %v2096_v18 = vpop.f32.mrf.mxu1 }
 0x31c   : > { %v2097_v30 = vadd.f32 %v2096_v18, %v2048_v41  ;;  %v2157_v23 = vsub.f32 %v2155_v1, %v2156_v34  ;;  %v5786_v41 = vld [vmem:[#allocation42_spill] sm:$0xff]  ;;  %v2350_v18 = vsub.f32 %v5118_v48, %v5604_v36  ;;  %v5803_v36 = vld [vmem:[#allocation17_spill] sm:$0xff] }
 0x31e   : > { %v2111_v31 = vand.u32 4294901760, %v2097_v30  ;;  %v2158_v0 = vand.u32 4294901760, %v2157_v23 }
 0x320   : > { %v2149_v26 = vsub.f32 %v2097_v30, %v2111_v31  ;;  %2112 = vmatpush.msra.mxu2 %v2111_v31  ;;  %2299 = vmatpush.msra.mxu1 %v2111_v31 }
 0x322   : > { %v2150_v39 = vand.u32 4294901760, %v2149_v26  ;;  %2114 = vmatpush.msra.mxu2 %v2113_v40  ;;  %2301 = vmatpush.msra.mxu1 %v2113_v40 }
 0x324   : > { %v2151_v58 = vsub.f32 %v2149_v26, %v2150_v39  ;;  %2116 = vmatpush.msra.mxu2 %v2115_v60  ;;  %2264 = vmatpush.msra.mxu0 %v2150_v39  ;;  %v5793_v39 = vld [vmem:[#allocation49_spill] sm:$0xff] }
 0x325   : > { %2303 = vmatpush.msra.mxu1 %v2115_v60 }
 0x326   : > { %2118 = vmatpush.msra.mxu2 %v2117_v63  ;;  %2268 = vmatpush.msra.mxu0 %v2156_v34  ;;  %v2152_v29 = vand.u32 4294901760, %v2151_v58  ;;  %v5792_v34 = vld [vmem:[#allocation36_spill] sm:$0xff] }
 0x327   : > { %2305 = vmatpush.msra.mxu1 %v2117_v63  ;;  %2124 = vmatmul.f32.vlgmr.msra.gmra.mxu2 %v4727_v55  ;;  %v5794_v58 = vld [vmem:[#allocation32_spill] sm:$0xff] }
 0x328   : > { %2195 = vmatpush.msrb.mxu2 %v2149_v26  ;;  %2153 = vmatpush.msra.mxu3 %v2152_v29  ;;  %v5791_v26 = vld [vmem:[#allocation29_spill] sm:$0xff]  ;;  %v5795_v29 = vld [vmem:[#allocation40_spill] sm:$0xff] }
 0x329   : > { %2272 = vmatpush.msra.mxu0 %v2162_v53  ;;  %2563 = vmatpush.msrb.mxu1 %v4347_v3  ;;  %v2351_v53 = vand.u32 4294901760, %v2350_v18 }
 0x32a   : > { %2198 = vmatpush.msrb.mxu2 %v2155_v1  ;;  %2159 = vmatpush.msra.mxu3 %v2158_v0  ;;  %v5787_v1 = vld [vmem:[#allocation63_spill] sm:$0xff] }
 0x32b   : > { %2276 = vmatpush.msra.mxu0 %v2168_v43  ;;  %2565 = vmatpush.msrb.mxu1 %v4349_v4  ;;  %v352_v30 = vmul.f32 %v5787_v1, %v5787_v1  ;;  %v5797_v0 = vld [vmem:[#allocation35_spill] sm:$0xff]  ;;  %v5802_v1 = vld [vmem:[#allocation56_spill] sm:$0xff] }
 0x32c   : > { %2201 = vmatpush.msrb.mxu2 %v2161_v35  ;;  %2165 = vmatpush.msra.mxu3 %v2164_v12  ;;  %v5788_v35 = vld [vmem:[#allocation33_spill] sm:$0xff]  ;;  %v5799_v12 = vld [vmem:[#allocation54_spill] sm:$0xff] }
 0x32d   : > { %2495 = vmatpush.msrb.mxu0 %v4361_v14  ;;  %2567 = vmatpush.msrb.mxu1 %v4351_v5  ;;  %v5158_v43 = vand.u32 4294901760, %v352_v30 }
 0x32e   : > { %2204 = vmatpush.msrb.mxu2 %v2167_v59  ;;  %2171 = vmatpush.msra.mxu3 %v2170_v46  ;;  %v5790_v59 = vld [vmem:[#allocation61_spill] sm:$0xff] }
 0x32f   : > { %2173 = vmatmul.f32.vlgmr.msra.gmra.mxu3 %v4711_v42  ;;  %2132 = vmatmul.f32.gmra.mxu2 %v4737_v49  ;;  %v2364_v56 = vsub.f32 %v352_v30, %v5158_v43 }
 0x330   : > { %2316 = vmatpush.msra.mxu2 %v4347_v3  ;;  %2229 = vmatpush.msrb.mxu3 %v2111_v31  ;;  %v5789_v31 = vld [vmem:[#allocation46_spill] sm:$0xff] }
 0x331   : > { %2498 = vmatpush.msrb.mxu0 %v4364_v15  ;;  %2569 = vmatpush.msrb.mxu1 %v4353_v9  ;;  %v2365_v30 = vand.u32 4294901760, %v2364_v56 }
 0x332   : > { %2318 = vmatpush.msra.mxu2 %v4349_v4  ;;  %2231 = vmatpush.msrb.mxu3 %v2113_v40  ;;  %v5784_v40 = vld [vmem:[#allocation25_spill] sm:$0xff] }
 0x333   : > { %2501 = vmatpush.msrb.mxu0 %v4368_v16  ;;  %2571 = vmatpush.msrb.mxu1 %v4355_v10 }
 0x334   : > { %2320 = vmatpush.msra.mxu2 %v4351_v5  ;;  %2233 = vmatpush.msrb.mxu3 %v2115_v60  ;;  %v5785_v60 = vld [vmem:[#allocation30_spill] sm:$0xff] }
 0x335   : > { %2278 = vmatmul.f32.vlgmr.msra.gmra.mxu0 %v4711_v42  ;;  %2307 = vmatmul.f32.vlgmr.msra.gmra.mxu1 %v4711_v42 }
 0x336   : > { %2322 = vmatpush.msra.mxu2 %v4353_v9  ;;  %2504 = vmatpush.msrb.mxu0 %v4373_v19 }
 0x337   : > { %2235 = vmatpush.msrb.mxu3 %v2117_v63  ;;  %2207 = vmatmul.f32.vlgmr.msrb.gmra.mxu2 %v4714_v45  ;;  %v5145_v63 = vsub.f32 %v351_v6, %v5131_v7  ;;  %v5801_v6 = vld [vmem:[#allocation64_spill] sm:$0xff] }
 0x338   : > { %2324 = vmatpush.msra.mxu2 %v4355_v10  ;;  %2177 = vmatmul.f32.gmra.mxu3 %v4720_v47  ;;  %v353_v18 = vmul.f32 %v5801_v6, %v5801_v6  ;;  %v5808_v6 = vld [vmem:[#allocation58_spill] sm:$0xff] }
 0x339   : > { %2385 = vmatpush.msra.mxu3 %v4423_v37  ;;  %2507 = vmatpush.msrb.mxu0 %v4376_v20  ;;  %v2357_v23 = vand.u32 4294901760, %v5145_v63 }
 0x33a   : > { %2326 = vmatpush.msra.mxu2 %v4357_v11  ;;  %2573 = vmatpush.msrb.mxu1 %v4357_v11 }
 0x33b   : > { %2391 = vmatpush.msra.mxu3 %v4425_v38  ;;  %2510 = vmatpush.msrb.mxu0 %v4379_v21  ;;  %v2358_v46 = vsub.f32 %v5145_v63, %v2357_v23 }
 0x33c   : > { %2328 = vmatpush.msra.mxu2 %v4370_v17  ;;  %2575 = vmatpush.msrb.mxu1 %v4370_v17 }
 0x33d   : > { %2397 = vmatpush.msra.mxu3 %v4440_v44  ;;  %2513 = vmatpush.msrb.mxu0 %v4399_v27 }
 0x33e   : > { %2330 = vmatpush.msra.mxu2 %v4381_v22  ;;  %2577 = vmatpush.msrb.mxu1 %v4381_v22 }
 0x33f   : > { %2403 = vmatpush.msra.mxu3 %v4455_v50  ;;  %2212 = vmatmul.f32.gmra.mxu2 %v4725_v8 }
 0x340   : > { %2332 = vmatpush.msra.mxu2 %v4401_v28  ;;  %2239 = vmatmul.f32.vlgmr.msrb.gmra.mxu3 %v4718_v24 }
 0x341   : > { %2409 = vmatpush.msra.mxu3 %v4472_v57  ;;  %2516 = vmatpush.msrb.mxu0 %v5781_v51 }
 0x342   : > { %2334 = vmatpush.msra.mxu2 %v5779_v62  ;;  %2579 = vmatpush.msrb.mxu1 %v4401_v28 }
 0x343   : > { %2415 = vmatpush.msra.mxu3 %v5780_v52  ;;  %2519 = vmatpush.msrb.mxu0 %v5784_v40 }
 0x344   : > { %2336 = vmatpush.msra.mxu2 %v5782_v61  ;;  %2282 = vmatmul.f32.gmra.mxu0 %v4720_v47 }
 0x345   : > { %2421 = vmatpush.msra.mxu3 %v5783_v33  ;;  %2311 = vmatmul.f32.gmra.mxu1 %v4720_v47 }
 0x346   : > { %2338 = vmatpush.msra.mxu2 %v5785_v60  ;;  %2522 = vmatpush.msrb.mxu0 %v5791_v26 }
 0x347   : > { %2427 = vmatpush.msra.mxu3 %v5786_v41  ;;  %2581 = vmatpush.msrb.mxu1 %v5779_v62 }
 0x348   : > { %2340 = vmatpush.msra.mxu2 %v5788_v35  ;;  %2245 = vmatmul.f32.gmra.mxu3 %v5790_v59 }
 0x349   : > { %2433 = vmatpush.msra.mxu3 %v5789_v31  ;;  %2525 = vmatpush.msrb.mxu0 %v5794_v58 }
 0x34a   : > { %2342 = vmatpush.msra.mxu2 %v5792_v34  ;;  %2583 = vmatpush.msrb.mxu1 %v5782_v61 }
 0x34b   : > { %2439 = vmatpush.msra.mxu3 %v5793_v39  ;;  %2528 = vmatpush.msrb.mxu0 %v5797_v0  ;;  %v5805_v0 = vld [vmem:[#allocation57_spill] sm:$0xff]  ;;  %v5179_v39 = vand.u32 4294901760, %v353_v18 }
 0x34c   : > { %2344 = vmatpush.msra.mxu2 %v5795_v29  ;;  %2585 = vmatpush.msrb.mxu1 %v5785_v60 }
 0x34d   : > { %2445 = vmatpush.msra.mxu3 %v5796_v13  ;;  %2531 = vmatpush.msrb.mxu0 %v5800_v25  ;;  %v5804_v13 = vld [vmem:[#allocation43_spill] sm:$0xff] }
 0x34e   : > { %2346 = vmatpush.msra.mxu2 %v5798_v54  ;;  %2587 = vmatpush.msrb.mxu1 %v5788_v35  ;;  %v5807_v25 = vld [vmem:[#allocation47_spill] sm:$0xff] }
 0x34f   : > { %2451 = vmatpush.msra.mxu3 %v5799_v12  ;;  %2352 = vmatmul.f32.vlgmr.msra.gmra.mxu2 %v2351_v53  ;;  %v5806_v53 = vld [vmem:[#allocation18_spill] sm:$0xff]  ;;  %v2359_v12 = vand.u32 4294901760, %v2358_v46  ;;  %v2366_v46 = vsub.f32 %v2364_v56, %v2365_v30 }
 0x350   : > { %2622 = vmatpush.msrb.mxu2 %v5803_v36  ;;  %2534 = vmatpush.msrb.mxu0 %v5804_v13  ;;  %v5810_v36 = vld [vmem:[#allocation50_spill] sm:$0xff]  ;;  %v5811_v13 = vld [vmem:[#allocation59_spill] sm:$0xff] }
 0x351   : > { %2457 = vmatpush.msra.mxu3 %v5802_v1  ;;  %v5809_v1 = vld [vmem:[#allocation19_spill] sm:$0xff]  ;;  %2589 = vmatpush.msrb.mxu1 %v5792_v34 }
 0x352   : > { %2626 = vmatpush.msrb.mxu2 %v5806_v53  ;;  %2537 = vmatpush.msrb.mxu0 %v5807_v25  ;;  %v2372_v53 = vsub.f32 %v353_v18, %v5179_v39  ;;  %v5813_v25 = vld [vmem:[#allocation21_spill] sm:$0xff]  ;;  %v5816_v18 = vand.u32 4294901760, %v5118_v48 }
 0x353   : > { %2463 = vmatpush.msra.mxu3 %v5805_v0  ;;  %v5812_v0 = vld [vmem:[#allocation20_spill] sm:$0xff]  ;;  %2591 = vmatpush.msrb.mxu1 %v5795_v29 }
 0x354   : > { %2630 = vmatpush.msrb.mxu2 %v5809_v1  ;;  %2540 = vmatpush.msrb.mxu0 %v5810_v36  ;;  %v5814_v1 = vld [vmem:[#allocation23_spill] sm:$0xff] }
 0x355   : > { %2469 = vmatpush.msra.mxu3 %v5808_v6  ;;  %2543 = vmatmul.f32.vlgmr.msrb.gmra.mxu0 %v5118_v48  ;;  %v5818_v6 = vld [vmem:[#allocation31_spill] sm:$0xff] }
 0x356   : > { %2634 = vmatpush.msrb.mxu2 %v5812_v0  ;;  %2593 = vmatpush.msrb.mxu1 %v5798_v54  ;;  %v5815_v0 = vld [vmem:[#allocation26_spill] sm:$0xff] }
 0x357   : > { %2475 = vmatpush.msra.mxu3 %v5811_v13  ;;  %2360 = vmatmul.f32.gmra.mxu2 %v2359_v12  ;;  %v2367_v13 = vand.u32 4294901760, %v2366_v46  ;;  %v2373_v12 = vand.u32 4294901760, %v2372_v53  ;;  %v5819_v46 = vld [vmem:[#allocation37_spill] sm:$0xff] }
 0x358   : > { %2477 = vmatmul.f32.vlgmr.msra.gmra.mxu3 %v5107_v2  ;;  %2638 = vmatpush.msrb.mxu2 %v5813_v25  ;;  %v5817_v25 = vld [vmem:[#allocation28_spill] sm:$0xff] }
 0x359   : > { %2701 = vmatpush.msrb.mxu3 %v4347_v3  ;;  %2597 = vmatmul.f32.vlgmr.msrb.gmra.mxu1 %v5816_v18  ;;  %v5820_v18 = vld [vmem:[#allocation41_spill] sm:$0xff] }
 0x35a   : > { %2642 = vmatpush.msrb.mxu2 %v5814_v1  ;;  %v2374_v1 = vsub.f32 %v2372_v53, %v2373_v12 }
 0x35b   : > { %2703 = vmatpush.msrb.mxu3 %v4349_v4 }
 0x35c   : > { %2646 = vmatpush.msrb.mxu2 %v5815_v0  ;;  %v2375_v48 = vand.u32 4294901760, %v2374_v1  ;;  %v5824_v1 = vld [vmem:[#allocation53_spill] sm:$0xff] }
 0x35d   : > { %2705 = vmatpush.msrb.mxu3 %v4351_v5  ;;  %2548 = vmatmul.f32.gmra.mxu0 %v5145_v63  ;;  %v5823_v63 = vld [vmem:[#allocation51_spill] sm:$0xff] }
 0x35e   : > { %2650 = vmatpush.msrb.mxu2 %v5817_v25 }
 0x35f   : > { %2707 = vmatpush.msrb.mxu3 %v4353_v9  ;;  %2368 = vmatmul.f32.gmra.mxu2 %v2367_v13  ;;  %v5821_v13 = vld [vmem:[#allocation45_spill] sm:$0xff] }
 0x360   : > { %2481 = vmatmul.f32.gmra.mxu3 %v5131_v7  ;;  %2654 = vmatpush.msrb.mxu2 %v5818_v6  ;;  %v5822_v6 = vld [vmem:[#allocation48_spill] sm:$0xff] }
 0x361   : > { %2709 = vmatpush.msrb.mxu3 %v4355_v10  ;;  %2603 = vmatmul.f32.gmra.mxu1 %v2357_v23  ;;  %v5825_v23 = vld [vmem:[#allocation55_spill] sm:$0xff] }
 0x362   : > { %2658 = vmatpush.msrb.mxu2 %v5819_v46 }
 0x363   : > { %2711 = vmatpush.msrb.mxu3 %v4357_v11 }
 0x364   : > { %2662 = vmatpush.msrb.mxu2 %v5820_v18 }
 0x365   : > { %2713 = vmatpush.msrb.mxu3 %v4370_v17  ;;  %2553 = vmatmul.f32.gmra.mxu0 %v2364_v56 }
 0x366   : > { %2666 = vmatpush.msrb.mxu2 %v5821_v13 }
 0x367   : > { %2715 = vmatpush.msrb.mxu3 %v4381_v22  ;;  %2376 = vmatmul.f32.gmra.mxu2 %v2375_v48 }
 0x368   : > { %2485 = vmatmul.f32.gmra.mxu3 %v5158_v43  ;;  %2670 = vmatpush.msrb.mxu2 %v5822_v6 }
 0x369   : > { %2717 = vmatpush.msrb.mxu3 %v4401_v28  ;;  %2609 = vmatmul.f32.gmra.mxu1 %v2365_v30 }
 0x36a   : > { %2674 = vmatpush.msrb.mxu2 %v5823_v63 }
 0x36b   : > { %2719 = vmatpush.msrb.mxu3 %v5779_v62 }
 0x36c   : > { %2678 = vmatpush.msrb.mxu2 %v5824_v1 }
 0x36d   : > { %2721 = vmatpush.msrb.mxu3 %v5782_v61  ;;  %2558 = vmatmul.f32.gmra.mxu0 %v2372_v53 }
 0x36e   : > { %2682 = vmatpush.msrb.mxu2 %v5825_v23 }
 0x36f   : > { %2723 = vmatpush.msrb.mxu3 %v5785_v60  ;;  %2684 = vmatmul.f32.vlgmr.msrb.gmra.mxu2 %v5107_v2 }
 0x370   : > { %2489 = vmatmul.f32.gmra.mxu3 %v5179_v39 }
 0x371   : > { %2725 = vmatpush.msrb.mxu3 %v5788_v35  ;;  %2615 = vmatmul.f32.gmra.mxu1 %v2373_v12 }
 0x373   : > { %2727 = vmatpush.msrb.mxu3 %v5792_v34 }
 0x375   : > { %2729 = vmatpush.msrb.mxu3 %v5795_v29 }
 0x377   : > { %2731 = vmatpush.msrb.mxu3 %v5798_v54  ;;  %2688 = vmatmul.f32.gmra.mxu2 %v5131_v7 }
 0x378   : > { %2733 = vmatmul.f32.vlgmr.msrb.gmra.mxu3 %v5107_v2 }
 0x37f   : > { %2692 = vmatmul.f32.gmra.mxu2 %v5158_v43 }
 0x380   : > { %2737 = vmatmul.f32.gmra.mxu3 %v5131_v7 }
 0x387   : > { %2696 = vmatmul.f32.gmra.mxu2 %v5179_v39 }
 0x388   : > { %2741 = vmatmul.f32.gmra.mxu3 %v5158_v43 }
 0x390   : > { %2745 = vmatmul.f32.gmra.mxu3 %v5179_v39 }
 0x3aa   : > { %v2125_v56 = vpop.f32.mrf.mxu2 }
 0x3b2   : > { %v2174_v53 = vpop.f32.mrf.mxu3  ;;  %v2133_v30 = vpop.f32.mrf.mxu2 }
 0x3b3   : > { %v2175_v12 = vadd.f32 %v2174_v53, %v2125_v56  ;;  %v2279_v6 = vpop.f32.mrf.mxu0  ;;  %v2308_v2 = vpop.f32.mrf.mxu1 }
 0x3ba   : > { %v2208_v23 = vpop.f32.mrf.mxu2 }
 0x3bb   : > { %v2178_v48 = vpop.f32.mrf.mxu3  ;;  %v2209_v63 = vadd.f32 %v2208_v23, %v2175_v12 }
 0x3bc   : > { %v2179_v1 = vadd.f32 %v2178_v48, %v2133_v30 }
 0x3c1   : > { %v2283_v36 = vpop.f32.mrf.mxu0 }
 0x3c2   : > { %v2213_v13 = vpop.f32.mrf.mxu2  ;;  %v2312_v54 = vpop.f32.mrf.mxu1 }
 0x3c3   : > { %v2240_v18 = vpop.f32.mrf.mxu3  ;;  %v2214_v46 = vadd.f32 %v2213_v13, %v2179_v1 }
 0x3c4   : > { %v2241_v7 = vadd.f32 %v2240_v18, %v2209_v63 }
 0x3c6   : > { %v2280_v25 = vadd.f32 %v2279_v6, %v2241_v7 }
 0x3c8   : > { %v5234_v0 = vadd.f32 %v2308_v2, %v2280_v25 }
 0x3ca   : > { %5826 = vst [vmem:[#allocation62_spill] sm:$0xff] %v5234_v0 }
 0x3cb   : > { %v2246_v43 = vpop.f32.mrf.mxu3 }
 0x3cc   : > { %v2247_v39 = vadd.f32 %v2246_v43, %v2214_v46 }
 0x3ce   : > { %v2284_v29 = vadd.f32 %v2283_v36, %v2247_v39 }
 0x3d0   : > { %v5236_v34 = vadd.f32 %v2312_v54, %v2284_v29 }
 0x3d2   : > { %5827 = vst [vmem:[#allocation63_spill] sm:$0xff] %v5236_v34  ;;  %v2353_v56 = vpop.f32.mrf.mxu2  ;;  %v2544_v48 = vpop.f32.mrf.mxu0 }
 0x3d6   : > { %v2598_v13 = vpop.f32.mrf.mxu1 }
 0x3da   : > { %v2361_v53 = vpop.f32.mrf.mxu2  ;;  %v2549_v25 = vpop.f32.mrf.mxu0 }
 0x3db   : > { %v2478_v30 = vpop.f32.mrf.mxu3 }
 0x3dc   : > { %v2479_v43 = vadd.f32 %v2478_v30, %v2353_v56 }
 0x3de   : > { %v2604_v63 = vpop.f32.mrf.mxu1  ;;  %v2545_v31 = vadd.f32 %v2544_v48, %v2479_v43  ;;  %v5838_v43 = vld [vmem:[#allocation33_spill] sm:$0xff] }
 0x3e0   : > { %v2599_v61 = vadd.f32 %v2598_v13, %v2545_v31 }
 0x3e2   : > { %v2369_v23 = vpop.f32.mrf.mxu2  ;;  %v2554_v46 = vpop.f32.mrf.mxu0 }
 0x3e3   : > { %v2482_v12 = vpop.f32.mrf.mxu3 }
 0x3e4   : > { %v2483_v36 = vadd.f32 %v2482_v12, %v2361_v53 }
 0x3e6   : > { %v2610_v29 = vpop.f32.mrf.mxu1  ;;  %v2550_v0 = vadd.f32 %v2549_v25, %v2483_v36 }
 0x3e8   : > { %v2605_v60 = vadd.f32 %v2604_v63, %v2550_v0  ;;  %v5834_v63 = vld [vmem:[#allocation25_spill] sm:$0xff] }
 0x3ea   : > { %v2377_v59 = vpop.f32.mrf.mxu2  ;;  %v2559_v41 = vpop.f32.mrf.mxu0 }
 0x3eb   : > { %v2486_v58 = vpop.f32.mrf.mxu3 }
 0x3ec   : > { %v2487_v7 = vadd.f32 %v2486_v58, %v2369_v23 }
 0x3ee   : > { %v2555_v39 = vadd.f32 %v2554_v46, %v2487_v7  ;;  %v2616_v24 = vpop.f32.mrf.mxu1 }
 0x3f0   : > { %v2611_v35 = vadd.f32 %v2610_v29, %v2555_v39  ;;  %v5836_v29 = vld [vmem:[#allocation42_spill] sm:$0xff] }
 0x3f1   : > { %v5839_v39 = vld [vmem:[#allocation46_spill] sm:$0xff] }
 0x3f2   : > { %v2685_v6 = vpop.f32.mrf.mxu2 }
 0x3f3   : > { %v2490_v18 = vpop.f32.mrf.mxu3  ;;  %v2686_v58 = vadd.f32 %v2685_v6, %v2599_v61 }
 0x3f4   : > { %v2491_v26 = vadd.f32 %v2490_v18, %v2377_v59 }
 0x3f6   : > { %v2560_v51 = vadd.f32 %v2559_v41, %v2491_v26 }
 0x3f8   : > { %v2617_v12 = vadd.f32 %v2616_v24, %v2560_v51 }
 0x3fa   : > { %v2689_v1 = vpop.f32.mrf.mxu2 }
 0x3fb   : > { %v2734_v2 = vpop.f32.mrf.mxu3  ;;  %v2690_v52 = vadd.f32 %v2689_v1, %v2605_v60 }
 0x3fc   : > { %v2735_v56 = vadd.f32 %v2734_v2, %v2686_v58  ;;  %v5835_v2 = vld [vmem:[#allocation30_spill] sm:$0xff]  ;;  %v5840_v58 = vld [vmem:[#allocation32_spill] sm:$0xff] }
 0x3fe   : > { %v2767_v7 = vand.u32 4294901760, %v2735_v56 }
 0x402   : > { %v2693_v34 = vpop.f32.mrf.mxu2 }
 0x403   : > { %v2738_v54 = vpop.f32.mrf.mxu3  ;;  %v2694_v40 = vadd.f32 %v2693_v34, %v2611_v35  ;;  %v2817_v34 = vsub.f32 %v2735_v56, %v2767_v7  ;;  %v3953_v56 = vld [vmem:[%s4326_s9 + $0x10] sm:$0xff] }
 0x404   : > { %v2739_v53 = vadd.f32 %v2738_v54, %v2690_v52  ;;  %v5837_v54 = vld [vmem:[#allocation29_spill] sm:$0xff] }
 0x405   : > { %v2818_v61 = vand.u32 4294901760, %v2817_v34 }
 0x406   : > { %v2765_v46 = vand.u32 4294901760, %v2739_v53 }
 0x407   : > { %v2819_v26 = vsub.f32 %v2817_v34, %v2818_v61 }
 0x408   : > { %v2811_v0 = vsub.f32 %v2739_v53, %v2765_v46 }
 0x409   : > { %v2820_v6 = vand.u32 4294901760, %v2819_v26 }
 0x40a   : > { %v2697_v23 = vpop.f32.mrf.mxu2  ;;  %v2812_v52 = vand.u32 4294901760, %v2811_v0 }
 0x40b   : > { %v2742_v33 = vpop.f32.mrf.mxu3  ;;  %v2698_v25 = vadd.f32 %v2697_v23, %v2617_v12  ;;  %v5841_v23 = vld [vmem:[#allocation61_spill] sm:$0xff] }
 0x40c   : > { %v2743_v62 = vadd.f32 %v2742_v33, %v2694_v40  ;;  %v2813_v60 = vsub.f32 %v2811_v0, %v2812_v52 }
 0x40e   : > { %v2763_v30 = vand.u32 4294901760, %v2743_v62  ;;  %v2814_v13 = vand.u32 4294901760, %v2813_v60  ;;  %v3955_v60 = vld [vmem:[%s4326_s9 + $0x18] sm:$0xff] }
 0x410   : > { %v2805_v59 = vsub.f32 %v2743_v62, %v2763_v30 }
 0x412   : > { %v2806_v33 = vand.u32 4294901760, %v2805_v59 }
 0x413   : > { %v2746_v48 = vpop.f32.mrf.mxu3 }
 0x414   : > { %v2747_v18 = vadd.f32 %v2746_v48, %v2698_v25  ;;  %v2807_v51 = vsub.f32 %v2805_v59, %v2806_v33  ;;  %v5842_v25 = vld [vmem:[#allocation36_spill] sm:$0xff]  ;;  %v5843_v48 = vld [vmem:[#allocation49_spill] sm:$0xff] }
 0x416   : > { %v2761_v35 = vand.u32 4294901760, %v2747_v18  ;;  %v2808_v41 = vand.u32 4294901760, %v2807_v51  ;;  %v5852_v51 = vld [vmem:[#allocation47_spill] sm:$0xff] }
 0x418   : > { %v2799_v31 = vsub.f32 %v2747_v18, %v2761_v35  ;;  %2762 = vmatpush.msra.mxu0 %v2761_v35  ;;  %2949 = vmatpush.msra.mxu3 %v2761_v35  ;;  %v5846_v18 = vld [vmem:[#allocation52_spill] sm:$0xff] }
 0x41a   : > { %v2800_v40 = vand.u32 4294901760, %v2799_v31  ;;  %2764 = vmatpush.msra.mxu0 %v2763_v30  ;;  %2951 = vmatpush.msra.mxu3 %v2763_v30 }
 0x41c   : > { %v2801_v24 = vsub.f32 %v2799_v31, %v2800_v40  ;;  %2766 = vmatpush.msra.mxu0 %v2765_v46  ;;  %2914 = vmatpush.msra.mxu2 %v2800_v40  ;;  %v5849_v40 = vld [vmem:[#allocation54_spill] sm:$0xff] }
 0x41d   : > { %2953 = vmatpush.msra.mxu3 %v2765_v46 }
 0x41e   : > { %2768 = vmatpush.msra.mxu0 %v2767_v7  ;;  %2918 = vmatpush.msra.mxu2 %v2806_v33  ;;  %v2802_v62 = vand.u32 4294901760, %v2801_v24  ;;  %v5848_v33 = vld [vmem:[#allocation44_spill] sm:$0xff] }
 0x41f   : > { %2955 = vmatpush.msra.mxu3 %v2767_v7  ;;  %2774 = vmatmul.f32.vlgmr.msra.gmra.mxu0 %v4727_v55  ;;  %v5851_v24 = vld [vmem:[#allocation56_spill] sm:$0xff] }
 0x420   : > { %2845 = vmatpush.msrb.mxu0 %v2799_v31  ;;  %2803 = vmatpush.msra.mxu1 %v2802_v62 }
 0x421   : > { %2922 = vmatpush.msra.mxu2 %v2812_v52  ;;  %3213 = vmatpush.msrb.mxu3 %v4347_v3  ;;  %v5850_v52 = vld [vmem:[#allocation43_spill] sm:$0xff] }
 0x422   : > { %2848 = vmatpush.msrb.mxu0 %v2805_v59  ;;  %2809 = vmatpush.msra.mxu1 %v2808_v41  ;;  %v5845_v59 = vld [vmem:[#allocation40_spill] sm:$0xff] }
 0x423   : > { %2926 = vmatpush.msra.mxu2 %v2818_v61  ;;  %3215 = vmatpush.msrb.mxu3 %v4349_v4  ;;  %v3956_v41 = vld [vmem:[%s4333_s12 + $0x18] sm:$0xff] }
 0x424   : > { %2851 = vmatpush.msrb.mxu0 %v2811_v0  ;;  %2815 = vmatpush.msra.mxu1 %v2814_v13  ;;  %v357_v26 = vmul.f32 %v3956_v41, %v3955_v60  ;;  %v5853_v13 = vld [vmem:[#allocation17_spill] sm:$0xff] }
 0x425   : > { %3145 = vmatpush.msrb.mxu2 %v4361_v14  ;;  %3217 = vmatpush.msrb.mxu3 %v4351_v5  ;;  %v3950_v14 = vld [vmem:[%s4326_s9] sm:$0xff] }
 0x426   : > { %2854 = vmatpush.msrb.mxu0 %v2817_v34  ;;  %2821 = vmatpush.msra.mxu1 %v2820_v6  ;;  %v5854_v6 = vld [vmem:[#allocation57_spill] sm:$0xff] }
 0x427   : > { %2823 = vmatmul.f32.vlgmr.msra.gmra.mxu1 %v4711_v42  ;;  %2782 = vmatmul.f32.gmra.mxu0 %v4737_v49  ;;  %v5882_v60 = vld [vmem:[#allocation85_spill] sm:$0xff] }
 0x428   : > { %2966 = vmatpush.msra.mxu0 %v4347_v3  ;;  %2879 = vmatpush.msrb.mxu1 %v2761_v35  ;;  %v5847_v35 = vld [vmem:[#allocation39_spill] sm:$0xff] }
 0x429   : > { %3148 = vmatpush.msrb.mxu2 %v4364_v15  ;;  %3219 = vmatpush.msrb.mxu3 %v4353_v9  ;;  %v354_v15 = vmul.f32 %v3950_v14, %v5095_v32  ;;  %v5832_v32 = vld [vmem:[#allocation27_spill] sm:$0xff]  ;;  %v5855_v14 = vld [vmem:[#allocation50_spill] sm:$0xff] }
 0x42a   : > { %2968 = vmatpush.msra.mxu0 %v4349_v4  ;;  %2881 = vmatpush.msrb.mxu1 %v2763_v30  ;;  %v3954_v30 = vld [vmem:[%s4333_s12 + $0x10] sm:$0xff] }
 0x42b   : > { %3151 = vmatpush.msrb.mxu2 %v4368_v16  ;;  %3221 = vmatpush.msrb.mxu3 %v4355_v10  ;;  %v5267_v16 = vand.u32 4294901760, %v354_v15 }
 0x42c   : > { %2970 = vmatpush.msra.mxu0 %v4351_v5  ;;  %2883 = vmatpush.msrb.mxu1 %v2765_v46  ;;  %v356_v46 = vmul.f32 %v3954_v30, %v3953_v56  ;;  %v5864_v56 = vld [vmem:[#allocation28_spill] sm:$0xff]  ;;  %v5867_v30 = vld [vmem:[#allocation41_spill] sm:$0xff] }
 0x42d   : > { %2928 = vmatmul.f32.vlgmr.msra.gmra.mxu2 %v4711_v42  ;;  %2957 = vmatmul.f32.vlgmr.msra.gmra.mxu3 %v4711_v42 }
 0x42e   : > { %2972 = vmatpush.msra.mxu0 %v4353_v9  ;;  %3154 = vmatpush.msrb.mxu2 %v4373_v19  ;;  %v5278_v19 = vsub.f32 %v354_v15, %v5267_v16  ;;  %v5317_v31 = vand.u32 4294901760, %v356_v46  ;;  %v5856_v15 = vld [vmem:[#allocation18_spill] sm:$0xff] }
 0x42f   : > { %2885 = vmatpush.msrb.mxu1 %v2767_v7  ;;  %2857 = vmatmul.f32.vlgmr.msrb.gmra.mxu0 %v4714_v45  ;;  %v5844_v7 = vld [vmem:[#allocation35_spill] sm:$0xff] }
 0x430   : > { %2974 = vmatpush.msra.mxu0 %v4355_v10  ;;  %2827 = vmatmul.f32.gmra.mxu1 %v4720_v47  ;;  %v2999_v1 = vand.u32 4294901760, %v5278_v19  ;;  %v3014_v62 = vsub.f32 %v356_v46, %v5317_v31  ;;  %v5874_v46 = vld [vmem:[#allocation66_spill] sm:$0xff] }
 0x431   : > { %3035 = vmatpush.msra.mxu1 %v4423_v37  ;;  %3157 = vmatpush.msrb.mxu2 %v4376_v20  ;;  %v5828_v20 = vld [vmem:[#allocation60_spill] sm:$0xff]  ;;  %v5830_v37 = vld [vmem:[#allocation34_spill] sm:$0xff] }
 0x432   : > { %2976 = vmatpush.msra.mxu0 %v4357_v11  ;;  %3223 = vmatpush.msrb.mxu3 %v4357_v11  ;;  %v3000_v53 = vsub.f32 %v5278_v19, %v2999_v1 }
 0x433   : > { %3041 = vmatpush.msra.mxu1 %v4425_v38  ;;  %3160 = vmatpush.msrb.mxu2 %v4379_v21  ;;  %v5829_v21 = vld [vmem:[#allocation24_spill] sm:$0xff]  ;;  %v3951_v38 = vld [vmem:[%s4326_s9 + $0x8] sm:$0xff]  ;;  %s4097_s9 = scalar_lea.hbm %s5500_s5, 16 }
 0x434   : > { %2978 = vmatpush.msra.mxu0 %v4370_v17  ;;  %3225 = vmatpush.msrb.mxu3 %v4370_v17  ;;  %v3001_v0 = vand.u32 4294901760, %v3000_v53  ;;  %v5863_v53 = vld [vmem:[#allocation26_spill] sm:$0xff]  ;;  %p4099_p10 = scmp.lt.s32.totalorder %s4097_s9, %s4093_s22 }
 0x435   : > { %3047 = vmatpush.msra.mxu1 %v4440_v44  ;;  %3163 = vmatpush.msrb.mxu2 %v4399_v27  ;;  %v3952_v44 = vld [vmem:[%s4333_s12 + $0x8] sm:$0xff] }
 0x436   : > { %2980 = vmatpush.msra.mxu0 %v4381_v22  ;;  %v355_v27 = vmul.f32 %v3952_v44, %v3951_v38  ;;  %3227 = vmatpush.msrb.mxu3 %v4381_v22  ;;  %v3015_v44 = vand.u32 4294901760, %v3014_v62  ;;  %p4100_p9 = por %p4099_p10, %p4098_p2 }
 0x437   : > { %3053 = vmatpush.msra.mxu1 %v4455_v50  ;;  %2862 = vmatmul.f32.gmra.mxu0 %v4725_v8  ;;  %v5831_v50 = vld [vmem:[#allocation22_spill] sm:$0xff] }
 0x438   : > { %2982 = vmatpush.msra.mxu0 %v4401_v28  ;;  %2889 = vmatmul.f32.vlgmr.msrb.gmra.mxu1 %v5828_v20  ;;  %v5295_v36 = vand.u32 4294901760, %v355_v27  ;;  %p4101_p11 = pnand %p4100_p9, %p4096_p8 }
 0x439   : > { %3059 = vmatpush.msra.mxu1 %v4472_v57  ;;  %3166 = vmatpush.msrb.mxu2 %v5831_v50  ;;  %v5833_v57 = vld [vmem:[#allocation38_spill] sm:$0xff]  ;;  %v5858_v50 = vld [vmem:[#allocation19_spill] sm:$0xff] }
 0x43a   : > { %2984 = vmatpush.msra.mxu0 %v5829_v21  ;;  %3229 = vmatpush.msrb.mxu3 %v4401_v28  ;;  %v3006_v12 = vsub.f32 %v355_v27, %v5295_v36  ;;  %v3021_v27 = vand.u32 4294901760, %v357_v26 }
 0x43b   : > { %3065 = vmatpush.msra.mxu1 %v5830_v37  ;;  %3169 = vmatpush.msrb.mxu2 %v5834_v63  ;;  %v5857_v37 = vld [vmem:[#allocation58_spill] sm:$0xff]  ;;  %v5860_v63 = vld [vmem:[#allocation20_spill] sm:$0xff] }
 0x43c   : > { %2986 = vmatpush.msra.mxu0 %v5832_v32  ;;  %2932 = vmatmul.f32.gmra.mxu2 %v4720_v47  ;;  %v3007_v34 = vand.u32 4294901760, %v3006_v12 }
 0x43d   : > { %3071 = vmatpush.msra.mxu1 %v5833_v57  ;;  %3172 = vmatpush.msrb.mxu2 %v5837_v54  ;;  %v5859_v57 = vld [vmem:[#allocation59_spill] sm:$0xff]  ;;  %v5861_v54 = vld [vmem:[#allocation21_spill] sm:$0xff] }
 0x43e   : > { %2988 = vmatpush.msra.mxu0 %v5835_v2  ;;  %2961 = vmatmul.f32.gmra.mxu3 %v4720_v47  ;;  %v3008_v61 = vsub.f32 %v3006_v12, %v3007_v34 }
 0x43f   : > { %3077 = vmatpush.msra.mxu1 %v5836_v29  ;;  %3175 = vmatpush.msrb.mxu2 %v5840_v58  ;;  %v3022_v29 = vsub.f32 %v357_v26, %v3021_v27  ;;  %v5883_v26 = vld [vmem:[#allocation67_spill] sm:$0xff] }
 0x440   : > { %2990 = vmatpush.msra.mxu0 %v5838_v43  ;;  %3231 = vmatpush.msrb.mxu3 %v5829_v21  ;;  %v3009_v38 = vand.u32 4294901760, %v3008_v61  ;;  %v5881_v61 = vld [vmem:[#allocation73_spill] sm:$0xff] }
 0x441   : > { %3083 = vmatpush.msra.mxu1 %v5839_v39  ;;  %3178 = vmatpush.msrb.mxu2 %v5844_v7  ;;  %v5862_v39 = vld [vmem:[#allocation23_spill] sm:$0xff]  ;;  %v3023_v58 = vand.u32 4294901760, %v3022_v29  ;;  %v5876_v7 = vld [vmem:[#allocation78_spill] sm:$0xff] }
 0x442   : > { %2895 = vmatmul.f32.gmra.mxu1 %v5841_v23  ;;  %2992 = vmatpush.msra.mxu0 %v5842_v25 }
 0x443   : > { %3089 = vmatpush.msra.mxu1 %v5843_v48  ;;  %3233 = vmatpush.msrb.mxu3 %v5832_v32  ;;  %v5875_v48 = vld [vmem:[#allocation77_spill] sm:$0xff] }
 0x444   : > { %2994 = vmatpush.msra.mxu0 %v5845_v59  ;;  %3181 = vmatpush.msrb.mxu2 %v5847_v35 }
 0x445   : > { %3095 = vmatpush.msra.mxu1 %v5846_v18  ;;  %3235 = vmatpush.msrb.mxu3 %v5835_v2 }
 0x446   : > { %2996 = vmatpush.msra.mxu0 %v5848_v33  ;;  %3184 = vmatpush.msrb.mxu2 %v5850_v52 }
 0x447   : > { %3101 = vmatpush.msra.mxu1 %v5849_v40  ;;  %3237 = vmatpush.msrb.mxu3 %v5838_v43  ;;  %v5880_v40 = vld [vmem:[#allocation82_spill] sm:$0xff] }
 0x448   : > { %3002 = vmatmul.f32.vlgmr.msra.gmra.mxu0 %v3001_v0  ;;  %3187 = vmatpush.msrb.mxu2 %v5852_v51  ;;  %v5878_v0 = vld [vmem:[#allocation81_spill] sm:$0xff] }
 0x449   : > { %3107 = vmatpush.msra.mxu1 %v5851_v24  ;;  %3239 = vmatpush.msrb.mxu3 %v5842_v25 }
 0x44a   : > { %3272 = vmatpush.msrb.mxu0 %v5853_v13  ;;  %3190 = vmatpush.msrb.mxu2 %v5855_v14  ;;  %v5884_v13 = vld [vmem:[#allocation68_spill] sm:$0xff]  ;;  %v5885_v14 = vld [vmem:[#allocation79_spill] sm:$0xff] }
 0x44b   : > { %3113 = vmatpush.msra.mxu1 %v5854_v6  ;;  %3241 = vmatpush.msrb.mxu3 %v5845_v59  ;;  %v879_v6 = vadd.f32 %v5884_v13, %v5883_v26 }
 0x44c   : > { %3276 = vmatpush.msrb.mxu0 %v5856_v15  ;;  %3193 = vmatmul.f32.vlgmr.msrb.gmra.mxu2 %v5278_v19  ;;  %v3016_v19 = vsub.f32 %v3014_v62, %v3015_v44  ;;  %v5886_v15 = vld [vmem:[#allocation80_spill] sm:$0xff] }
 0x44d   : > { %3119 = vmatpush.msra.mxu1 %v5857_v37  ;;  %3243 = vmatpush.msrb.mxu3 %v5848_v33  ;;  %v1529_v37 = vadd.f32 %v5886_v15, %v5885_v14 }
 0x44e   : > { %3280 = vmatpush.msrb.mxu0 %v5858_v50  ;;  %3247 = vmatmul.f32.vlgmr.msrb.gmra.mxu3 %v2999_v1  ;;  %v3017_v1 = vand.u32 4294901760, %v3016_v19  ;;  %v5888_v50 = vld [vmem:[#allocation83_spill] sm:$0xff] }
 0x44f   : > { %3125 = vmatpush.msra.mxu1 %v5859_v57  ;;  %v1564_v57 = vadd.f32 %v5888_v50, %v1529_v37 }
 0x450   : > { %3284 = vmatpush.msrb.mxu0 %v5860_v63  ;;  %3127 = vmatmul.f32.vlgmr.msra.gmra.mxu1 %v5267_v16 }
 0x451   : > { %3010 = vmatmul.f32.gmra.mxu0 %v3009_v38  ;;  %3351 = vmatpush.msrb.mxu1 %v4347_v3  ;;  %v3024_v3 = vsub.f32 %v3022_v29, %v3023_v58 }
 0x452   : > { %3288 = vmatpush.msrb.mxu0 %v5861_v54 }
 0x453   : > { %3353 = vmatpush.msrb.mxu1 %v4349_v4  ;;  %v5865_v4 = vld [vmem:[#allocation31_spill] sm:$0xff] }
 0x454   : > { %3292 = vmatpush.msrb.mxu0 %v5862_v39  ;;  %3198 = vmatmul.f32.gmra.mxu2 %v3006_v12  ;;  %v3025_v12 = vand.u32 4294901760, %v3024_v3  ;;  %v5890_v39 = vld [vmem:[#allocation86_spill] sm:$0xff] }
 0x455   : > { %3355 = vmatpush.msrb.mxu1 %v4351_v5  ;;  %v5866_v5 = vld [vmem:[#allocation37_spill] sm:$0xff] }
 0x456   : > { %3296 = vmatpush.msrb.mxu0 %v5863_v53  ;;  %3253 = vmatmul.f32.gmra.mxu3 %v3007_v34 }
 0x457   : > { %3357 = vmatpush.msrb.mxu1 %v4353_v9  ;;  %v5868_v9 = vld [vmem:[#allocation45_spill] sm:$0xff] }
 0x458   : > { %3300 = vmatpush.msrb.mxu0 %v5864_v56  ;;  %3131 = vmatmul.f32.gmra.mxu1 %v5295_v36  ;;  %v5891_v56 = vld [vmem:[#allocation72_spill] sm:$0xff] }
 0x459   : > { %3018 = vmatmul.f32.gmra.mxu0 %v3017_v1  ;;  %3359 = vmatpush.msrb.mxu1 %v4355_v10  ;;  %v5869_v10 = vld [vmem:[#allocation48_spill] sm:$0xff] }
 0x45a   : > { %3304 = vmatpush.msrb.mxu0 %v5865_v4  ;;  %v5892_v4 = vld [vmem:[#allocation84_spill] sm:$0xff] }
 0x45b   : > { %3361 = vmatpush.msrb.mxu1 %v4357_v11  ;;  %v5870_v11 = vld [vmem:[#allocation51_spill] sm:$0xff] }
 0x45c   : > { %3308 = vmatpush.msrb.mxu0 %v5866_v5  ;;  %3203 = vmatmul.f32.gmra.mxu2 %v3014_v62  ;;  %v1597_v5 = vadd.f32 %v5892_v4, %v1564_v57 }
 0x45d   : > { %3363 = vmatpush.msrb.mxu1 %v4370_v17  ;;  %v5871_v17 = vld [vmem:[#allocation53_spill] sm:$0xff] }
 0x45e   : > { %3312 = vmatpush.msrb.mxu0 %v5867_v30  ;;  %3259 = vmatmul.f32.gmra.mxu3 %v3015_v44  ;;  %v5887_v44 = vld [vmem:[#allocation71_spill] sm:$0xff] }
 0x45f   : > { %3365 = vmatpush.msrb.mxu1 %v4381_v22  ;;  %v5872_v22 = vld [vmem:[#allocation55_spill] sm:$0xff] }
 0x460   : > { %3316 = vmatpush.msrb.mxu0 %v5868_v9  ;;  %3135 = vmatmul.f32.gmra.mxu1 %v5317_v31 }
 0x461   : > { %3026 = vmatmul.f32.gmra.mxu0 %v3025_v12  ;;  %3367 = vmatpush.msrb.mxu1 %v4401_v28 }
 0x462   : > { %3320 = vmatpush.msrb.mxu0 %v5869_v10 }
 0x463   : > { %3369 = vmatpush.msrb.mxu1 %v5829_v21 }
 0x464   : > { %3324 = vmatpush.msrb.mxu0 %v5870_v11  ;;  %3208 = vmatmul.f32.gmra.mxu2 %v3022_v29  ;;  %v5889_v29 = vld [vmem:[#allocation74_spill] sm:$0xff] }
 0x465   : > { %3371 = vmatpush.msrb.mxu1 %v5832_v32 }
 0x466   : > { %3328 = vmatpush.msrb.mxu0 %v5871_v17  ;;  %3265 = vmatmul.f32.gmra.mxu3 %v3023_v58  ;;  %v5893_v17 = vld [vmem:[#allocation75_spill] sm:$0xff] }
 0x467   : > { %3373 = vmatpush.msrb.mxu1 %v5835_v2 }
 0x468   : > { %3332 = vmatpush.msrb.mxu0 %v5872_v22  ;;  %3139 = vmatmul.f32.gmra.mxu1 %v3021_v27 }
 0x469   : > { %3334 = vmatmul.f32.vlgmr.msrb.gmra.mxu0 %v5267_v16  ;;  %3375 = vmatpush.msrb.mxu1 %v5838_v43  ;;  %v5873_v43 = vld [vmem:[#allocation65_spill] sm:$0xff] }
 0x46b   : > { %3377 = vmatpush.msrb.mxu1 %v5842_v25  ;;  %v875_v25 = vadd.f32 %v5874_v46, %v5873_v43 }
 0x46d   : > { %3379 = vmatpush.msrb.mxu1 %v5845_v59  ;;  %v5877_v59 = vld [vmem:[#allocation69_spill] sm:$0xff] }
 0x46e   : > { %v909_v18 = vadd.f32 %v5877_v59, %v875_v25 }
 0x46f   : > { %3381 = vmatpush.msrb.mxu1 %v5848_v33  ;;  %v5879_v33 = vld [vmem:[#allocation70_spill] sm:$0xff] }
 0x470   : > { %3383 = vmatmul.f32.vlgmr.msrb.gmra.mxu1 %v5267_v16  ;;  %v1525_v16 = vadd.f32 %v5876_v7, %v5875_v48  ;;  %v5896_v48 = vld [vmem:[#allocation76_spill] sm:$0xff] }
 0x471   : > { %3338 = vmatmul.f32.gmra.mxu0 %v5295_v36 }
 0x478   : > { %3387 = vmatmul.f32.gmra.mxu1 %v5295_v36  ;;  %v1559_v36 = vadd.f32 %v5878_v0, %v1525_v16  ;;  %v5897_v16 = vld [vmem:[#allocation88_spill] sm:$0xff] }
 0x479   : > { %3342 = vmatmul.f32.gmra.mxu0 %v5317_v31 }
 0x47a   : > { %v1591_v52 = vadd.f32 %v5880_v40, %v1559_v36  ;;  %v5898_v40 = vld [vmem:[#allocation63_spill] sm:$0xff] }
 0x47c   : > { %v1630_v41 = vadd.f32 %v5882_v60, %v1591_v52 }
 0x47e   : > { %v5397_v1 = vadd.f32 %v5890_v39, %v1630_v41 }
 0x480   : > { %3391 = vmatmul.f32.gmra.mxu1 %v5317_v31  ;;  %v941_v31 = vadd.f32 %v5879_v33, %v909_v18  ;;  %v5407_v10 = vmul.f32 %v5397_v1, %v5397_v1 }
 0x481   : > { %3346 = vmatmul.f32.gmra.mxu0 %v3021_v27 }
 0x482   : > { %v980_v62 = vadd.f32 %v5881_v61, %v941_v31 }
 0x484   : > { %v5394_v54 = vadd.f32 %v5889_v29, %v980_v62 }
 0x486   : > { %v5403_v9 = vmul.f32 %v5394_v54, %v5394_v54 }
 0x488   : > { %3395 = vmatmul.f32.gmra.mxu1 %v3021_v27  ;;  %v914_v27 = vadd.f32 %v5887_v44, %v879_v6 }
 0x48a   : > { %v947_v3 = vadd.f32 %v5891_v56, %v914_v27 }
 0x48c   : > { %v984_v22 = vadd.f32 %v5893_v17, %v947_v3 }
 0x48e   : > { %v5417_v7 = vadd.f32 %v5896_v48, %v984_v22 }
 0x49c   : > { %v2775_v28 = vpop.f32.mrf.mxu0 }
 0x4a4   : > { %v2824_v21 = vpop.f32.mrf.mxu1  ;;  %v2783_v32 = vpop.f32.mrf.mxu0 }
 0x4a5   : > { %v2825_v2 = vadd.f32 %v2824_v21, %v2775_v28  ;;  %v5894_v28 = vld [vmem:[#allocation87_spill] sm:$0xff] }
 0x4a6   : > { %v1634_v21 = vadd.f32 %v5894_v28, %v1597_v5 }
 0x4a8   : > { %v5420_v59 = vadd.f32 %v5897_v16, %v1634_v21 }
 0x4aa   : > { %v5428_v33 = vmul.f32 %v5420_v59, %v5420_v59 }
 0x4ac   : > { %v2858_v34 = vpop.f32.mrf.mxu0 }
 0x4ad   : > { %v2828_v35 = vpop.f32.mrf.mxu1  ;;  %v2859_v51 = vadd.f32 %v2858_v34, %v2825_v2  ;;  %v5424_v34 = vmul.f32 %v5417_v7, %v5417_v7 }
 0x4ae   : > { %v2829_v24 = vadd.f32 %v2828_v35, %v2783_v32  ;;  %v5895_v32 = vld [vmem:[#allocation62_spill] sm:$0xff] }
 0x4af   : > { %v3621_v2 = vsub.f32 %v5895_v32, %v5403_v9  ;;  %v3622_v52 = vsub.f32 %v5898_v40, %v5424_v34 }
 0x4b0   : > { %v2929_v38 = vpop.f32.mrf.mxu2  ;;  %v2958_v12 = vpop.f32.mrf.mxu3 }
 0x4b4   : > { %v2863_v63 = vpop.f32.mrf.mxu0 }
 0x4b5   : > { %v2890_v19 = vpop.f32.mrf.mxu1  ;;  %v2864_v58 = vadd.f32 %v2863_v63, %v2829_v24 }
 0x4b6   : > { %v2891_v53 = vadd.f32 %v2890_v19, %v2859_v51 }
 0x4b8   : > { %v2930_v30 = vadd.f32 %v2929_v38, %v2891_v53 }
 0x4ba   : > { %v2959_v11 = vadd.f32 %v2958_v12, %v2930_v30 }
 0x4bc   : > { %v3623_v43 = vsub.f32 %v2959_v11, %v5407_v10 }
 0x4be   : > { %v5414_v46 = vadd.f32 %v3623_v43, %v3621_v2 }
 0x4bf   : > { %v2896_v25 = vpop.f32.mrf.mxu1  ;;  %v2933_v0 = vpop.f32.mrf.mxu2 }
 0x4c0   : > { %v2897_v18 = vadd.f32 %v2896_v25, %v2864_v58 }
 0x4c1   : > { %v2962_v35 = vpop.f32.mrf.mxu3 }
 0x4c2   : > { %v2934_v36 = vadd.f32 %v2933_v0, %v2897_v18 }
 0x4c4   : > { %v2963_v31 = vadd.f32 %v2962_v35, %v2934_v36 }
 0x4c5   : > { %v3003_v51 = vpop.f32.mrf.mxu0 }
 0x4c6   : > { %v3624_v24 = vsub.f32 %v2963_v31, %v5428_v33 }
 0x4c8   : > { %v5433_v61 = vadd.f32 %v3624_v24, %v3622_v52 }
 0x4cd   : > { %v3128_v62 = vpop.f32.mrf.mxu1 }
 0x4ce   : > { %v3011_v60 = vpop.f32.mrf.mxu0  ;;  %v3129_v53 = vadd.f32 %v3128_v62, %v3003_v51 }
 0x4cf   : > { %v3194_v13 = vpop.f32.mrf.mxu2 }
 0x4d0   : > { %v3195_v5 = vadd.f32 %v3194_v13, %v3129_v53  ;;  %v3637_v53 = vadd.f32 %v5407_v10, %v5403_v9  ;;  %v3619_v10 = vmul.f32 %v5397_v1, %v5394_v54 }
 0x4d1   : > { %v3248_v15 = vpop.f32.mrf.mxu3 }
 0x4d2   : > { %v3249_v21 = vadd.f32 %v3248_v15, %v3195_v5  ;;  %v3627_v1 = vmul.f32 2.0, %v3619_v10 }
 0x4d5   : > { %v3132_v41 = vpop.f32.mrf.mxu1 }
 0x4d6   : > { %v3019_v26 = vpop.f32.mrf.mxu0  ;;  %v3133_v29 = vadd.f32 %v3132_v41, %v3011_v60 }
 0x4d7   : > { %v3199_v44 = vpop.f32.mrf.mxu2 }
 0x4d8   : > { %v3200_v4 = vadd.f32 %v3199_v44, %v3133_v29 }
 0x4d9   : > { %v3254_v27 = vpop.f32.mrf.mxu3 }
 0x4da   : > { %v3255_v17 = vadd.f32 %v3254_v27, %v3200_v4 }
 0x4dd   : > { %v3136_v6 = vpop.f32.mrf.mxu1 }
 0x4de   : > { %v3027_v14 = vpop.f32.mrf.mxu0  ;;  %v3137_v19 = vadd.f32 %v3136_v6, %v3019_v26 }
 0x4df   : > { %v3204_v63 = vpop.f32.mrf.mxu2 }
 0x4e0   : > { %v3205_v56 = vadd.f32 %v3204_v63, %v3137_v19 }
 0x4e1   : > { %v3260_v39 = vpop.f32.mrf.mxu3 }
 0x4e2   : > { %v3261_v12 = vadd.f32 %v3260_v39, %v3205_v56  ;;  %v3639_v56 = vadd.f32 0.0001, %v3637_v53 }
 0x4e5   : > { %v3140_v37 = vpop.f32.mrf.mxu1 }
 0x4e6   : > { %v3335_v38 = vpop.f32.mrf.mxu0  ;;  %v3141_v30 = vadd.f32 %v3140_v37, %v3027_v14 }
 0x4e7   : > { %v3209_v11 = vpop.f32.mrf.mxu2  ;;  %v3336_v48 = vadd.f32 %v3335_v38, %v3249_v21 }
 0x4e8   : > { %v3210_v32 = vadd.f32 %v3209_v11, %v3141_v30 }
 0x4e9   : > { %v3266_v25 = vpop.f32.mrf.mxu3 }
 0x4ea   : > { %v3267_v0 = vadd.f32 %v3266_v25, %v3210_v32 }
 0x4ed   : > { %v3384_v50 = vpop.f32.mrf.mxu1 }
 0x4ee   : > { %v3339_v57 = vpop.f32.mrf.mxu0  ;;  %v3385_v36 = vadd.f32 %v3384_v50, %v3336_v48 }
 0x4ef   : > { %v3340_v2 = vadd.f32 %v3339_v57, %v3255_v17 }
 0x4f0   : > { %v3417_v24 = vand.u32 4294901760, %v3385_v36 }
 0x4f2   : > { %v3467_v26 = vsub.f32 %v3385_v36, %v3417_v24 }
 0x4f4   : > { %v3468_v44 = vand.u32 4294901760, %v3467_v26 }
 0x4f5   : > { %v3388_v58 = vpop.f32.mrf.mxu1 }
 0x4f6   : > { %v3343_v3 = vpop.f32.mrf.mxu0  ;;  %v3389_v16 = vadd.f32 %v3388_v58, %v3340_v2  ;;  %v3469_v63 = vsub.f32 %v3467_v26, %v3468_v44 }
 0x4f7   : > { %v3344_v22 = vadd.f32 %v3343_v3, %v3261_v12 }
 0x4f8   : > { %v3415_v31 = vand.u32 4294901760, %v3389_v16  ;;  %v3470_v29 = vand.u32 4294901760, %v3469_v63 }
 0x4fa   : > { %v3461_v60 = vsub.f32 %v3389_v16, %v3415_v31 }
 0x4fc   : > { %v3462_v15 = vand.u32 4294901760, %v3461_v60 }
 0x4fd   : > { %v3392_v28 = vpop.f32.mrf.mxu1 }
 0x4fe   : > { %v3393_v43 = vadd.f32 %v3392_v28, %v3344_v22  ;;  %v3347_v18 = vpop.f32.mrf.mxu0  ;;  %v3463_v50 = vsub.f32 %v3461_v60, %v3462_v15 }
 0x4ff   : > { %v3348_v40 = vadd.f32 %v3347_v18, %v3267_v0  ;;  %v3620_v18 = vmul.f32 %v5420_v59, %v5417_v7  ;;  %v3657_v7 = vld [vmem:[%s5499_s4] sm:$0x3] }
 0x500   : > { %v3413_v35 = vand.u32 4294901760, %v3393_v43  ;;  %v3464_v19 = vand.u32 4294901760, %v3463_v50  ;;  %v3666_v50 = vrot.slane %v3657_v7, 1 }
 0x502   : > { %v3455_v51 = vsub.f32 %v3393_v43, %v3413_v35 }
 0x504   : > { %v3456_v6 = vand.u32 4294901760, %v3455_v51 }
 0x505   : > { %v3396_v52 = vpop.f32.mrf.mxu1 }
 0x506   : > { %v3397_v62 = vadd.f32 %v3396_v52, %v3348_v40  ;;  %v3457_v38 = vsub.f32 %v3455_v51, %v3456_v6  ;;  %v3662_v52 = vstv %s3661_s24 }
 0x508   : > { %v3411_v41 = vand.u32 4294901760, %v3397_v62  ;;  %v3458_v57 = vand.u32 4294901760, %v3457_v38 }
 0x50a   : > { %v3449_v13 = vsub.f32 %v3397_v62, %v3411_v41  ;;  %3412 = vmatpush.msra.mxu2 %v3411_v41  ;;  %3599 = vmatpush.msra.mxu1 %v3411_v41 }
 0x50c   : > { %v3450_v14 = vand.u32 4294901760, %v3449_v13  ;;  %3414 = vmatpush.msra.mxu2 %v3413_v35  ;;  %3601 = vmatpush.msra.mxu1 %v3413_v35 }
 0x50e   : > { %v3451_v37 = vsub.f32 %v3449_v13, %v3450_v14  ;;  %3416 = vmatpush.msra.mxu2 %v3415_v31  ;;  %3564 = vmatpush.msra.mxu0 %v3450_v14 }
 0x50f   : > { %3603 = vmatpush.msra.mxu1 %v3415_v31 }
 0x510   : > { %3418 = vmatpush.msra.mxu2 %v3417_v24  ;;  %3568 = vmatpush.msra.mxu0 %v3456_v6  ;;  %v3452_v27 = vand.u32 4294901760, %v3451_v37 }
 0x511   : > { %3605 = vmatpush.msra.mxu1 %v3417_v24  ;;  %3424 = vmatmul.f32.vlgmr.msra.gmra.mxu2 %v4727_v55 }
 0x512   : > { %3495 = vmatpush.msrb.mxu2 %v3449_v13  ;;  %3453 = vmatpush.msra.mxu3 %v3452_v27 }
 0x513   : > { %3572 = vmatpush.msra.mxu0 %v3462_v15  ;;  %3607 = vmatmul.f32.vlgmr.msra.gmra.mxu1 %v4711_v42 }
 0x514   : > { %3498 = vmatpush.msrb.mxu2 %v3455_v51  ;;  %3459 = vmatpush.msra.mxu3 %v3458_v57 }
 0x515   : > { %3576 = vmatpush.msra.mxu0 %v3468_v44 }
 0x516   : > { %3501 = vmatpush.msrb.mxu2 %v3461_v60  ;;  %3578 = vmatmul.f32.vlgmr.msra.gmra.mxu0 %v4711_v42 }
 0x517   : > { %3465 = vmatpush.msra.mxu3 %v3464_v19 }
 0x518   : > { %3504 = vmatpush.msrb.mxu2 %v3467_v26 }
 0x519   : > { %3471 = vmatpush.msra.mxu3 %v3470_v29  ;;  %3432 = vmatmul.f32.gmra.mxu2 %v4737_v49  ;;  %v3638_v49 = vadd.f32 %v5428_v33, %v5424_v34 }
 0x51a   : > { %3473 = vmatmul.f32.vlgmr.msra.gmra.mxu3 %v4711_v42 }
 0x51b   : > { %3529 = vmatpush.msrb.mxu3 %v3411_v41  ;;  %3611 = vmatmul.f32.gmra.mxu1 %v4720_v47  ;;  %v3629_v41 = vadd.f32 0.0001, %v3627_v1 }
 0x51d   : > { %3531 = vmatpush.msrb.mxu3 %v3413_v35 }
 0x51e   : > { %3582 = vmatmul.f32.gmra.mxu0 %v4720_v47 }
 0x51f   : > { %3533 = vmatpush.msrb.mxu3 %v3415_v31 }
 0x521   : > { %3535 = vmatpush.msrb.mxu3 %v3417_v24  ;;  %3507 = vmatmul.f32.vlgmr.msrb.gmra.mxu2 %v4714_v45  ;;  %v3644_v45 = vadd.f32 0.0009, %v5433_v61  ;;  %v3658_v61 = vlaneseq  ;;  %v3628_v24 = vmul.f32 2.0, %v3620_v18 }
 0x522   : > { %3477 = vmatmul.f32.gmra.mxu3 %v4720_v47  ;;  %v3643_v47 = vadd.f32 0.0009, %v5414_v46 }
 0x523   : > { %v3659_v25 = vshrl.u32 %v3658_v61, 7  ;;  %v3630_v59 = vadd.f32 0.0001, %v3628_v24 }
 0x525   : > { %v3660_v40 = vcvt.s32.f32 %v3659_v25 }
 0x527   : > { %v3663_v6 = vadd.f32 %v3662_v52, %v3660_v40 }
 0x529   : > { %3512 = vmatmul.f32.gmra.mxu2 %v4725_v8  ;;  %v3640_v8 = vadd.f32 0.0001, %v3638_v49  ;;  %v3664_v27 = vmul.f32 4.0, %v3663_v6 }
 0x52a   : > { %3539 = vmatmul.f32.vlgmr.msrb.gmra.mxu3 %v5828_v20 }
 0x52b   : > { %v3646_v12 = vmul.f32 %v3644_v45, %v3640_v8  ;;  %v3668_v29 = vadd.f32 %v3666_v50, %v3664_v27 }
 0x52d   : > { %vm3669_vm1 = vcmp.lt.f32.partialorder %v3668_v29, 8.0 }
 0x532   : > { %3545 = vmatmul.f32.gmra.mxu3 %v5841_v23  ;;  %v3645_v23 = vmul.f32 %v3643_v47, %v3639_v56 }
 0x534   : > { %3941 = vrcp.f32 %v3645_v23 }
 0x535   : > { %3943 = vrcp.f32 %v3646_v12 }
 0x53a   : > { %v3942_v2 = vpop.eup %3941 }
 0x53b   : > { %v3944_v48 = vpop.eup %3943  ;;  %v3649_v54 = vmul.f32 %v3942_v2, %v3645_v23 }
 0x53c   : > { %v3650_v35 = vmul.f32 %v3944_v48, %v3646_v12 }
 0x53d   : > { %v3651_v60 = vsub.f32 2.0, %v3649_v54 }
 0x53e   : > { %v3652_v26 = vsub.f32 2.0, %v3650_v35 }
 0x53f   : > { %v3653_v37 = vmul.f32 %v3942_v2, %v3651_v60 }
 0x540   : > { %v3654_v44 = vmul.f32 %v3944_v48, %v3652_v26 }
 0x590   : > { %v3608_v11 = vpop.f32.mrf.mxu1 }
 0x593   : > { %v3579_v4 = vpop.f32.mrf.mxu0 }
 0x594   : > { %v3425_v42 = vpop.f32.mrf.mxu2 }
 0x598   : > { %v3612_v16 = vpop.f32.mrf.mxu1 }
 0x59b   : > { %v3583_v32 = vpop.f32.mrf.mxu0 }
 0x59c   : > { %v3433_v39 = vpop.f32.mrf.mxu2 }
 0x59d   : > { %v3474_v55 = vpop.f32.mrf.mxu3 }
 0x59e   : > { %v3475_v20 = vadd.f32 %v3474_v55, %v3425_v42 }
 0x5a4   : > { %v3508_v3 = vpop.f32.mrf.mxu2 }
 0x5a5   : > { %v3478_v58 = vpop.f32.mrf.mxu3  ;;  %v3509_v5 = vadd.f32 %v3508_v3, %v3475_v20 }
 0x5a6   : > { %v3479_v46 = vadd.f32 %v3478_v58, %v3433_v39  ;;  %v4161_v58 = vmov 0.0  }
 0x5a7   : > { %v3670_v53 = vsel %vm3669_vm1, 1.0, %v4161_v58 }
 0x5a8   : > { %v3671_v47 = vmul.f32 %v3670_v53, %v3657_v7 }
 0x5ac   : > { %v3513_v33 = vpop.f32.mrf.mxu2 }
 0x5ad   : > { %v3540_v30 = vpop.f32.mrf.mxu3  ;;  %v3514_v28 = vadd.f32 %v3513_v33, %v3479_v46 }
 0x5ae   : > { %v3541_v17 = vadd.f32 %v3540_v30, %v3509_v5 }
 0x5b0   : > { %v3580_v9 = vadd.f32 %v3579_v4, %v3541_v17 }
 0x5b2   : > { %v3609_v34 = vadd.f32 %v3608_v11, %v3580_v9 }
 0x5b4   : > { %v3625_v22 = vsub.f32 %v3609_v34, %v3619_v10 }
 0x5b5   : > { %v3546_v21 = vpop.f32.mrf.mxu3 }
 0x5b6   : > { %v3547_v43 = vadd.f32 %v3546_v21, %v3514_v28  ;;  %v3631_v0 = vmul.f32 2.0, %v3625_v22 }
 0x5b8   : > { %v3584_v36 = vadd.f32 %v3583_v32, %v3547_v43  ;;  %v3633_v51 = vadd.f32 0.0009, %v3631_v0 }
 0x5ba   : > { %v3613_v31 = vadd.f32 %v3612_v16, %v3584_v36  ;;  %v3635_v14 = vmul.f32 %v3633_v51, %v3629_v41 }
 0x5bc   : > { %v3626_v62 = vsub.f32 %v3613_v31, %v3620_v18  ;;  %v3655_v57 = vmul.f32 %v3653_v37, %v3635_v14 }
 0x5be   : > { %v3632_v13 = vmul.f32 2.0, %v3626_v62 }
 0x5c0   : > { %v3634_v15 = vadd.f32 0.0009, %v3632_v13 }
 0x5c2   : > { %v3636_v38 = vmul.f32 %v3634_v15, %v3630_v59 }
 0x5c4   : > { %v3656_v63 = vmul.f32 %v3654_v44, %v3636_v38 }
 0x5c6   : > { %v3672_v19 = vadd.f32 %v3656_v63, %v3655_v57 }
 0x5c8   : > { %v3673_v42 = vrot.slane %v3672_v19, 4 }
 0x5ca   : > { %v3674_v55 = vadd.f32 %v3673_v42, %v3672_v19 }
 0x5cc   : > { %v3675_v39 = vrot.slane %v3674_v55, 2 }
 0x5ce   : > { %v3676_v49 = vadd.f32 %v3675_v39, %v3674_v55 }
 0x5d0   : > { %v3677_v45 = vrot.slane %v3676_v49, 1 }
 0x5d2   : > { %v3678_v56 = vadd.f32 %v3677_v45, %v3676_v49 }
 0x5d4   : > { %v3679_v20 = vmul.f32 %v3678_v56, %v3671_v47 }
 0x5d6   : > { %v3681_v3 = vperm.slane %v3679_v20, 0 }
 0x5d8   : > { %3682 = vst [vmem:[%s319_s3] sm:$0xff] %v3681_v3 }
 0x5d9   : > { %4104 = shalt.err (!%p4101_p11)
}
 0x5da   : > { %3878 = dma.vmem_to_hbm [thread:$0]  (%p4264_p3), %s3697_s30, 128, %s3699_s8, %s3684_s16  }
 0x5db PF: > { %s3710_s27 = sand.u32 1, %s4143_s18   ;;  %p5899_p12 = scmp.ge.s32.totalorder %s4155_s21, 2 }
 0x5dc   : > { %s3711_s12 = scalar_lea.sflag [#allocation4], %s3710_s27 }
 0x5dd   : > { %p3895_p13 = pnand %p5899_p12, %p4227_p6 }
 0x5df   : > { %p3896_p0 = pneg %p3895_p13 }
 0x5e1   : > { %4138 = dma.done.wait (%p3896_p0), %s3711_s12, 128  }
 0x5e2   : > { %4140 = vsyncadd (%p3896_p0), %s3711_s12, 4294967168  ;;  %s5900_s24 = sld [smem:[#allocation16_spill]]  ;;  %p22_p5 = scmp.ge.s32.totalorder %s4254_s14, 4  }
 0x5e3   : > { %s5901_s18 = smov %s4147_s19  ;;  %s5902_s19 = smov %s4151_s20 }
 0x5e4   : > { %s5904_s21 = smov %s4254_s14  ;;  %24 = sbr.rel (!%p22_p5) target bundleno = 12 (0xc), region = 106 }
 0x5e8   : > { %s5903_s20 = smov %s5900_s24 }
 0x5e9   :  { %3717 = vsyncpa [#allocation3], 1 }
 0x5ea   :  { %3719 = vsyncpa [#allocation3 + $0x1], 1 }
 0x5eb   :  { %3720 = vsyncpa [#allocation6], 1 }
 0x5ec   :  { %3722 = vsyncpa [#allocation6 + $0x1], 1 }
 0x5ed   :  { %3723 = vsyncpa [#allocation9], 1 }
 0x5ee   :  { %3724 = vsyncpa [#allocation4], 1 }
 0x5ef   :  { %3726 = vsyncpa [#allocation4 + $0x1], 1 }

</bundles_post_ra>
